<compile_context>
chip_gen: v5e
topology: v5e:2x2
jax: 0.10.0
libtpu: 0.0.40
codegen_flags: <defaults>
</compile_context>

<pallas_src>
import functools

import jax
import jax.numpy as jnp
from jax import lax
from jax.experimental import pallas as pl
from jax.experimental.pallas import tpu as pltpu

HIDDEN_MLP_DIM = 300
PROJECTION_DIM = 300
PARAM_STD = 0.01

# Lane-aligned (multiple-of-128) padded feature sizes.
D_PAD = 384
H_PAD = 384
# Max batch items per grid step in the fused kernel (stacked M up to 16*16=256).
BT_MAX = 16

_VMEM_LIMIT = 32 * 1024 * 1024  # explicit budget; safe on v5e/v6e/v7x


def _round_up(x, m):
    return (x + m - 1) // m * m


def _cdiv(a, b):
    return -(-a // b)


# ----------------------------------------------------------------------------
# In-kernel helpers
# ----------------------------------------------------------------------------
def _mm(a, b):
    # bf16 x bf16 matmul with f32 accumulation on the MXU.
    return jnp.dot(a.astype(jnp.bfloat16), b, preferred_element_type=jnp.float32)


# ----------------------------------------------------------------------------
# Kernel 1: fused f_func + decomposable attention + g_func + sum over sequence.
#   Grid is over tiles of BT batch items; weights are grid-invariant blocks.
#   g's 600-wide input is realized as x @ g_w1a (hoisted, stacked rows) +
#   lincom @ g_w1b (stacked rows) -- no concat of [sent, lincom] materialized.
# ----------------------------------------------------------------------------
def fused_kernel(s1_ref, s2_ref,
                 fw1_ref, fb1_ref, fw2_ref, fb2_ref,
                 gw1a_ref, gw1b_ref, gb1_ref, gw2_ref, gb2_ref,
                 v1_ref, v2_ref, *, l1, l2):
    bt, l1p, dp = s1_ref.shape
    _, l2p, _ = s2_ref.shape
    hp = fw1_ref.shape[1]
    n1 = bt * l1p
    n2 = bt * l2p

    s1 = s1_ref[...]                                   # (bt, l1p, dp) f32
    s2 = s2_ref[...]                                   # (bt, l2p, dp) f32

    # ---- token-parallel part: f_func MLP and the attention-independent half
    # ---- of g's first layer, on the stacked (bt*(l1p+l2p), dp) token matrix.
    x = jnp.concatenate([s1.reshape(n1, dp), s2.reshape(n2, dp)], axis=0)
    xb = x.astype(jnp.bfloat16)
    h = jnp.maximum(_mm(xb, fw1_ref[...]) + fb1_ref[...], 0.0)
    f = jnp.maximum(_mm(h, fw2_ref[...]) + fb2_ref[...], 0.0)
    pa = _mm(xb, gw1a_ref[...])                        # x @ g_w1a (hoisted)

    f1 = f[:n1].reshape(bt, l1p, hp).astype(jnp.bfloat16)
    f2 = f[n1:].reshape(bt, l2p, hp).astype(jnp.bfloat16)

    # ---- attention scores (batched over the bt items of this grid step).
    e_kq = jnp.einsum("bkh,bqh->bkq", f2, f1,
                      preferred_element_type=jnp.float32)   # (bt, l2p, l1p)
    e_qk = jnp.einsum("bqh,bkh->bqk", f1, f2,
                      preferred_element_type=jnp.float32)   # (bt, l1p, l2p)

    # Mask padded positions out of the softmax *normalizations* (they run over
    # the sublane axis below).  Padded columns are harmless: they multiply the
    # zero-padded rows of s1/s2 in the lincom matmuls.
    if l2p != l2:
        kmask = lax.broadcasted_iota(jnp.int32, (bt, l2p, l1p), 1) < l2
        e_kq = jnp.where(kmask, e_kq, jnp.float32(-1e30))
    if l1p != l1:
        qmask = lax.broadcasted_iota(jnp.int32, (bt, l1p, l2p), 1) < l1
        e_qk = jnp.where(qmask, e_qk, jnp.float32(-1e30))

    def softmax_over_rows(e):          # softmax over axis 1; exact division
        m = jnp.max(e, axis=1, keepdims=True)
        z = jnp.exp(e - m)
        return z / jnp.sum(z, axis=1, keepdims=True)

    # a_t[b, q, k] == softmax(eij, dim=q)[b, k, q]  (PyTorch softmax_eij^T)
    # b_t[b, k, q] == softmax(eji, dim=k)[b, q, k]  (PyTorch softmax_eji^T)
    a_t = softmax_over_rows(e_qk).astype(jnp.bfloat16)      # (bt, l1p, l2p)
    b_t = softmax_over_rows(e_kq).astype(jnp.bfloat16)      # (bt, l2p, l1p)

    s1b = s1.astype(jnp.bfloat16)
    s2b = s2.astype(jnp.bfloat16)
    lin2 = jnp.einsum("bqk,bkd->bqd", a_t, s2b,
                      preferred_element_type=jnp.float32)   # sent2_lincom
    lin1 = jnp.einsum("bkq,bqd->bkd", b_t, s1b,
                      preferred_element_type=jnp.float32)   # sent1_lincom

    # ---- g_func MLP on stacked rows; layer 1 = pa + lin @ g_w1b + bias.
    lin = jnp.concatenate([lin2.reshape(n1, dp), lin1.reshape(n2, dp)], axis=0)
    h1 = jnp.maximum(pa + _mm(lin, gw1b_ref[...]) + gb1_ref[...], 0.0)
    g = jnp.maximum(_mm(h1, gw2_ref[...]) + gb2_ref[...], 0.0)

    # ---- sum over the sequence axis (padded rows zeroed first), one
    # ---- unmasked full-block store per output.
    g1 = g[:n1].reshape(bt, l1p, hp)
    g2 = g[n1:].reshape(bt, l2p, hp)
    if l1p != l1:
        m1 = lax.broadcasted_iota(jnp.int32, (bt, l1p, hp), 1) < l1
        g1 = jnp.where(m1, g1, 0.0)
    if l2p != l2:
        m2 = lax.broadcasted_iota(jnp.int32, (bt, l2p, hp), 1) < l2
        g2 = jnp.where(m2, g2, 0.0)
    v1_ref[...] = jnp.sum(g1, axis=1).reshape(1, bt, hp)
    v2_ref[...] = jnp.sum(g2, axis=1).reshape(1, bt, hp)


def fused_attention(s1p, s2p, pp, *, bt, l1, l2):
    b_pad, l1p, dp = s1p.shape
    _, l2p, _ = s2p.shape
    hp = H_PAD
    num_steps = b_pad // bt
    kernel = functools.partial(fused_kernel, l1=l1, l2=l2)
    return pl.pallas_call(
        kernel,
        grid=(num_steps,),
        in_specs=[
            pl.BlockSpec((bt, l1p, dp), lambda i: (i, 0, 0)),
            pl.BlockSpec((bt, l2p, dp), lambda i: (i, 0, 0)),
            pl.BlockSpec((dp, hp), lambda i: (0, 0)),    # f_w1 (bf16)
            pl.BlockSpec((1, hp), lambda i: (0, 0)),     # f_b1 (f32)
            pl.BlockSpec((hp, hp), lambda i: (0, 0)),    # f_w2
            pl.BlockSpec((1, hp), lambda i: (0, 0)),     # f_b2
            pl.BlockSpec((dp, hp), lambda i: (0, 0)),    # g_w1a
            pl.BlockSpec((dp, hp), lambda i: (0, 0)),    # g_w1b
            pl.BlockSpec((1, hp), lambda i: (0, 0)),     # g_b1
            pl.BlockSpec((hp, hp), lambda i: (0, 0)),    # g_w2
            pl.BlockSpec((1, hp), lambda i: (0, 0)),     # g_b2
        ],
        out_specs=[
            pl.BlockSpec((1, bt, hp), lambda i: (i, 0, 0)),
            pl.BlockSpec((1, bt, hp), lambda i: (i, 0, 0)),
        ],
        out_shape=[
            jax.ShapeDtypeStruct((num_steps, bt, hp), jnp.float32),
            jax.ShapeDtypeStruct((num_steps, bt, hp), jnp.float32),
        ],
        compiler_params=pltpu.CompilerParams(
            dimension_semantics=("parallel",),
            vmem_limit_bytes=_VMEM_LIMIT),
    )(s1p, s2p, pp["f_w1"], pp["f_b1"], pp["f_w2"], pp["f_b2"],
      pp["g_w1a"], pp["g_w1b"], pp["g_b1"], pp["g_w2"], pp["g_b2"])


# ----------------------------------------------------------------------------
# Kernel 2: fused tail = h_func (600->300->300 via split h_w1) + final linear
#           + masked log_softmax over a lane-dense (128-wide) padded class dim.
# ----------------------------------------------------------------------------
def tail_kernel(v1_ref, v2_ref, hw1a_ref, hw1b_ref, hb1_ref, hw2_ref, hb2_ref,
                ow_ref, ob_ref, o_ref, *, label_count):
    z = (_mm(v1_ref[...], hw1a_ref[...]) + _mm(v2_ref[...], hw1b_ref[...])
         + hb1_ref[...])
    h = jnp.maximum(z, 0.0)
    h = jnp.maximum(_mm(h, hw2_ref[...]) + hb2_ref[...], 0.0)

    logits = _mm(h, ow_ref[...]) + ob_ref[...]                  # (B, C_PAD)
    col = lax.broadcasted_iota(jnp.int32, logits.shape, 1)
    logits = jnp.where(col < label_count, logits, jnp.float32(-1e30))

    m = jnp.max(logits, axis=-1, keepdims=True)
    zc = logits - m
    lse = jnp.log(jnp.sum(jnp.exp(zc), axis=-1, keepdims=True))
    o_ref[...] = zc - lse


def tail(v1, v2, hw1a, hw1b, hb1, hw2, hb2, ow, ob, *, label_count):
    bp = v1.shape[0]
    c_pad = ow.shape[1]
    return pl.pallas_call(
        functools.partial(tail_kernel, label_count=label_count),
        out_shape=jax.ShapeDtypeStruct((bp, c_pad), jnp.float32),
        compiler_params=pltpu.CompilerParams(vmem_limit_bytes=_VMEM_LIMIT),
    )(v1, v2, hw1a, hw1b, hb1, hw2, hb2, ow, ob)


# ----------------------------------------------------------------------------
# Parameters: logical (PyTorch-shaped, f32) params + zero-padded / split / bf16
# versions actually consumed by the Pallas kernels (biases kept f32).
# ----------------------------------------------------------------------------
def init_params(key, label_count):
    ks = jax.random.split(key, 14)
    n = lambda k, shape: (PARAM_STD * jax.random.normal(k, shape)).astype(jnp.float32)
    H, D = HIDDEN_MLP_DIM, PROJECTION_DIM
    return {
        "f_w1": n(ks[0], (D, H)),       "f_b1": n(ks[1], (1, H)),
        "f_w2": n(ks[2], (H, H)),       "f_b2": n(ks[3], (1, H)),
        "g_w1": n(ks[4], (2 * D, H)),   "g_b1": n(ks[5], (1, H)),
        "g_w2": n(ks[6], (H, H)),       "g_b2": n(ks[7], (1, H)),
        "h_w1": n(ks[8], (2 * H, H)),   "h_b1": n(ks[9], (1, H)),
        "h_w2": n(ks[10], (H, H)),      "h_b2": n(ks[11], (1, H)),
        "o_w": n(ks[12], (H, label_count)), "o_b": n(ks[13], (1, label_count)),
    }


def pad_params(p, label_count):
    def padw(w, rows, cols):   # matmul operands -> bf16 (zero pads stay zero)
        return jnp.pad(w, ((0, rows - w.shape[0]),
                           (0, cols - w.shape[1]))).astype(jnp.bfloat16)

    def padb(b, cols):         # biases (added after the f32 accumulate) -> f32
        return jnp.pad(b, ((0, 0), (0, cols - b.shape[1]))).astype(jnp.float32)

    D, H = PROJECTION_DIM, HIDDEN_MLP_DIM
    c_pad = _round_up(max(label_count, 1), 128)
    return {
        "f_w1": padw(p["f_w1"], D_PAD, H_PAD), "f_b1": padb(p["f_b1"], H_PAD),
        "f_w2": padw(p["f_w2"], H_PAD, H_PAD), "f_b2": padb(p["f_b2"], H_PAD),
        "g_w1a": padw(p["g_w1"][:D], D_PAD, H_PAD),
        "g_w1b": padw(p["g_w1"][D:], D_PAD, H_PAD),
        "g_b1": padb(p["g_b1"], H_PAD),
        "g_w2": padw(p["g_w2"], H_PAD, H_PAD), "g_b2": padb(p["g_b2"], H_PAD),
        "h_w1a": padw(p["h_w1"][:H], H_PAD, H_PAD),
        "h_w1b": padw(p["h_w1"][H:], H_PAD, H_PAD),
        "h_b1": padb(p["h_b1"], H_PAD),
        "h_w2": padw(p["h_w2"], H_PAD, H_PAD), "h_b2": padb(p["h_b2"], H_PAD),
        "o_w": padw(p["o_w"], H_PAD, c_pad), "o_b": padb(p["o_b"], c_pad),
    }


# ----------------------------------------------------------------------------
# Full forward (glue is plain JAX: zero-padding, reshapes, slices).
# ----------------------------------------------------------------------------
def decomp_atten_forward(pp, sent1, sent2, label_count):
    B, L1, D = sent1.shape
    _, L2, _ = sent2.shape
    L1p = _round_up(L1, 8)
    L2p = _round_up(L2, 8)

    # Balanced batch tiling: >= 2 grid steps whenever B >= 2 (2 TCs on v7x),
    # per-step BT up to BT_MAX (stacked matmul M up to BT*(L1p+L2p) rows).
    target_steps = max(2, _cdiv(B, BT_MAX))
    bt = max(1, _cdiv(B, target_steps))
    num_steps = _cdiv(B, bt)
    b_pad = num_steps * bt

    s1p = jnp.pad(sent1, ((0, b_pad - B), (0, L1p - L1), (0, D_PAD - D)))
    s2p = jnp.pad(sent2, ((0, b_pad - B), (0, L2p - L2), (0, D_PAD - D)))

    # Fused f_func + attention + g_func + sum-over-sequence.
    v1, v2 = fused_attention(s1p, s2p, pp, bt=bt, l1=L1, l2=L2)
    v1 = v1.reshape(b_pad, H_PAD)
    v2 = v2.reshape(b_pad, H_PAD)

    # Fused h_func + final linear + log_softmax.
    logp = tail(v1, v2, pp["h_w1a"], pp["h_w1b"], pp["h_b1"], pp["h_w2"],
                pp["h_b2"], pp["o_w"], pp["o_b"], label_count=label_count)

    return logp[:B, :label_count]


# ----------------------------------------------------------------------------
# Pure-JAX f32 reference (uses the logical, unpadded parameters).
# ----------------------------------------------------------------------------
def decomp_atten_reference(params, sent1, sent2):
    p = params
    B, L1, _ = sent1.shape
    _, L2, _ = sent2.shape
    mlp = lambda x, w1, b1, w2, b2: jnp.maximum(
        jnp.maximum(x @ w1 + b1, 0.0) @ w2 + b2, 0.0)
    f1 = mlp(sent1.reshape(-1, PROJECTION_DIM),
             p["f_w1"], p["f_b1"], p["f_w2"], p["f_b2"]).reshape(B, L1, -1)
    f2 = mlp(sent2.reshape(-1, PROJECTION_DIM),
             p["f_w1"], p["f_b1"], p["f_w2"], p["f_b2"]).reshape(B, L2, -1)
    eij = jnp.einsum("bkh,bqh->bkq", f2, f1)                 # (B, L2, L1)
    alpha = jax.nn.softmax(eij, axis=2)
    sent2_lincom = jnp.einsum("bkq,bkd->bqd", alpha, sent2)  # (B, L1, D)
    beta = jax.nn.softmax(jnp.swapaxes(eij, 1, 2), axis=2)   # (B, L1, L2)
    sent1_lincom = jnp.einsum("bqk,bqd->bkd", beta, sent1)   # (B, L2, D)
    s1c = jnp.concatenate([sent1, sent2_lincom], axis=2)
    s2c = jnp.concatenate([sent2, sent1_lincom], axis=2)
    g1 = mlp(s1c.reshape(-1, 2 * PROJECTION_DIM),
             p["g_w1"], p["g_b1"], p["g_w2"], p["g_b2"]).reshape(B, L1, -1)
    g2 = mlp(s2c.reshape(-1, 2 * PROJECTION_DIM),
             p["g_w1"], p["g_b1"], p["g_w2"], p["g_b2"]).reshape(B, L2, -1)
    v = jnp.concatenate([g1.sum(1), g2.sum(1)], axis=1)
    h = mlp(v, p["h_w1"], p["h_b1"], p["h_w2"], p["h_b2"])
    logits = h @ p["o_w"] + p["o_b"]
    return jax.nn.log_softmax(logits, axis=1)


if __name__ == "__main__":
    LABEL_COUNT = 3
    B, L1, L2 = 2, 8, 6

    key = jax.random.PRNGKey(0)
    kp, k1, k2 = jax.random.split(key, 3)
    params = init_params(kp, LABEL_COUNT)
    padded = pad_params(params, LABEL_COUNT)
    sent1 = jax.random.normal(k1, (B, L1, PROJECTION_DIM), dtype=jnp.float32)
    sent2 = jax.random.normal(k2, (B, L2, PROJECTION_DIM), dtype=jnp.float32)

    fwd = jax.jit(lambda pp, a, b: decomp_atten_forward(pp, a, b, LABEL_COUNT))
    out = jax.block_until_ready(fwd(padded, sent1, sent2))

    ref = decomp_atten_reference(params, sent1, sent2)
    assert out.shape == (B, LABEL_COUNT)
    # bf16 MXU operands (f32 accumulation) => tolerance relaxed vs f32 reference.
    assert bool(jnp.allclose(out, ref, atol=2e-3, rtol=2e-3)), "mismatch vs reference"

    print("KERNEL_OK")
</pallas_src>

<mosaic_0001>
module attributes {stable_mosaic.version = 11 : i64} {
  func.func @fused_kernel(%arg0: i32, %arg1: memref<1x8x384xf32, #tpu.memory_space<vmem>>, %arg2: memref<1x8x384xf32, #tpu.memory_space<vmem>>, %arg3: memref<384x384xbf16, #tpu.memory_space<vmem>>, %arg4: memref<1x384xf32, #tpu.memory_space<vmem>>, %arg5: memref<384x384xbf16, #tpu.memory_space<vmem>>, %arg6: memref<1x384xf32, #tpu.memory_space<vmem>>, %arg7: memref<384x384xbf16, #tpu.memory_space<vmem>>, %arg8: memref<384x384xbf16, #tpu.memory_space<vmem>>, %arg9: memref<1x384xf32, #tpu.memory_space<vmem>>, %arg10: memref<384x384xbf16, #tpu.memory_space<vmem>>, %arg11: memref<1x384xf32, #tpu.memory_space<vmem>>, %arg12: memref<1x1x384xf32, #tpu.memory_space<vmem>>, %arg13: memref<1x1x384xf32, #tpu.memory_space<vmem>>) attributes {dimension_semantics = [#tpu.dimension_semantics<parallel>], iteration_bounds = array<i64: 2>, scalar_prefetch = 0 : i64, scratch_operands = 0 : i64, tpu.core_type = #tpu.core_type<tc>, window_params = [{transform_indices = @transform_0, window_bounds = array<i64: 1, 8, 384>}, {transform_indices = @transform_1, window_bounds = array<i64: 1, 8, 384>}, {pipeline_mode = #tpu.pipeline_mode<synchronous>, transform_indices = @transform_2, window_bounds = array<i64: 384, 384>}, {pipeline_mode = #tpu.pipeline_mode<synchronous>, transform_indices = @transform_3, window_bounds = array<i64: 1, 384>}, {pipeline_mode = #tpu.pipeline_mode<synchronous>, transform_indices = @transform_4, window_bounds = array<i64: 384, 384>}, {pipeline_mode = #tpu.pipeline_mode<synchronous>, transform_indices = @transform_5, window_bounds = array<i64: 1, 384>}, {pipeline_mode = #tpu.pipeline_mode<synchronous>, transform_indices = @transform_6, window_bounds = array<i64: 384, 384>}, {pipeline_mode = #tpu.pipeline_mode<synchronous>, transform_indices = @transform_7, window_bounds = array<i64: 384, 384>}, {pipeline_mode = #tpu.pipeline_mode<synchronous>, transform_indices = @transform_8, window_bounds = array<i64: 1, 384>}, {pipeline_mode = #tpu.pipeline_mode<synchronous>, transform_indices = @transform_9, window_bounds = array<i64: 384, 384>}, {pipeline_mode = #tpu.pipeline_mode<synchronous>, transform_indices = @transform_10, window_bounds = array<i64: 1, 384>}, {transform_indices = @transform_11, window_bounds = array<i64: 1, 1, 384>}, {transform_indices = @transform_12, window_bounds = array<i64: 1, 1, 384>}]} {
    %c0 = arith.constant 0 : index
    %c0_0 = arith.constant 0 : index
    %c0_1 = arith.constant 0 : index
    %0 = vector.load %arg1[%c0, %c0_0, %c0_1] : memref<1x8x384xf32, #tpu.memory_space<vmem>>, vector<1x8x384xf32>
    %c0_2 = arith.constant 0 : index
    %c0_3 = arith.constant 0 : index
    %c0_4 = arith.constant 0 : index
    %1 = vector.load %arg2[%c0_2, %c0_3, %c0_4] : memref<1x8x384xf32, #tpu.memory_space<vmem>>, vector<1x8x384xf32>
    %2 = vector.shape_cast %0 : vector<1x8x384xf32> to vector<8x384xf32>
    %3 = vector.shape_cast %1 : vector<1x8x384xf32> to vector<8x384xf32>
    %4 = tpu.concatenate %2, %3 in 0 : vector<8x384xf32>, vector<8x384xf32> -> vector<16x384xf32>
    %5 = arith.truncf %4 : vector<16x384xf32> to vector<16x384xbf16>
    %c0_5 = arith.constant 0 : index
    %c0_6 = arith.constant 0 : index
    %6 = vector.load %arg3[%c0_5, %c0_6] : memref<384x384xbf16, #tpu.memory_space<vmem>>, vector<384x384xbf16>
    %cst = arith.constant dense<0.000000e+00> : vector<16x384xf32>
    %7 = tpu.matmul %5, %6, %cst {dimension_numbers = #tpu.dot_dimension_numbers<[1], [0], [0], [1], [0, 0, 1, 1], [], []>} : vector<16x384xbf16>, vector<384x384xbf16>, vector<16x384xf32> -> vector<16x384xf32>
    %c0_7 = arith.constant 0 : index
    %c0_8 = arith.constant 0 : index
    %8 = vector.load %arg4[%c0_7, %c0_8] : memref<1x384xf32, #tpu.memory_space<vmem>>, vector<1x384xf32>
    %9 = vector.broadcast %8 : vector<1x384xf32> to vector<16x384xf32>
    %10 = arith.addf %7, %9 : vector<16x384xf32>
    %cst_9 = arith.constant 0.000000e+00 : f32
    %11 = vector.broadcast %cst_9 : f32 to vector<16x384xf32>
    %12 = arith.maximumf %10, %11 : vector<16x384xf32>
    %c0_10 = arith.constant 0 : index
    %c0_11 = arith.constant 0 : index
    %13 = vector.load %arg5[%c0_10, %c0_11] : memref<384x384xbf16, #tpu.memory_space<vmem>>, vector<384x384xbf16>
    %14 = arith.truncf %12 : vector<16x384xf32> to vector<16x384xbf16>
    %cst_12 = arith.constant dense<0.000000e+00> : vector<16x384xf32>
    %15 = tpu.matmul %14, %13, %cst_12 {dimension_numbers = #tpu.dot_dimension_numbers<[1], [0], [0], [1], [0, 0, 1, 1], [], []>} : vector<16x384xbf16>, vector<384x384xbf16>, vector<16x384xf32> -> vector<16x384xf32>
    %c0_13 = arith.constant 0 : index
    %c0_14 = arith.constant 0 : index
    %16 = vector.load %arg6[%c0_13, %c0_14] : memref<1x384xf32, #tpu.memory_space<vmem>>, vector<1x384xf32>
    %17 = vector.broadcast %16 : vector<1x384xf32> to vector<16x384xf32>
    %18 = arith.addf %15, %17 : vector<16x384xf32>
    %cst_15 = arith.constant 0.000000e+00 : f32
    %19 = vector.broadcast %cst_15 : f32 to vector<16x384xf32>
    %20 = arith.maximumf %18, %19 : vector<16x384xf32>
    %c0_16 = arith.constant 0 : index
    %c0_17 = arith.constant 0 : index
    %21 = vector.load %arg7[%c0_16, %c0_17] : memref<384x384xbf16, #tpu.memory_space<vmem>>, vector<384x384xbf16>
    %cst_18 = arith.constant dense<0.000000e+00> : vector<16x384xf32>
    %22 = tpu.matmul %5, %21, %cst_18 {dimension_numbers = #tpu.dot_dimension_numbers<[1], [0], [0], [1], [0, 0, 1, 1], [], []>} : vector<16x384xbf16>, vector<384x384xbf16>, vector<16x384xf32> -> vector<16x384xf32>
    %23 = vector.extract_strided_slice %20 {offsets = [0, 0], sizes = [8, 384], strides = [1, 1]} : vector<16x384xf32> to vector<8x384xf32>
    %24 = vector.shape_cast %23 : vector<8x384xf32> to vector<1x8x384xf32>
    %25 = arith.truncf %24 : vector<1x8x384xf32> to vector<1x8x384xbf16>
    %26 = vector.extract_strided_slice %20 {offsets = [8, 0], sizes = [8, 384], strides = [1, 1]} : vector<16x384xf32> to vector<8x384xf32>
    %27 = vector.shape_cast %26 : vector<8x384xf32> to vector<1x8x384xf32>
    %28 = arith.truncf %27 : vector<1x8x384xf32> to vector<1x8x384xbf16>
    "tpu.trace_start"() <{level = 10 : i32, message = "bkh,bqh->bkq"}> : () -> ()
    %cst_19 = arith.constant dense<0.000000e+00> : vector<1x8x8xf32>
    %29 = tpu.matmul %28, %25, %cst_19 {dimension_numbers = #tpu.dot_dimension_numbers<[2], [2], [1], [1], [0, 0, 0, 1, 1, 1], [0], [0]>} : vector<1x8x384xbf16>, vector<1x8x384xbf16>, vector<1x8x8xf32> -> vector<1x8x8xf32>
    "tpu.trace_stop"() : () -> ()
    "tpu.trace_start"() <{level = 10 : i32, message = "bqh,bkh->bqk"}> : () -> ()
    %cst_20 = arith.constant dense<0.000000e+00> : vector<1x8x8xf32>
    %30 = tpu.matmul %25, %28, %cst_20 {dimension_numbers = #tpu.dot_dimension_numbers<[2], [2], [1], [1], [0, 0, 0, 1, 1, 1], [0], [0]>} : vector<1x8x384xbf16>, vector<1x8x384xbf16>, vector<1x8x8xf32> -> vector<1x8x8xf32>
    "tpu.trace_stop"() : () -> ()
    %31 = tpu.iota {dimensions = array<i32: 1>} : vector<1x8x8xi32>
    %c6_i32 = arith.constant 6 : i32
    %32 = vector.broadcast %c6_i32 : i32 to vector<1x8x8xi32>
    %33 = arith.cmpi slt, %31, %32 : vector<1x8x8xi32>
    %cst_21 = arith.constant -1.000000e+30 : f32
    %34 = vector.broadcast %cst_21 : f32 to vector<1x8x8xf32>
    %35 = arith.select %33, %29, %34 : vector<1x8x8xi1>, vector<1x8x8xf32>
    %cst_22 = arith.constant dense<0xFF800000> : vector<1x8xf32>
    %36 = vector.multi_reduction <maximumf>, %30, %cst_22 [1] : vector<1x8x8xf32> to vector<1x8xf32>
    %37 = vector.shape_cast %36 : vector<1x8xf32> to vector<1x1x8xf32>
    %38 = vector.broadcast %37 : vector<1x1x8xf32> to vector<1x8x8xf32>
    %39 = arith.subf %30, %38 : vector<1x8x8xf32>
    %40 = math.exp %39 : vector<1x8x8xf32>
    %cst_23 = arith.constant dense<0.000000e+00> : vector<1x8xf32>
    %41 = vector.multi_reduction <add>, %40, %cst_23 [1] : vector<1x8x8xf32> to vector<1x8xf32>
    %42 = vector.shape_cast %41 : vector<1x8xf32> to vector<1x1x8xf32>
    %43 = vector.broadcast %42 : vector<1x1x8xf32> to vector<1x8x8xf32>
    %44 = arith.divf %40, %43 : vector<1x8x8xf32>
    %45 = arith.truncf %44 : vector<1x8x8xf32> to vector<1x8x8xbf16>
    %cst_24 = arith.constant dense<0xFF800000> : vector<1x8xf32>
    %46 = vector.multi_reduction <maximumf>, %35, %cst_24 [1] : vector<1x8x8xf32> to vector<1x8xf32>
    %47 = vector.shape_cast %46 : vector<1x8xf32> to vector<1x1x8xf32>
    %48 = vector.broadcast %47 : vector<1x1x8xf32> to vector<1x8x8xf32>
    %49 = arith.subf %35, %48 : vector<1x8x8xf32>
    %50 = math.exp %49 : vector<1x8x8xf32>
    %cst_25 = arith.constant dense<0.000000e+00> : vector<1x8xf32>
    %51 = vector.multi_reduction <add>, %50, %cst_25 [1] : vector<1x8x8xf32> to vector<1x8xf32>
    %52 = vector.shape_cast %51 : vector<1x8xf32> to vector<1x1x8xf32>
    %53 = vector.broadcast %52 : vector<1x1x8xf32> to vector<1x8x8xf32>
    %54 = arith.divf %50, %53 : vector<1x8x8xf32>
    %55 = arith.truncf %54 : vector<1x8x8xf32> to vector<1x8x8xbf16>
    %56 = arith.truncf %0 : vector<1x8x384xf32> to vector<1x8x384xbf16>
    %57 = arith.truncf %1 : vector<1x8x384xf32> to vector<1x8x384xbf16>
    "tpu.trace_start"() <{level = 10 : i32, message = "bqk,bkd->bqd"}> : () -> ()
    %cst_26 = arith.constant dense<0.000000e+00> : vector<1x8x384xf32>
    %58 = tpu.matmul %45, %57, %cst_26 {dimension_numbers = #tpu.dot_dimension_numbers<[2], [1], [1], [2], [0, 0, 0, 1, 1, 2], [0], [0]>} : vector<1x8x8xbf16>, vector<1x8x384xbf16>, vector<1x8x384xf32> -> vector<1x8x384xf32>
    "tpu.trace_stop"() : () -> ()
    "tpu.trace_start"() <{level = 10 : i32, message = "bkq,bqd->bkd"}> : () -> ()
    %cst_27 = arith.constant dense<0.000000e+00> : vector<1x8x384xf32>
    %59 = tpu.matmul %55, %56, %cst_27 {dimension_numbers = #tpu.dot_dimension_numbers<[2], [1], [1], [2], [0, 0, 0, 1, 1, 2], [0], [0]>} : vector<1x8x8xbf16>, vector<1x8x384xbf16>, vector<1x8x384xf32> -> vector<1x8x384xf32>
    "tpu.trace_stop"() : () -> ()
    %60 = vector.shape_cast %58 : vector<1x8x384xf32> to vector<8x384xf32>
    %61 = vector.shape_cast %59 : vector<1x8x384xf32> to vector<8x384xf32>
    %62 = tpu.concatenate %60, %61 in 0 : vector<8x384xf32>, vector<8x384xf32> -> vector<16x384xf32>
    %c0_28 = arith.constant 0 : index
    %c0_29 = arith.constant 0 : index
    %63 = vector.load %arg8[%c0_28, %c0_29] : memref<384x384xbf16, #tpu.memory_space<vmem>>, vector<384x384xbf16>
    %64 = arith.truncf %62 : vector<16x384xf32> to vector<16x384xbf16>
    %cst_30 = arith.constant dense<0.000000e+00> : vector<16x384xf32>
    %65 = tpu.matmul %64, %63, %cst_30 {dimension_numbers = #tpu.dot_dimension_numbers<[1], [0], [0], [1], [0, 0, 1, 1], [], []>} : vector<16x384xbf16>, vector<384x384xbf16>, vector<16x384xf32> -> vector<16x384xf32>
    %66 = arith.addf %22, %65 : vector<16x384xf32>
    %c0_31 = arith.constant 0 : index
    %c0_32 = arith.constant 0 : index
    %67 = vector.load %arg9[%c0_31, %c0_32] : memref<1x384xf32, #tpu.memory_space<vmem>>, vector<1x384xf32>
    %68 = vector.broadcast %67 : vector<1x384xf32> to vector<16x384xf32>
    %69 = arith.addf %66, %68 : vector<16x384xf32>
    %cst_33 = arith.constant 0.000000e+00 : f32
    %70 = vector.broadcast %cst_33 : f32 to vector<16x384xf32>
    %71 = arith.maximumf %69, %70 : vector<16x384xf32>
    %c0_34 = arith.constant 0 : index
    %c0_35 = arith.constant 0 : index
    %72 = vector.load %arg10[%c0_34, %c0_35] : memref<384x384xbf16, #tpu.memory_space<vmem>>, vector<384x384xbf16>
    %73 = arith.truncf %71 : vector<16x384xf32> to vector<16x384xbf16>
    %cst_36 = arith.constant dense<0.000000e+00> : vector<16x384xf32>
    %74 = tpu.matmul %73, %72, %cst_36 {dimension_numbers = #tpu.dot_dimension_numbers<[1], [0], [0], [1], [0, 0, 1, 1], [], []>} : vector<16x384xbf16>, vector<384x384xbf16>, vector<16x384xf32> -> vector<16x384xf32>
    %c0_37 = arith.constant 0 : index
    %c0_38 = arith.constant 0 : index
    %75 = vector.load %arg11[%c0_37, %c0_38] : memref<1x384xf32, #tpu.memory_space<vmem>>, vector<1x384xf32>
    %76 = vector.broadcast %75 : vector<1x384xf32> to vector<16x384xf32>
    %77 = arith.addf %74, %76 : vector<16x384xf32>
    %cst_39 = arith.constant 0.000000e+00 : f32
    %78 = vector.broadcast %cst_39 : f32 to vector<16x384xf32>
    %79 = arith.maximumf %77, %78 : vector<16x384xf32>
    %80 = vector.extract_strided_slice %79 {offsets = [0, 0], sizes = [8, 384], strides = [1, 1]} : vector<16x384xf32> to vector<8x384xf32>
    %81 = vector.shape_cast %80 : vector<8x384xf32> to vector<1x8x384xf32>
    %82 = vector.extract_strided_slice %79 {offsets = [8, 0], sizes = [8, 384], strides = [1, 1]} : vector<16x384xf32> to vector<8x384xf32>
    %83 = vector.shape_cast %82 : vector<8x384xf32> to vector<1x8x384xf32>
    %84 = tpu.iota {dimensions = array<i32: 1>} : vector<1x8x384xi32>
    %c6_i32_40 = arith.constant 6 : i32
    %85 = vector.broadcast %c6_i32_40 : i32 to vector<1x8x384xi32>
    %86 = arith.cmpi slt, %84, %85 : vector<1x8x384xi32>
    %cst_41 = arith.constant 0.000000e+00 : f32
    %87 = vector.broadcast %cst_41 : f32 to vector<1x8x384xf32>
    %88 = arith.select %86, %83, %87 : vector<1x8x384xi1>, vector<1x8x384xf32>
    %cst_42 = arith.constant dense<0.000000e+00> : vector<1x384xf32>
    %89 = vector.multi_reduction <add>, %81, %cst_42 [1] : vector<1x8x384xf32> to vector<1x384xf32>
    %90 = vector.shape_cast %89 : vector<1x384xf32> to vector<1x1x384xf32>
    %c0_43 = arith.constant 0 : index
    %c0_44 = arith.constant 0 : index
    %c0_45 = arith.constant 0 : index
    %91 = vector.load %arg12[%c0_43, %c0_44, %c0_45] : memref<1x1x384xf32, #tpu.memory_space<vmem>>, vector<1x1x384xf32>
    tpu.vector_store %arg12[%c0_43, %c0_44, %c0_45], %90 {strides = array<i32>} : memref<1x1x384xf32, #tpu.memory_space<vmem>>, vector<1x1x384xf32>,
    %cst_46 = arith.constant dense<0.000000e+00> : vector<1x384xf32>
    %92 = vector.multi_reduction <add>, %88, %cst_46 [1] : vector<1x8x384xf32> to vector<1x384xf32>
    %93 = vector.shape_cast %92 : vector<1x384xf32> to vector<1x1x384xf32>
    %c0_47 = arith.constant 0 : index
    %c0_48 = arith.constant 0 : index
    %c0_49 = arith.constant 0 : index
    %94 = vector.load %arg13[%c0_47, %c0_48, %c0_49] : memref<1x1x384xf32, #tpu.memory_space<vmem>>, vector<1x1x384xf32>
    tpu.vector_store %arg13[%c0_47, %c0_48, %c0_49], %93 {strides = array<i32>} : memref<1x1x384xf32, #tpu.memory_space<vmem>>, vector<1x1x384xf32>,
    return
  }
  func.func @transform_0(%arg0: i32) -> (i32, i32, i32) {
    %c0_i32 = arith.constant 0 : i32
    %c0_i32_0 = arith.constant 0 : i32
    %c0_i32_1 = arith.constant 0 : i32
    return %arg0, %c0_i32, %c0_i32_0 : i32, i32, i32
  }
  func.func @transform_1(%arg0: i32) -> (i32, i32, i32) {
    %c0_i32 = arith.constant 0 : i32
    %c0_i32_0 = arith.constant 0 : i32
    %c0_i32_1 = arith.constant 0 : i32
    return %arg0, %c0_i32, %c0_i32_0 : i32, i32, i32
  }
  func.func @transform_2(%arg0: i32) -> (i32, i32) {
    %c0_i32 = arith.constant 0 : i32
    %c0_i32_0 = arith.constant 0 : i32
    %c0_i32_1 = arith.constant 0 : i32
    return %c0_i32, %c0_i32_0 : i32, i32
  }
  func.func @transform_3(%arg0: i32) -> (i32, i32) {
    %c0_i32 = arith.constant 0 : i32
    %c0_i32_0 = arith.constant 0 : i32
    %c0_i32_1 = arith.constant 0 : i32
    return %c0_i32, %c0_i32_0 : i32, i32
  }
  func.func @transform_4(%arg0: i32) -> (i32, i32) {
    %c0_i32 = arith.constant 0 : i32
    %c0_i32_0 = arith.constant 0 : i32
    %c0_i32_1 = arith.constant 0 : i32
    return %c0_i32, %c0_i32_0 : i32, i32
  }
  func.func @transform_5(%arg0: i32) -> (i32, i32) {
    %c0_i32 = arith.constant 0 : i32
    %c0_i32_0 = arith.constant 0 : i32
    %c0_i32_1 = arith.constant 0 : i32
    return %c0_i32, %c0_i32_0 : i32, i32
  }
  func.func @transform_6(%arg0: i32) -> (i32, i32) {
    %c0_i32 = arith.constant 0 : i32
    %c0_i32_0 = arith.constant 0 : i32
    %c0_i32_1 = arith.constant 0 : i32
    return %c0_i32, %c0_i32_0 : i32, i32
  }
  func.func @transform_7(%arg0: i32) -> (i32, i32) {
    %c0_i32 = arith.constant 0 : i32
    %c0_i32_0 = arith.constant 0 : i32
    %c0_i32_1 = arith.constant 0 : i32
    return %c0_i32, %c0_i32_0 : i32, i32
  }
  func.func @transform_8(%arg0: i32) -> (i32, i32) {
    %c0_i32 = arith.constant 0 : i32
    %c0_i32_0 = arith.constant 0 : i32
    %c0_i32_1 = arith.constant 0 : i32
    return %c0_i32, %c0_i32_0 : i32, i32
  }
  func.func @transform_9(%arg0: i32) -> (i32, i32) {
    %c0_i32 = arith.constant 0 : i32
    %c0_i32_0 = arith.constant 0 : i32
    %c0_i32_1 = arith.constant 0 : i32
    return %c0_i32, %c0_i32_0 : i32, i32
  }
  func.func @transform_10(%arg0: i32) -> (i32, i32) {
    %c0_i32 = arith.constant 0 : i32
    %c0_i32_0 = arith.constant 0 : i32
    %c0_i32_1 = arith.constant 0 : i32
    return %c0_i32, %c0_i32_0 : i32, i32
  }
  func.func @transform_11(%arg0: i32) -> (i32, i32, i32) {
    %c0_i32 = arith.constant 0 : i32
    %c0_i32_0 = arith.constant 0 : i32
    %c0_i32_1 = arith.constant 0 : i32
    return %arg0, %c0_i32, %c0_i32_0 : i32, i32, i32
  }
  func.func @transform_12(%arg0: i32) -> (i32, i32, i32) {
    %c0_i32 = arith.constant 0 : i32
    %c0_i32_0 = arith.constant 0 : i32
    %c0_i32_1 = arith.constant 0 : i32
    return %arg0, %c0_i32, %c0_i32_0 : i32, i32, i32
  }
}

module attributes {stable_mosaic.version = 11 : i64} {
  func.func @tail_kernel(%arg0: memref<2x384xf32, #tpu.memory_space<vmem>>, %arg1: memref<2x384xf32, #tpu.memory_space<vmem>>, %arg2: memref<384x384xbf16, #tpu.memory_space<vmem>>, %arg3: memref<384x384xbf16, #tpu.memory_space<vmem>>, %arg4: memref<1x384xf32, #tpu.memory_space<vmem>>, %arg5: memref<384x384xbf16, #tpu.memory_space<vmem>>, %arg6: memref<1x384xf32, #tpu.memory_space<vmem>>, %arg7: memref<384x128xbf16, #tpu.memory_space<vmem>>, %arg8: memref<1x128xf32, #tpu.memory_space<vmem>>, %arg9: memref<2x128xf32, #tpu.memory_space<vmem>>) attributes {dimension_semantics = [], scalar_prefetch = 0 : i64, scratch_operands = 0 : i64, tpu.core_type = #tpu.core_type<tc>} {
    %c0 = arith.constant 0 : index
    %c0_0 = arith.constant 0 : index
    %0 = vector.load %arg0[%c0, %c0_0] : memref<2x384xf32, #tpu.memory_space<vmem>>, vector<2x384xf32>
    %c0_1 = arith.constant 0 : index
    %c0_2 = arith.constant 0 : index
    %1 = vector.load %arg2[%c0_1, %c0_2] : memref<384x384xbf16, #tpu.memory_space<vmem>>, vector<384x384xbf16>
    %2 = arith.truncf %0 : vector<2x384xf32> to vector<2x384xbf16>
    %cst = arith.constant dense<0.000000e+00> : vector<2x384xf32>
    %3 = tpu.matmul %2, %1, %cst {dimension_numbers = #tpu.dot_dimension_numbers<[1], [0], [0], [1], [0, 0, 1, 1], [], []>} : vector<2x384xbf16>, vector<384x384xbf16>, vector<2x384xf32> -> vector<2x384xf32>
    %c0_3 = arith.constant 0 : index
    %c0_4 = arith.constant 0 : index
    %4 = vector.load %arg1[%c0_3, %c0_4] : memref<2x384xf32, #tpu.memory_space<vmem>>, vector<2x384xf32>
    %c0_5 = arith.constant 0 : index
    %c0_6 = arith.constant 0 : index
    %5 = vector.load %arg3[%c0_5, %c0_6] : memref<384x384xbf16, #tpu.memory_space<vmem>>, vector<384x384xbf16>
    %6 = arith.truncf %4 : vector<2x384xf32> to vector<2x384xbf16>
    %cst_7 = arith.constant dense<0.000000e+00> : vector<2x384xf32>
    %7 = tpu.matmul %6, %5, %cst_7 {dimension_numbers = #tpu.dot_dimension_numbers<[1], [0], [0], [1], [0, 0, 1, 1], [], []>} : vector<2x384xbf16>, vector<384x384xbf16>, vector<2x384xf32> -> vector<2x384xf32>
    %8 = arith.addf %3, %7 : vector<2x384xf32>
    %c0_8 = arith.constant 0 : index
    %c0_9 = arith.constant 0 : index
    %9 = vector.load %arg4[%c0_8, %c0_9] : memref<1x384xf32, #tpu.memory_space<vmem>>, vector<1x384xf32>
    %10 = vector.broadcast %9 : vector<1x384xf32> to vector<2x384xf32>
    %11 = arith.addf %8, %10 : vector<2x384xf32>
    %cst_10 = arith.constant 0.000000e+00 : f32
    %12 = vector.broadcast %cst_10 : f32 to vector<2x384xf32>
    %13 = arith.maximumf %11, %12 : vector<2x384xf32>
    %c0_11 = arith.constant 0 : index
    %c0_12 = arith.constant 0 : index
    %14 = vector.load %arg5[%c0_11, %c0_12] : memref<384x384xbf16, #tpu.memory_space<vmem>>, vector<384x384xbf16>
    %15 = arith.truncf %13 : vector<2x384xf32> to vector<2x384xbf16>
    %cst_13 = arith.constant dense<0.000000e+00> : vector<2x384xf32>
    %16 = tpu.matmul %15, %14, %cst_13 {dimension_numbers = #tpu.dot_dimension_numbers<[1], [0], [0], [1], [0, 0, 1, 1], [], []>} : vector<2x384xbf16>, vector<384x384xbf16>, vector<2x384xf32> -> vector<2x384xf32>
    %c0_14 = arith.constant 0 : index
    %c0_15 = arith.constant 0 : index
    %17 = vector.load %arg6[%c0_14, %c0_15] : memref<1x384xf32, #tpu.memory_space<vmem>>, vector<1x384xf32>
    %18 = vector.broadcast %17 : vector<1x384xf32> to vector<2x384xf32>
    %19 = arith.addf %16, %18 : vector<2x384xf32>
    %cst_16 = arith.constant 0.000000e+00 : f32
    %20 = vector.broadcast %cst_16 : f32 to vector<2x384xf32>
    %21 = arith.maximumf %19, %20 : vector<2x384xf32>
    %c0_17 = arith.constant 0 : index
    %c0_18 = arith.constant 0 : index
    %22 = vector.load %arg7[%c0_17, %c0_18] : memref<384x128xbf16, #tpu.memory_space<vmem>>, vector<384x128xbf16>
    %23 = arith.truncf %21 : vector<2x384xf32> to vector<2x384xbf16>
    %cst_19 = arith.constant dense<0.000000e+00> : vector<2x128xf32>
    %24 = tpu.matmul %23, %22, %cst_19 {dimension_numbers = #tpu.dot_dimension_numbers<[1], [0], [0], [1], [0, 0, 1, 1], [], []>} : vector<2x384xbf16>, vector<384x128xbf16>, vector<2x128xf32> -> vector<2x128xf32>
    %c0_20 = arith.constant 0 : index
    %c0_21 = arith.constant 0 : index
    %25 = vector.load %arg8[%c0_20, %c0_21] : memref<1x128xf32, #tpu.memory_space<vmem>>, vector<1x128xf32>
    %26 = vector.broadcast %25 : vector<1x128xf32> to vector<2x128xf32>
    %27 = arith.addf %24, %26 : vector<2x128xf32>
    %28 = tpu.iota {dimensions = array<i32: 1>} : vector<2x128xi32>
    %c3_i32 = arith.constant 3 : i32
    %29 = vector.broadcast %c3_i32 : i32 to vector<2x128xi32>
    %30 = arith.cmpi slt, %28, %29 : vector<2x128xi32>
    %cst_22 = arith.constant -1.000000e+30 : f32
    %31 = vector.broadcast %cst_22 : f32 to vector<2x128xf32>
    %32 = arith.select %30, %27, %31 : vector<2x128xi1>, vector<2x128xf32>
    %cst_23 = arith.constant dense<0xFF800000> : vector<2xf32>
    %33 = vector.multi_reduction <maximumf>, %32, %cst_23 [1] : vector<2x128xf32> to vector<2xf32>
    %34 = vector.shape_cast %33 : vector<2xf32> to vector<2x1xf32>
    %35 = vector.broadcast %34 : vector<2x1xf32> to vector<2x128xf32>
    %36 = arith.subf %32, %35 : vector<2x128xf32>
    %37 = math.exp %36 : vector<2x128xf32>
    %cst_24 = arith.constant dense<0.000000e+00> : vector<2xf32>
    %38 = vector.multi_reduction <add>, %37, %cst_24 [1] : vector<2x128xf32> to vector<2xf32>
    %39 = vector.shape_cast %38 : vector<2xf32> to vector<2x1xf32>
    %40 = math.log %39 : vector<2x1xf32>
    %41 = vector.broadcast %40 : vector<2x1xf32> to vector<2x128xf32>
    %42 = arith.subf %36, %41 : vector<2x128xf32>
    %c0_25 = arith.constant 0 : index
    %c0_26 = arith.constant 0 : index
    %43 = vector.load %arg9[%c0_25, %c0_26] : memref<2x128xf32, #tpu.memory_space<vmem>>, vector<2x128xf32>
    tpu.vector_store %arg9[%c0_25, %c0_26], %42 {strides = array<i32>} : memref<2x128xf32, #tpu.memory_space<vmem>>, vector<2x128xf32>,
    return
  }
}

</mosaic_0001>

<bundles_post_ra>
// kernel: _lambda_.3
= control target key start
LH: loop header
LB: loop body
LE: loop exit
PB: predicated region body
PF: predicated region fallthrough
CT: control target
= control target key end

     0   :  { %14 = vsyncpa [#allocation3], 0  ;;  %s3721_s0 = inlined_call_operand.vmem [shape: f32[2,384], index: 0, kind: input, shape index: {}]   ;;  %s3722_s1 = inlined_call_operand.vmem [shape: f32[2,384], index: 1, kind: input, shape index: {}]   ;;  %s3723_s2 = inlined_call_operand.hbm [shape: bf16[384,384], index: 2, kind: input, shape index: {}]   ;;  %s3724_s3 = inlined_call_operand.hbm [shape: bf16[384,384], index: 3, kind: input, shape index: {}]   ;;  %s3725_s4 = inlined_call_operand.vmem [shape: f32[1,384], index: 4, kind: input, shape index: {}]   ;;  %s3726_s5 = inlined_call_operand.hbm [shape: bf16[384,384], index: 5, kind: input, shape index: {}]   ;;  %s3727_s6 = inlined_call_operand.vmem [shape: f32[1,384], index: 6, kind: input, shape index: {}]   ;;  %s3728_s7 = inlined_call_operand.hbm [shape: bf16[384,128], index: 7, kind: input, shape index: {}]   ;;  %s3729_s8 = inlined_call_operand.vmem [shape: f32[1,128], index: 8, kind: input, shape index: {}]   ;;  %s3730_s9 = inlined_call_operand.hbm [shape: f32[2,128], index: 9, kind: output, shape index: {}]  }
   0x1   :  { %15 = vsyncpa [#allocation6], 0 }
   0x2   :  { %16 = vsyncpa [#allocation9], 0 }
   0x3   :  { %17 = vsyncpa [#allocation4], 0  ;;  %s39_s11 = sshll.u32 %s3724_s3, 4  ;;  %s3556_s12 = smov [#allocation5]   ;;  %s40_s11 = int_to_ptr.hbm [resolvable:$true] %s39_s11 }
   0x4   :  { %s41_s13 = sshll.u32 %s3556_s12, 4  ;;  %s26_s16 = sshll.u32 %s3723_s2, 4  ;;  %s42_s13 = int_to_ptr.vmem [resolvable:$true] %s41_s13  ;;  %s27_s16 = int_to_ptr.hbm [resolvable:$true] %s26_s16 }
   0x5   :  { %s3557_s17 = smov 192   ;;  %s3558_s18 = smov 12  }
   0x6   :  { %47 = dma.hbm_to_vmem [thread:$0]  %s40_s11, 9216, %s42_s13, [#allocation6], %s3557_s17, %s3557_s17, %s3558_s18  }
   0x7   :  { %s3559_s19 = smov [#allocation2]   ;;  %s54_s23 = sshll.u32 %s3726_s5, 4  ;;  %s55_s23 = int_to_ptr.hbm [resolvable:$true] %s54_s23 }
   0x8   :  { %s28_s20 = sshll.u32 %s3559_s19, 4  ;;  %s69_s25 = sshll.u32 %s3728_s7, 4  ;;  %s29_s20 = int_to_ptr.vmem [resolvable:$true] %s28_s20  ;;  %s70_s25 = int_to_ptr.hbm [resolvable:$true] %s69_s25 }
   0x9   :  { %34 = dma.hbm_to_vmem [thread:$0]  %s27_s16, 9216, %s29_s20, [#allocation3], %s3557_s17, %s3557_s17, %s3558_s18  }
   0xa   :  { %s3560_s26 = smov [#allocation7]   ;;  %s3561_s2 = smov [#allocation8]  }
   0xb   :  { %s56_s27 = sshll.u32 %s3560_s26, 4  ;;  %s71_s28 = sshll.u32 %s3561_s2, 4  ;;  %s57_s27 = int_to_ptr.vmem [resolvable:$true] %s56_s27  ;;  %s72_s28 = int_to_ptr.vmem [resolvable:$true] %s71_s28 }
   0xc   :  { %62 = dma.hbm_to_vmem [thread:$0]  %s55_s23, 9216, %s57_s27, [#allocation6], %s3557_s17, %s3557_s17, %s3558_s18  }
   0xd   :  { %s3562_s29 = smov 64   ;;  %s3563_s30 = smov 4  }
   0xe   :  { %77 = dma.hbm_to_vmem [thread:$0]  %s70_s25, 3072, %s72_s28, [#allocation9], %s3562_s29, %s3562_s29, %s3563_s30  }
   0xf   :  { %3548 = dma.done.wait [#allocation3], 9216  }
  0x10   :  { %3549 = vsyncadd [#allocation3], 4294958080 }
  0x11   :  { %3550 = dma.done.wait [#allocation6], 18432  }
  0x12   :  { %3551 = vsyncadd [#allocation6], 4294948864 }
  0x13   :  { %3552 = dma.done.wait [#allocation9], 3072  }
  0x14   :  { %3553 = vsyncadd [#allocation9], 4294964224  ;;  %v2300_v0 = vld [vmem:[#allocation5 + $0xa8] sm:$0xf]  ;;  %v3268_v1 = vld [vmem:[#allocation5 + $0xb0] sm:$0xf0] }
  0x15   :  { %v2396_v2 = vld [vmem:[#allocation5 + $0x168] sm:$0xf]  ;;  %v2301_v3 = vor.u32 %v3268_v1, %v2300_v0  ;;  %v3292_v4 = vld [vmem:[#allocation5 + $0x170] sm:$0xf0]  ;;  %v3267_v9 = vld [vmem:[#allocation5 + $0xac] sm:$0xf] }
  0x16   :  { %v2492_v5 = vld [vmem:[#allocation5 + $0x228] sm:$0xf]  ;;  %v3316_v6 = vld [vmem:[#allocation5 + $0x230] sm:$0xf0]  ;;  %v2397_v7 = vor.u32 %v3292_v4, %v2396_v2  ;;  %v2302_v10 = vld [vmem:[#allocation5 + $0xb4] sm:$0xf0] }
  0x17   :  { %v2493_v8 = vor.u32 %v3316_v6, %v2492_v5  ;;  %v2288_v11 = vld [vmem:[#allocation5 + $0x90] sm:$0xf]  ;;  %696 = vmatpush.bf16.msra.mxu0 %v2301_v3  ;;  %v2305_v12 = vor.u32 %v3267_v9, %v2302_v10  ;;  %v3265_v13 = vld [vmem:[#allocation5 + $0x98] sm:$0xf0]  ;;  %v3264_v20 = vld [vmem:[#allocation5 + $0x94] sm:$0xf] }
  0x18   :  { %v2384_v14 = vld [vmem:[#allocation5 + $0x150] sm:$0xf]  ;;  %v3289_v15 = vld [vmem:[#allocation5 + $0x158] sm:$0xf0]  ;;  %709 = vmatpush.bf16.msra.mxu1 %v2397_v7  ;;  %v2289_v16 = vor.u32 %v3265_v13, %v2288_v11  ;;  %v2290_v22 = vld [vmem:[#allocation5 + $0x9c] sm:$0xf0] }
  0x19   :  { %722 = vmatpush.bf16.msra.mxu2 %v2493_v8  ;;  %v2385_v17 = vor.u32 %v3289_v15, %v2384_v14  ;;  %v2480_v18 = vld [vmem:[#allocation5 + $0x210] sm:$0xf]  ;;  %v3313_v19 = vld [vmem:[#allocation5 + $0x218] sm:$0xf0]  ;;  %735 = vmatpush.bf16.msra.mxu3 %v2305_v12  ;;  %v2276_v23 = vld [vmem:[#allocation5 + $0x78] sm:$0xf]  ;;  %v2293_v25 = vor.u32 %v3264_v20, %v2290_v22 }
  0x1a   :  { %v2481_v21 = vor.u32 %v3313_v19, %v2480_v18  ;;  %v3262_v24 = vld [vmem:[#allocation5 + $0x80] sm:$0xf0]  ;;  %v2372_v26 = vld [vmem:[#allocation5 + $0x138] sm:$0xf]  ;;  %v3261_v31 = vld [vmem:[#allocation5 + $0x7c] sm:$0xf] }
  0x1b   :  { %v3286_v27 = vld [vmem:[#allocation5 + $0x140] sm:$0xf0]  ;;  %v2468_v28 = vld [vmem:[#allocation5 + $0x1f8] sm:$0xf]  ;;  %697 = vmatpush.bf16.msra.mxu0 %v2289_v16  ;;  %v2277_v29 = vor.u32 %v3262_v24, %v2276_v23  ;;  %v2278_v32 = vld [vmem:[#allocation5 + $0x84] sm:$0xf0] }
  0x1c   :  { %v3310_v30 = vld [vmem:[#allocation5 + $0x200] sm:$0xf0]  ;;  %710 = vmatpush.bf16.msra.mxu1 %v2385_v17  ;;  %v2373_v33 = vor.u32 %v3286_v27, %v2372_v26  ;;  %v2264_v35 = vld [vmem:[#allocation5 + $0x60] sm:$0xf]  ;;  %v3259_v36 = vld [vmem:[#allocation5 + $0x68] sm:$0xf0]  ;;  %v2281_v38 = vor.u32 %v3261_v31, %v2278_v32 }
  0x1d   :  { %723 = vmatpush.bf16.msra.mxu2 %v2481_v21  ;;  %v2469_v34 = vor.u32 %v3310_v30, %v2468_v28  ;;  %v2360_v37 = vld [vmem:[#allocation5 + $0x120] sm:$0xf]  ;;  %736 = vmatpush.bf16.msra.mxu3 %v2293_v25  ;;  %v3283_v39 = vld [vmem:[#allocation5 + $0x128] sm:$0xf0]  ;;  %v3258_v42 = vld [vmem:[#allocation5 + $0x64] sm:$0xf]  ;;  %v2265_v44 = vor.u32 %v3259_v36, %v2264_v35 }
  0x1e   :  { %v2456_v40 = vld [vmem:[#allocation5 + $0x1e0] sm:$0xf]  ;;  %v3307_v41 = vld [vmem:[#allocation5 + $0x1e8] sm:$0xf0]  ;;  %v2266_v43 = vld [vmem:[#allocation5 + $0x6c] sm:$0xf0]  ;;  %v2361_v45 = vor.u32 %v3283_v39, %v2360_v37 }
  0x1f   :  { %698 = vmatpush.bf16.msra.mxu0 %v2277_v29  ;;  %v2457_v46 = vor.u32 %v3307_v41, %v2456_v40  ;;  %v2252_v47 = vld [vmem:[#allocation5 + $0x48] sm:$0xf]  ;;  %v3256_v48 = vld [vmem:[#allocation5 + $0x50] sm:$0xf0]  ;;  %v2269_v50 = vor.u32 %v3258_v42, %v2266_v43  ;;  %v3255_v54 = vld [vmem:[#allocation5 + $0x4c] sm:$0xf] }
  0x20   :  { %711 = vmatpush.bf16.msra.mxu1 %v2373_v33  ;;  %v2348_v49 = vld [vmem:[#allocation5 + $0x108] sm:$0xf]  ;;  %v3280_v51 = vld [vmem:[#allocation5 + $0x110] sm:$0xf0]  ;;  %v2254_v55 = vld [vmem:[#allocation5 + $0x54] sm:$0xf0]  ;;  %v2253_v56 = vor.u32 %v3256_v48, %v2252_v47 }
  0x21   :  { %724 = vmatpush.bf16.msra.mxu2 %v2469_v34  ;;  %737 = vmatpush.bf16.msra.mxu3 %v2281_v38  ;;  %v2444_v52 = vld [vmem:[#allocation5 + $0x1c8] sm:$0xf]  ;;  %v3304_v53 = vld [vmem:[#allocation5 + $0x1d0] sm:$0xf0]  ;;  %v2349_v57 = vor.u32 %v3280_v51, %v2348_v49  ;;  %v2240_v59 = vld [vmem:[#allocation5 + $0x30] sm:$0xf]  ;;  %v2257_v62 = vor.u32 %v3255_v54, %v2254_v55 }
  0x22   :  { %v2445_v58 = vor.u32 %v3304_v53, %v2444_v52  ;;  %v3253_v60 = vld [vmem:[#allocation5 + $0x38] sm:$0xf0]  ;;  %v2336_v61 = vld [vmem:[#allocation5 + $0xf0] sm:$0xf]  ;;  %v3252_v2 = vld [vmem:[#allocation5 + $0x34] sm:$0xf] }
  0x23   :  { %699 = vmatpush.bf16.msra.mxu0 %v2265_v44  ;;  %v3277_v63 = vld [vmem:[#allocation5 + $0xf8] sm:$0xf0]  ;;  %v2432_v0 = vld [vmem:[#allocation5 + $0x1b0] sm:$0xf]  ;;  %v2242_v3 = vld [vmem:[#allocation5 + $0x3c] sm:$0xf0]  ;;  %v2241_v4 = vor.u32 %v3253_v60, %v2240_v59 }
  0x24   :  { %712 = vmatpush.bf16.msra.mxu1 %v2361_v45  ;;  %v3301_v1 = vld [vmem:[#allocation5 + $0x1b8] sm:$0xf0]  ;;  %v2337_v5 = vor.u32 %v3277_v63, %v2336_v61  ;;  %v2228_v7 = vld [vmem:[#allocation5 + $0x18] sm:$0xf]  ;;  %v3250_v8 = vld [vmem:[#allocation5 + $0x20] sm:$0xf0]  ;;  %v2245_v10 = vor.u32 %v3252_v2, %v2242_v3 }
  0x25   :  { %725 = vmatpush.bf16.msra.mxu2 %v2457_v46  ;;  %738 = vmatpush.bf16.msra.mxu3 %v2269_v50  ;;  %v2433_v6 = vor.u32 %v3301_v1, %v2432_v0  ;;  %v2324_v9 = vld [vmem:[#allocation5 + $0xd8] sm:$0xf]  ;;  %v3274_v11 = vld [vmem:[#allocation5 + $0xe0] sm:$0xf0]  ;;  %v3249_v14 = vld [vmem:[#allocation5 + $0x1c] sm:$0xf]  ;;  %v2229_v16 = vor.u32 %v3250_v8, %v2228_v7 }
  0x26   :  { %v2420_v12 = vld [vmem:[#allocation5 + $0x198] sm:$0xf]  ;;  %v3298_v13 = vld [vmem:[#allocation5 + $0x1a0] sm:$0xf0]  ;;  %v2230_v15 = vld [vmem:[#allocation5 + $0x24] sm:$0xf0]  ;;  %v2325_v19 = vor.u32 %v3274_v11, %v2324_v9 }
  0x27   :  { %700 = vmatpush.bf16.msra.mxu0 %v2253_v56  ;;  %v2216_v17 = vld [vmem:[#allocation5] sm:$0xf]  ;;  %v3247_v18 = vld [vmem:[#allocation5 + $0x8] sm:$0xf0]  ;;  %v2421_v20 = vor.u32 %v3298_v13, %v2420_v12  ;;  %v2233_v24 = vor.u32 %v3249_v14, %v2230_v15  ;;  %v3246_v26 = vld [vmem:[#allocation5 + $0x4] sm:$0xf] }
  0x28   :  { %713 = vmatpush.bf16.msra.mxu1 %v2349_v57  ;;  %v2312_v21 = vld [vmem:[#allocation5 + $0xc0] sm:$0xf]  ;;  %v3271_v22 = vld [vmem:[#allocation5 + $0xc8] sm:$0xf0]  ;;  %v2218_v27 = vld [vmem:[#allocation5 + $0xc] sm:$0xf0]  ;;  %v2217_v31 = vor.u32 %v3247_v18, %v2216_v17 }
  0x29   :  { %726 = vmatpush.bf16.msra.mxu2 %v2445_v58  ;;  %739 = vmatpush.bf16.msra.mxu3 %v2257_v62  ;;  %v2408_v23 = vld [vmem:[#allocation5 + $0x180] sm:$0xf]  ;;  %v3295_v25 = vld [vmem:[#allocation5 + $0x188] sm:$0xf0]  ;;  %v2398_v29 = vld [vmem:[#allocation5 + $0x174] sm:$0xf0]  ;;  %v2313_v35 = vor.u32 %v3271_v22, %v2312_v21  ;;  %v2221_v39 = vor.u32 %v3246_v26, %v2218_v27 }
  0x2a   :  { %v3291_v28 = vld [vmem:[#allocation5 + $0x16c] sm:$0xf]  ;;  %v2494_v32 = vld [vmem:[#allocation5 + $0x234] sm:$0xf0]  ;;  %v2308_v33 = vld [vmem:[#allocation5 + $0xb0] sm:$0xf]  ;;  %v2409_v36 = vor.u32 %v3295_v25, %v2408_v23 }
  0x2b   :  { %701 = vmatpush.bf16.msra.mxu0 %v2241_v4  ;;  %v3315_v30 = vld [vmem:[#allocation5 + $0x22c] sm:$0xf]  ;;  %v3269_v34 = vld [vmem:[#allocation5 + $0xb8] sm:$0xf0]  ;;  %v2404_v37 = vld [vmem:[#allocation5 + $0x170] sm:$0xf]  ;;  %v2401_v40 = vor.u32 %v3291_v28, %v2398_v29 }
  0x2c   :  { %714 = vmatpush.bf16.msra.mxu1 %v2337_v5  ;;  %v3293_v38 = vld [vmem:[#allocation5 + $0x178] sm:$0xf0]  ;;  %v2497_v41 = vor.u32 %v3315_v30, %v2494_v32  ;;  %v2309_v42 = vor.u32 %v3269_v34, %v2308_v33  ;;  %v3288_v43 = vld [vmem:[#allocation5 + $0x154] sm:$0xf]  ;;  %v2386_v44 = vld [vmem:[#allocation5 + $0x15c] sm:$0xf0] }
  0x2d   :  { %727 = vmatpush.bf16.msra.mxu2 %v2433_v6  ;;  %740 = vmatpush.bf16.msra.mxu3 %v2245_v10  ;;  %v3312_v45 = vld [vmem:[#allocation5 + $0x214] sm:$0xf]  ;;  %v2405_v46 = vor.u32 %v3293_v38, %v2404_v37  ;;  %v2482_v47 = vld [vmem:[#allocation5 + $0x21c] sm:$0xf0]  ;;  %v2296_v48 = vld [vmem:[#allocation5 + $0x98] sm:$0xf]  ;;  %v2389_v52 = vor.u32 %v3288_v43, %v2386_v44 }
  0x2e   :  { %v3266_v49 = vld [vmem:[#allocation5 + $0xa0] sm:$0xf0]  ;;  %v2392_v50 = vld [vmem:[#allocation5 + $0x158] sm:$0xf]  ;;  %v2485_v53 = vor.u32 %v3312_v45, %v2482_v47  ;;  %v3285_v55 = vld [vmem:[#allocation5 + $0x13c] sm:$0xf] }
  0x2f   :  { %702 = vmatpush.bf16.msra.mxu0 %v2229_v16  ;;  %v3290_v51 = vld [vmem:[#allocation5 + $0x160] sm:$0xf0]  ;;  %v2297_v54 = vor.u32 %v3266_v49, %v2296_v48  ;;  %v2374_v56 = vld [vmem:[#allocation5 + $0x144] sm:$0xf0]  ;;  %v3309_v57 = vld [vmem:[#allocation5 + $0x1fc] sm:$0xf] }
  0x30   :  { %715 = vmatpush.bf16.msra.mxu1 %v2325_v19  ;;  %v2393_v58 = vor.u32 %v3290_v51, %v2392_v50  ;;  %v2470_v59 = vld [vmem:[#allocation5 + $0x204] sm:$0xf0]  ;;  %v2284_v60 = vld [vmem:[#allocation5 + $0x80] sm:$0xf]  ;;  %v3263_v61 = vld [vmem:[#allocation5 + $0x88] sm:$0xf0]  ;;  %v2377_v0 = vor.u32 %v3285_v55, %v2374_v56 }
  0x31   :  { %728 = vmatpush.bf16.msra.mxu2 %v2421_v20  ;;  %741 = vmatpush.bf16.msra.mxu3 %v2233_v24  ;;  %v2380_v62 = vld [vmem:[#allocation5 + $0x140] sm:$0xf]  ;;  %v3287_v63 = vld [vmem:[#allocation5 + $0x148] sm:$0xf0]  ;;  %v3282_v1 = vld [vmem:[#allocation5 + $0x124] sm:$0xf]  ;;  %v2473_v3 = vor.u32 %v3309_v57, %v2470_v59  ;;  %v2285_v4 = vor.u32 %v3263_v61, %v2284_v60 }
  0x32   :  { %v96_v2 = vld [vmem:[%s3721_s0] sm:$0x3f]  ;;  %v2362_v5 = vld [vmem:[#allocation5 + $0x12c] sm:$0xf0]  ;;  %v3306_v6 = vld [vmem:[#allocation5 + $0x1e4] sm:$0xf]  ;;  %v2381_v7 = vor.u32 %v3287_v63, %v2380_v62 }
  0x33   :  { %703 = vmatpush.bf16.msra.mxu0 %v2217_v31  ;;  %194 = vst [vmem:[#allocation1] ss:$4 sm:$0xff] %v96_v2  ;;  %v2458_v8 = vld [vmem:[#allocation5 + $0x1ec] sm:$0xf0]  ;;  %v2272_v9 = vld [vmem:[#allocation5 + $0x68] sm:$0xf]  ;;  %v2365_v13 = vor.u32 %v3282_v1, %v2362_v5 }
  0x34   :  { %716 = vmatpush.bf16.msra.mxu1 %v2313_v35  ;;  %v3260_v10 = vld [vmem:[#allocation5 + $0x70] sm:$0xf0]  ;;  %v2368_v11 = vld [vmem:[#allocation5 + $0x128] sm:$0xf]  ;;  %v3279_v14 = vld [vmem:[#allocation5 + $0x10c] sm:$0xf]  ;;  %v2461_v16 = vor.u32 %v3306_v6, %v2458_v8 }
  0x35   :  { %729 = vmatpush.bf16.msra.mxu2 %v2409_v36  ;;  %742 = vmatpush.bf16.msra.mxu3 %v2221_v39  ;;  %v3284_v12 = vld [vmem:[#allocation5 + $0x130] sm:$0xf0]  ;;  %v2350_v15 = vld [vmem:[#allocation5 + $0x114] sm:$0xf0]  ;;  %v2273_v17 = vor.u32 %v3260_v10, %v2272_v9  ;;  %v3303_v18 = vld [vmem:[#allocation5 + $0x1cc] sm:$0xf] }
  0x36   :  { %v2446_v19 = vld [vmem:[#allocation5 + $0x1d4] sm:$0xf0]  ;;  %v2260_v20 = vld [vmem:[#allocation5 + $0x50] sm:$0xf]  ;;  %v2369_v21 = vor.u32 %v3284_v12, %v2368_v11  ;;  %v3257_v22 = vld [vmem:[#allocation5 + $0x58] sm:$0xf0]  ;;  %v2353_v28 = vor.u32 %v3279_v14, %v2350_v15 }
  0x37   :  { %748 = vmatpush.bf16.msrb.mxu0 %v2401_v40  ;;  %v2356_v23 = vld [vmem:[#allocation5 + $0x110] sm:$0xf]  ;;  %v3281_v24 = vld [vmem:[#allocation5 + $0x118] sm:$0xf0]  ;;  %v3276_v25 = vld [vmem:[#allocation5 + $0xf4] sm:$0xf]  ;;  %v2449_v32 = vor.u32 %v3303_v18, %v2446_v19  ;;  %v2261_v33 = vor.u32 %v3257_v22, %v2260_v20 }
  0x38   :  { %761 = vmatpush.bf16.msrb.mxu1 %v2497_v41  ;;  %v2338_v26 = vld [vmem:[#allocation5 + $0xfc] sm:$0xf0]  ;;  %v204_v27 = vld [vmem:[%s3722_s1] sm:$0x3f]  ;;  %v3300_v29 = vld [vmem:[#allocation5 + $0x1b4] sm:$0xf]  ;;  %v2357_v36 = vor.u32 %v3281_v24, %v2356_v23 }
  0x39   :  { %774 = vmatpush.bf16.msrb.mxu2 %v2309_v42  ;;  %787 = vmatpush.bf16.msrb.mxu3 %v2405_v46  ;;  %v2434_v34 = vld [vmem:[#allocation5 + $0x1bc] sm:$0xf0]  ;;  %v2248_v37 = vld [vmem:[#allocation5 + $0x38] sm:$0xf]  ;;  %v3254_v38 = vld [vmem:[#allocation5 + $0x40] sm:$0xf0]  ;;  %v2341_v41 = vor.u32 %v3276_v25, %v2338_v26 }
  0x3a   :  { %v3633_v30 = vld.sshfl [vmem:[#allocation1] sm:$0xff pattern:$0x73625140]  ;;  %v3635_v31 = vld.sshfl [vmem:[#allocation1 + $0x8] sm:$0xff pattern:$0x73625140]  ;;  %v2437_v42 = vor.u32 %v3300_v29, %v2434_v34  ;;  %v2249_v43 = vor.u32 %v3254_v38, %v2248_v37 }
  0x3b   :  { %749 = vmatpush.bf16.msrb.mxu0 %v2389_v52  ;;  %v3637_v35 = vld.sshfl [vmem:[#allocation1 + $0x10] sm:$0xff pattern:$0x73625140]  ;;  %v2344_v39 = vld [vmem:[#allocation5 + $0xf8] sm:$0xf]  ;;  %vm2181_vm1 = vcmask 1041408  }
  0x3c   :  { %762 = vmatpush.bf16.msrb.mxu1 %v2485_v53  ;;  %302 = vst [vmem:[#allocation1] ss:$4 sm:$0xff] %v204_v27  ;;  %v3278_v40 = vld [vmem:[#allocation5 + $0x100] sm:$0xf0]  ;;  %v3273_v44 = vld [vmem:[#allocation5 + $0xdc] sm:$0xf] }
  0x3d   :  { %775 = vmatpush.bf16.msrb.mxu2 %v2297_v54  ;;  %788 = vmatpush.bf16.msrb.mxu3 %v2393_v58  ;;  %v2326_v45 = vld [vmem:[#allocation5 + $0xe4] sm:$0xf0]  ;;  %v2345_v46 = vor.u32 %v3278_v40, %v2344_v39  ;;  %v3297_v47 = vld [vmem:[#allocation5 + $0x19c] sm:$0xf]  ;;  %v2236_v49 = vld [vmem:[#allocation5 + $0x20] sm:$0xf] }
  0x3e   :  { %v2422_v48 = vld [vmem:[#allocation5 + $0x1a4] sm:$0xf0]  ;;  %v3251_v50 = vld [vmem:[#allocation5 + $0x28] sm:$0xf0]  ;;  %v2332_v51 = vld [vmem:[#allocation5 + $0xe0] sm:$0xf]  ;;  %v2329_v59 = vor.u32 %v3273_v44, %v2326_v45 }
  0x3f   :  { %750 = vmatpush.bf16.msrb.mxu0 %v2377_v0  ;;  %v3275_v52 = vld [vmem:[#allocation5 + $0xe8] sm:$0xf0]  ;;  %v3270_v53 = vld [vmem:[#allocation5 + $0xc4] sm:$0xf]  ;;  %v2314_v54 = vld [vmem:[#allocation5 + $0xcc] sm:$0xf0]  ;;  %v2425_v60 = vor.u32 %v3297_v47, %v2422_v48  ;;  %v2237_v1 = vor.u32 %v3251_v50, %v2236_v49 }
  0x40   :  { %763 = vmatpush.bf16.msrb.mxu1 %v2473_v3  ;;  %v3294_v55 = vld [vmem:[#allocation5 + $0x184] sm:$0xf]  ;;  %v2410_v56 = vld [vmem:[#allocation5 + $0x18c] sm:$0xf0]  ;;  %v2224_v61 = vld [vmem:[#allocation5 + $0x8] sm:$0xf]  ;;  %v2333_v2 = vor.u32 %v3275_v52, %v2332_v51  ;;  %v2317_v12 = vor.u32 %v3270_v53, %v2314_v54 }
  0x41   :  { %776 = vmatpush.bf16.msrb.mxu2 %v2285_v4  ;;  %789 = vmatpush.bf16.msrb.mxu3 %v2381_v7  ;;  %v3248_v62 = vld [vmem:[#allocation5 + $0x10] sm:$0xf0]  ;;  %v2320_v4 = vld [vmem:[#allocation5 + $0xc8] sm:$0xf]  ;;  %v2500_v7 = vld [vmem:[#allocation5 + $0x230] sm:$0xf] }
  0x42   :  { %v3272_v6 = vld [vmem:[#allocation5 + $0xd0] sm:$0xf0]  ;;  %v3317_v8 = vld [vmem:[#allocation5 + $0x238] sm:$0xf0]  ;;  %v2588_v9 = vld [vmem:[#allocation2 + $0xa8] sm:$0xf] }
  0x43   :  { %751 = vmatpush.bf16.msrb.mxu0 %v2365_v13  ;;  %v303_v57 = vld.sshfl [vmem:[#allocation1] sm:$0xff pattern:$0x73625140]  ;;  %v304_v58 = vld.sshfl [vmem:[#allocation1 + $0x8] sm:$0xff pattern:$0x73625140]  ;;  %v2413_v13 = vor.u32 %v3294_v55, %v2410_v56  ;;  %v2321_v18 = vor.u32 %v3272_v6, %v2320_v4  ;;  %v2501_v19 = vor.u32 %v3317_v8, %v2500_v7 }
  0x44   :  { %764 = vmatpush.bf16.msrb.mxu1 %v2461_v16  ;;  %v3639_v63 = vpack.c.bf16 %v303_v57, %v303_v57  ;;  %v3641_v0 = vpack.c.bf16 %v304_v58, %v304_v58  ;;  %v305_v3 = vld.sshfl [vmem:[#allocation1 + $0x10] sm:$0xff pattern:$0x73625140]  ;;  %v3196_v10 = vld [vmem:[#allocation2 + $0xb0] sm:$0xf0]  ;;  %s2202_s17 = sshll.u32 %s3730_s9, 4  ;;  %s2203_s17 = int_to_ptr.hbm [resolvable:$true] %s2202_s17 }
  0x45   :  { %777 = vmatpush.bf16.msrb.mxu2 %v2273_v17  ;;  %790 = vmatpush.bf16.msrb.mxu3 %v2369_v21  ;;  %v3643_v5 = vpack.c.bf16 %v305_v3, %v305_v3  ;;  %v2684_v11 = vld [vmem:[#allocation2 + $0x168] sm:$0xf]  ;;  %v3220_v14 = vld [vmem:[#allocation2 + $0x170] sm:$0xf0]  ;;  %v2225_v17 = vor.u32 %v3248_v62, %v2224_v61  ;;  %v2589_v20 = vor.u32 %v3196_v10, %v2588_v9  ;;  %v2488_v21 = vld [vmem:[#allocation5 + $0x218] sm:$0xf] }
  0x46   :  { %704 = vmatmul.bf16.vlgmr.msra.gmra.mxu0 %v3639_v63  ;;  %717 = vmatmul.bf16.vlgmr.msra.gmra.mxu1 %v3641_v0  ;;  %v2780_v15 = vld [vmem:[#allocation2 + $0x228] sm:$0xf]  ;;  %v3244_v16 = vld [vmem:[#allocation2 + $0x230] sm:$0xf0]  ;;  %v3314_v22 = vld [vmem:[#allocation5 + $0x220] sm:$0xf0]  ;;  %v2685_v23 = vor.u32 %v3220_v14, %v2684_v11 }
  0x47   :  { %752 = vmatpush.bf16.msrb.mxu0 %v2353_v28  ;;  %730 = vmatmul.bf16.vlgmr.msra.gmra.mxu2 %v3643_v5  ;;  %v2781_v24 = vor.u32 %v3244_v16, %v2780_v15  ;;  %v2576_v25 = vld [vmem:[#allocation2 + $0x90] sm:$0xf]  ;;  %v3193_v26 = vld [vmem:[#allocation2 + $0x98] sm:$0xf0]  ;;  %v3311_v37 = vld [vmem:[#allocation5 + $0x208] sm:$0xf0] }
  0x48   :  { %765 = vmatpush.bf16.msrb.mxu1 %v2449_v32  ;;  %743 = vmatmul.bf16.vlgmr.msra.gmra.mxu3 %v3639_v63  ;;  %v2672_v27 = vld [vmem:[#allocation2 + $0x150] sm:$0xf]  ;;  %v3217_v28 = vld [vmem:[#allocation2 + $0x158] sm:$0xf0]  ;;  %v2577_v34 = vor.u32 %v3193_v26, %v2576_v25  ;;  %v2564_v40 = vld [vmem:[#allocation2 + $0x78] sm:$0xf] }
  0x49   :  { %778 = vmatpush.bf16.msrb.mxu2 %v2261_v33  ;;  %791 = vmatpush.bf16.msrb.mxu3 %v2357_v36  ;;  %v2768_v29 = vld [vmem:[#allocation2 + $0x210] sm:$0xf]  ;;  %v3241_v32 = vld [vmem:[#allocation2 + $0x218] sm:$0xf0]  ;;  %v2489_v33 = vor.u32 %v3314_v22, %v2488_v21  ;;  %v2476_v36 = vld [vmem:[#allocation5 + $0x200] sm:$0xf]  ;;  %v2673_v38 = vor.u32 %v3217_v28, %v2672_v27 }
  0x4a   :  { %v2769_v39 = vor.u32 %v3241_v32, %v2768_v29  ;;  %v2756_v44 = vld [vmem:[#allocation2 + $0x1f8] sm:$0xf]  ;;  %v3238_v45 = vld [vmem:[#allocation2 + $0x200] sm:$0xf0]  ;;  %v2464_v48 = vld [vmem:[#allocation5 + $0x1e8] sm:$0xf] }
  0x4b   :  { %753 = vmatpush.bf16.msrb.mxu0 %v2341_v41  ;;  %v3190_v41 = vld [vmem:[#allocation2 + $0x80] sm:$0xf0]  ;;  %v3308_v49 = vld [vmem:[#allocation5 + $0x1f0] sm:$0xf0]  ;;  %v2757_v51 = vor.u32 %v3238_v45, %v2756_v44  ;;  %v2552_v52 = vld [vmem:[#allocation2 + $0x60] sm:$0xf] }
  0x4c   :  { %766 = vmatpush.bf16.msrb.mxu1 %v2437_v42  ;;  %v2660_v42 = vld [vmem:[#allocation2 + $0x138] sm:$0xf]  ;;  %v2565_v47 = vor.u32 %v3190_v41, %v2564_v40  ;;  %v3187_v53 = vld [vmem:[#allocation2 + $0x68] sm:$0xf0]  ;;  %v2648_v54 = vld [vmem:[#allocation2 + $0x120] sm:$0xf]  ;;  %v2465_v58 = vor.u32 %v3308_v49, %v2464_v48 }
  0x4d   :  { %779 = vmatpush.bf16.msrb.mxu2 %v2249_v43  ;;  %792 = vmatpush.bf16.msrb.mxu3 %v2345_v46  ;;  %v3214_v43 = vld [vmem:[#allocation2 + $0x140] sm:$0xf0]  ;;  %v2477_v46 = vor.u32 %v3311_v37, %v2476_v36  ;;  %v3211_v55 = vld [vmem:[#allocation2 + $0x128] sm:$0xf0]  ;;  %v2744_v56 = vld [vmem:[#allocation2 + $0x1e0] sm:$0xf] }
  0x4e   :  { %v2661_v50 = vor.u32 %v3214_v43, %v2660_v42  ;;  %v3235_v57 = vld [vmem:[#allocation2 + $0x1e8] sm:$0xf0]  ;;  %v3305_v61 = vld [vmem:[#allocation5 + $0x1d8] sm:$0xf0]  ;;  %v2649_v62 = vor.u32 %v3211_v55, %v2648_v54  ;;  %v3184_v3 = vld [vmem:[#allocation2 + $0x50] sm:$0xf0] }
  0x4f   :  { %754 = vmatpush.bf16.msrb.mxu0 %v2329_v59  ;;  %v2553_v59 = vor.u32 %v3187_v53, %v2552_v52  ;;  %v2636_v4 = vld [vmem:[#allocation2 + $0x108] sm:$0xf]  ;;  %v3208_v6 = vld [vmem:[#allocation2 + $0x110] sm:$0xf0]  ;;  %v2440_v11 = vld [vmem:[#allocation5 + $0x1b8] sm:$0xf] }
  0x50   :  { %767 = vmatpush.bf16.msrb.mxu1 %v2425_v60  ;;  %v2452_v60 = vld [vmem:[#allocation5 + $0x1d0] sm:$0xf]  ;;  %v2732_v7 = vld [vmem:[#allocation2 + $0x1c8] sm:$0xf]  ;;  %v3232_v8 = vld [vmem:[#allocation2 + $0x1d0] sm:$0xf0] }
  0x51   :  { %780 = vmatpush.bf16.msrb.mxu2 %v2237_v1  ;;  %793 = vmatpush.bf16.msrb.mxu3 %v2333_v2  ;;  %v2745_v1 = vor.u32 %v3235_v57, %v2744_v56  ;;  %v2540_v2 = vld [vmem:[#allocation2 + $0x48] sm:$0xf]  ;;  %v2453_v9 = vor.u32 %v3305_v61, %v2452_v60  ;;  %v2733_v14 = vor.u32 %v3232_v8, %v2732_v7  ;;  %v2528_v15 = vld [vmem:[#allocation2 + $0x30] sm:$0xf]  ;;  %v3181_v16 = vld [vmem:[#allocation2 + $0x38] sm:$0xf0] }
  0x52   :  { %v2541_v10 = vor.u32 %v3184_v3, %v2540_v2  ;;  %v2529_v22 = vor.u32 %v3181_v16, %v2528_v15  ;;  %v2516_v27 = vld [vmem:[#allocation2 + $0x18] sm:$0xf]  ;;  %v3178_v28 = vld [vmem:[#allocation2 + $0x20] sm:$0xf0]  ;;  %v3296_v37 = vld [vmem:[#allocation5 + $0x190] sm:$0xf0]  ;;  %v3659_v7 = vpack.c.bf16 %v3635_v31, %v3635_v31 }
  0x53   :  { %755 = vmatpush.bf16.msrb.mxu0 %v2317_v12  ;;  %v3302_v12 = vld [vmem:[#allocation5 + $0x1c0] sm:$0xf0]  ;;  %v2612_v29 = vld [vmem:[#allocation2 + $0xd8] sm:$0xf]  ;;  %v2517_v36 = vor.u32 %v3178_v28, %v2516_v27  ;;  %v2600_v42 = vld [vmem:[#allocation2 + $0xc0] sm:$0xf] }
  0x54   :  { %768 = vmatpush.bf16.msrb.mxu1 %v2413_v13  ;;  %v2637_v13 = vor.u32 %v3208_v6, %v2636_v4  ;;  %v2441_v21 = vor.u32 %v3302_v12, %v2440_v11  ;;  %v3202_v32 = vld [vmem:[#allocation2 + $0xe0] sm:$0xf0]  ;;  %v3199_v43 = vld [vmem:[#allocation2 + $0xc8] sm:$0xf0]  ;;  %v2696_v44 = vld [vmem:[#allocation2 + $0x180] sm:$0xf]  ;;  %v3655_v6 = vpack.c.bf16 %v3633_v30, %v3633_v30  ;;  %v3663_v11 = vpack.c.bf16 %v3637_v35, %v3637_v35 }
  0x55   :  { %781 = vmatpush.bf16.msrb.mxu2 %v2225_v17  ;;  %794 = vmatpush.bf16.msrb.mxu3 %v2321_v18  ;;  %v2624_v17 = vld [vmem:[#allocation2 + $0xf0] sm:$0xf]  ;;  %v3205_v18 = vld [vmem:[#allocation2 + $0xf8] sm:$0xf0]  ;;  %v2613_v40 = vor.u32 %v3202_v32, %v2612_v29  ;;  %v3223_v45 = vld [vmem:[#allocation2 + $0x188] sm:$0xf0]  ;;  %v2601_v56 = vor.u32 %v3199_v43, %v2600_v42 }
  0x56   :  { %756 = vmatmul.bf16.vlgmr.msrb.gmra.mxu0 %v3641_v0  ;;  %v2625_v25 = vor.u32 %v3205_v18, %v2624_v17  ;;  %v3219_v48 = vld [vmem:[#allocation2 + $0x16c] sm:$0xf]  ;;  %v2686_v49 = vld [vmem:[#allocation2 + $0x174] sm:$0xf0]  ;;  %v2596_v54 = vld [vmem:[#allocation2 + $0xb0] sm:$0xf]  ;;  %v2697_v57 = vor.u32 %v3223_v45, %v2696_v44 }
  0x57   :  { %800 = vmatpush.bf16.msra.mxu0 %v2501_v19  ;;  %769 = vmatmul.bf16.vlgmr.msrb.gmra.mxu1 %v3643_v5  ;;  %v2720_v19 = vld [vmem:[#allocation2 + $0x1b0] sm:$0xf]  ;;  %v2782_v53 = vld [vmem:[#allocation2 + $0x234] sm:$0xf0]  ;;  %v3197_v55 = vld [vmem:[#allocation2 + $0xb8] sm:$0xf0] }
  0x58   :  { %1197 = vmatpush.bf16.msra.mxu1 %v2589_v20  ;;  %782 = vmatmul.bf16.vlgmr.msrb.gmra.mxu2 %v3639_v63  ;;  %v3229_v20 = vld [vmem:[#allocation2 + $0x1b8] sm:$0xf0]  ;;  %v2708_v63 = vld [vmem:[#allocation2 + $0x198] sm:$0xf]  ;;  %v3192_v60 = vld [vmem:[#allocation2 + $0x94] sm:$0xf]  ;;  %v2597_v2 = vor.u32 %v3197_v55, %v2596_v54 }
  0x59   :  { %1210 = vmatpush.bf16.msra.mxu2 %v2685_v23  ;;  %1223 = vmatpush.bf16.msra.mxu3 %v2781_v24  ;;  %v2428_v23 = vld [vmem:[#allocation5 + $0x1a0] sm:$0xf]  ;;  %v3299_v24 = vld [vmem:[#allocation5 + $0x1a8] sm:$0xf0]  ;;  %v2721_v26 = vor.u32 %v3229_v20, %v2720_v19  ;;  %v3240_v4 = vld [vmem:[#allocation2 + $0x214] sm:$0xf] }
  0x5a   :  { %795 = vmatmul.bf16.vlgmr.msrb.gmra.mxu3 %v3641_v0  ;;  %v2416_v0 = vld [vmem:[#allocation5 + $0x188] sm:$0xf]  ;;  %v2578_v61 = vld [vmem:[#allocation2 + $0x9c] sm:$0xf0]  ;;  %v3213_v16 = vld [vmem:[#allocation2 + $0x13c] sm:$0xf] }
  0x5b   :  { %801 = vmatpush.bf16.msra.mxu0 %v2489_v33  ;;  %v3226_v33 = vld [vmem:[#allocation2 + $0x1a0] sm:$0xf0]  ;;  %v2674_v3 = vld [vmem:[#allocation2 + $0x15c] sm:$0xf0]  ;;  %v2581_v12 = vor.u32 %v3192_v60, %v2578_v61  ;;  %v2566_v30 = vld [vmem:[#allocation2 + $0x84] sm:$0xf0] }
  0x5c   :  { %1198 = vmatpush.bf16.msra.mxu1 %v2577_v34  ;;  %v2429_v34 = vor.u32 %v3299_v24, %v2428_v23  ;;  %v2709_v41 = vor.u32 %v3226_v33, %v2708_v63  ;;  %v2770_v8 = vld [vmem:[#allocation2 + $0x21c] sm:$0xf0]  ;;  %v2662_v17 = vld [vmem:[#allocation2 + $0x144] sm:$0xf0]  ;;  %v3237_v18 = vld [vmem:[#allocation2 + $0x1fc] sm:$0xf] }
  0x5d   :  { %1211 = vmatpush.bf16.msra.mxu2 %v2673_v38  ;;  %1224 = vmatpush.bf16.msra.mxu3 %v2769_v39  ;;  %v2504_v38 = vld [vmem:[#allocation2] sm:$0xf]  ;;  %v3175_v39 = vld [vmem:[#allocation2 + $0x8] sm:$0xf0]  ;;  %v2773_v15 = vor.u32 %v3240_v4, %v2770_v8  ;;  %v2758_v19 = vld [vmem:[#allocation2 + $0x204] sm:$0xf0] }
  0x5e   :  { %v2505_v52 = vor.u32 %v3175_v39, %v2504_v38  ;;  %v2572_v35 = vld [vmem:[#allocation2 + $0x80] sm:$0xf]  ;;  %v3191_v20 = vld [vmem:[#allocation2 + $0x88] sm:$0xf0]  ;;  %v3186_v23 = vld [vmem:[#allocation2 + $0x64] sm:$0xf] }
  0x5f   :  { %802 = vmatpush.bf16.msra.mxu0 %v2477_v46  ;;  %v3195_v46 = vld [vmem:[#allocation2 + $0xac] sm:$0xf]  ;;  %v2554_v24 = vld [vmem:[#allocation2 + $0x6c] sm:$0xf0]  ;;  %v3210_v27 = vld [vmem:[#allocation2 + $0x124] sm:$0xf] }
  0x60   :  { %1199 = vmatpush.bf16.msra.mxu1 %v2565_v47  ;;  %v2590_v47 = vld [vmem:[#allocation2 + $0xb4] sm:$0xf0]  ;;  %v2650_v28 = vld [vmem:[#allocation2 + $0x12c] sm:$0xf0]  ;;  %v3234_v29 = vld [vmem:[#allocation2 + $0x1e4] sm:$0xf] }
  0x61   :  { %1212 = vmatpush.bf16.msra.mxu2 %v2661_v50  ;;  %1225 = vmatpush.bf16.msra.mxu3 %v2757_v51  ;;  %v3243_v50 = vld [vmem:[#allocation2 + $0x22c] sm:$0xf]  ;;  %v2417_v51 = vor.u32 %v3296_v37, %v2416_v0  ;;  %v2746_v32 = vld [vmem:[#allocation2 + $0x1ec] sm:$0xf0]  ;;  %v2560_v63 = vld [vmem:[#allocation2 + $0x68] sm:$0xf]  ;;  %v2557_v0 = vor.u32 %v3186_v23, %v2554_v24 }
  0x62   :  { %v3188_v33 = vld [vmem:[#allocation2 + $0x70] sm:$0xf0]  ;;  %v2749_v37 = vor.u32 %v3234_v29, %v2746_v32  ;;  %v3207_v39 = vld [vmem:[#allocation2 + $0x10c] sm:$0xf]  ;;  %v2734_v42 = vld [vmem:[#allocation2 + $0x1d4] sm:$0xf0] }
  0x63   :  { %803 = vmatpush.bf16.msra.mxu0 %v2465_v58  ;;  %v2593_v58 = vor.u32 %v3195_v46, %v2590_v47  ;;  %v2561_v38 = vor.u32 %v3188_v33, %v2560_v63  ;;  %v2548_v43 = vld [vmem:[#allocation2 + $0x50] sm:$0xf]  ;;  %v3185_v44 = vld [vmem:[#allocation2 + $0x58] sm:$0xf0]  ;;  %v3180_v47 = vld [vmem:[#allocation2 + $0x34] sm:$0xf] }
  0x64   :  { %1200 = vmatpush.bf16.msra.mxu1 %v2553_v59  ;;  %v2689_v59 = vor.u32 %v3219_v48, %v2686_v49  ;;  %v2530_v48 = vld [vmem:[#allocation2 + $0x3c] sm:$0xf0]  ;;  %v2536_v55 = vld [vmem:[#allocation2 + $0x38] sm:$0xf]  ;;  %v2518_v60 = vld [vmem:[#allocation2 + $0x24] sm:$0xf0] }
  0x65   :  { %1213 = vmatpush.bf16.msra.mxu2 %v2649_v62  ;;  %1226 = vmatpush.bf16.msra.mxu3 %v2745_v1  ;;  %v3216_v62 = vld [vmem:[#allocation2 + $0x154] sm:$0xf]  ;;  %v2785_v1 = vor.u32 %v3243_v50, %v2782_v53  ;;  %v2549_v50 = vor.u32 %v3185_v44, %v2548_v43  ;;  %v2722_v54 = vld [vmem:[#allocation2 + $0x1bc] sm:$0xf0]  ;;  %v2710_v4 = vld [vmem:[#allocation2 + $0x1a4] sm:$0xf0] }
  0x66   :  { %v3228_v53 = vld [vmem:[#allocation2 + $0x1b4] sm:$0xf]  ;;  %v2524_v8 = vld [vmem:[#allocation2 + $0x20] sm:$0xf]  ;;  %v3245_v23 = vld [vmem:[#allocation2 + $0x238] sm:$0xf0] }
  0x67   :  { %804 = vmatpush.bf16.msra.mxu0 %v2453_v9  ;;  %v2584_v9 = vld [vmem:[#allocation2 + $0x98] sm:$0xf]  ;;  %v2725_v61 = vor.u32 %v3228_v53, %v2722_v54  ;;  %v3218_v63 = vld [vmem:[#allocation2 + $0x160] sm:$0xf0]  ;;  %v3212_v43 = vld [vmem:[#allocation2 + $0x130] sm:$0xf0] }
  0x68   :  { %1201 = vmatpush.bf16.msra.mxu1 %v2541_v10  ;;  %v3194_v10 = vld [vmem:[#allocation2 + $0xa0] sm:$0xf0]  ;;  %v2680_v32 = vld [vmem:[#allocation2 + $0x158] sm:$0xf]  ;;  %v2752_v44 = vld [vmem:[#allocation2 + $0x1e8] sm:$0xf] }
  0x69   :  { %1214 = vmatpush.bf16.msra.mxu2 %v2637_v13  ;;  %1227 = vmatpush.bf16.msra.mxu3 %v2733_v14  ;;  %v2677_v13 = vor.u32 %v3216_v62, %v2674_v3  ;;  %v3189_v14 = vld [vmem:[#allocation2 + $0x7c] sm:$0xf]  ;;  %v2585_v31 = vor.u32 %v3194_v10, %v2584_v9  ;;  %v3179_v9 = vld [vmem:[#allocation2 + $0x28] sm:$0xf0]  ;;  %v2776_v33 = vld [vmem:[#allocation2 + $0x218] sm:$0xf] }
  0x6a   :  { %v3225_v3 = vld [vmem:[#allocation2 + $0x19c] sm:$0xf]  ;;  %v2632_v53 = vld [vmem:[#allocation2 + $0xf8] sm:$0xf]  ;;  %v3206_v54 = vld [vmem:[#allocation2 + $0x100] sm:$0xf0] }
  0x6b   :  { %805 = vmatpush.bf16.msra.mxu0 %v2441_v21  ;;  %v2569_v21 = vor.u32 %v3189_v14, %v2566_v30  ;;  %v2506_v14 = vld [vmem:[#allocation2 + $0xc] sm:$0xf0]  ;;  %v3198_v30 = vld [vmem:[#allocation2 + $0xc4] sm:$0xf] }
  0x6c   :  { %1202 = vmatpush.bf16.msra.mxu1 %v2529_v22  ;;  %v2665_v22 = vor.u32 %v3213_v16, %v2662_v17  ;;  %v2602_v16 = vld [vmem:[#allocation2 + $0xcc] sm:$0xf0]  ;;  %v3222_v17 = vld [vmem:[#allocation2 + $0x184] sm:$0xf] }
  0x6d   :  { %1215 = vmatpush.bf16.msra.mxu2 %v2625_v25  ;;  %1228 = vmatpush.bf16.msra.mxu3 %v2721_v26  ;;  %v2761_v25 = vor.u32 %v3237_v18, %v2758_v19  ;;  %v2573_v26 = vor.u32 %v3191_v20, %v2572_v35  ;;  %v2698_v18 = vld [vmem:[#allocation2 + $0x18c] sm:$0xf0]  ;;  %v2512_v19 = vld [vmem:[#allocation2 + $0x8] sm:$0xf]  ;;  %v3176_v35 = vld [vmem:[#allocation2 + $0x10] sm:$0xf0] }
  0x6e   :  { %v2692_v20 = vld [vmem:[#allocation2 + $0x170] sm:$0xf] }
  0x6f   :  { %806 = vmatpush.bf16.msra.mxu0 %v2429_v34  ;;  %v3183_v34 = vld [vmem:[#allocation2 + $0x4c] sm:$0xf] }
  0x70   :  { %1203 = vmatpush.bf16.msra.mxu1 %v2517_v36  ;;  %v2542_v36 = vld [vmem:[#allocation2 + $0x54] sm:$0xf0] }
  0x71   :  { %1216 = vmatpush.bf16.msra.mxu2 %v2613_v40  ;;  %1229 = vmatpush.bf16.msra.mxu3 %v2709_v41  ;;  %v2638_v40 = vld [vmem:[#allocation2 + $0x114] sm:$0xf0]  ;;  %v3231_v41 = vld [vmem:[#allocation2 + $0x1cc] sm:$0xf]  ;;  %v2545_v45 = vor.u32 %v3183_v34, %v2542_v36  ;;  %v2668_v36 = vld [vmem:[#allocation2 + $0x140] sm:$0xf] }
  0x72   :  { %v2641_v46 = vor.u32 %v3207_v39, %v2638_v40  ;;  %v2737_v49 = vor.u32 %v3231_v41, %v2734_v42  ;;  %v3239_v39 = vld [vmem:[#allocation2 + $0x208] sm:$0xf0]  ;;  %v2656_v42 = vld [vmem:[#allocation2 + $0x128] sm:$0xf] }
  0x73   :  { %807 = vmatpush.bf16.msra.mxu0 %v2417_v51  ;;  %v3204_v51 = vld [vmem:[#allocation2 + $0xf4] sm:$0xf] }
  0x74   :  { %1204 = vmatpush.bf16.msra.mxu1 %v2505_v52  ;;  %v2626_v52 = vld [vmem:[#allocation2 + $0xfc] sm:$0xf0] }
  0x75   :  { %1217 = vmatpush.bf16.msra.mxu2 %v2601_v56  ;;  %1230 = vmatpush.bf16.msra.mxu3 %v2697_v57  ;;  %v3182_v56 = vld [vmem:[#allocation2 + $0x40] sm:$0xf0]  ;;  %v2533_v57 = vor.u32 %v3180_v47, %v2530_v48  ;;  %v2644_v48 = vld [vmem:[#allocation2 + $0x110] sm:$0xf] }
  0x76   :  { %808 = vmatmul.bf16.vlgmr.msra.gmra.mxu0 %v3643_v5  ;;  %v2653_v5 = vor.u32 %v3210_v27, %v2650_v28  ;;  %v2537_v62 = vor.u32 %v3182_v56, %v2536_v55  ;;  %v2513_v27 = vor.u32 %v3176_v35, %v2512_v19  ;;  %v2728_v55 = vld [vmem:[#allocation2 + $0x1b8] sm:$0xf]  ;;  %v3230_v56 = vld [vmem:[#allocation2 + $0x1c0] sm:$0xf0] }
  0x77   :  { %1236 = vmatpush.bf16.msrb.mxu0 %v2593_v58  ;;  %1205 = vmatmul.bf16.vlgmr.msra.gmra.mxu1 %v3655_v6  ;;  %v2629_v58 = vor.u32 %v3204_v51, %v2626_v52  ;;  %v3233_v51 = vld [vmem:[#allocation2 + $0x1d8] sm:$0xf0]  ;;  %v2852_v19 = vld [vmem:[#allocation7 + $0x78] sm:$0xf]  ;;  %v3334_v35 = vld [vmem:[#allocation7 + $0x80] sm:$0xf0] }
  0x78   :  { %1249 = vmatpush.bf16.msrb.mxu1 %v2689_v59  ;;  %1218 = vmatmul.bf16.vlgmr.msra.gmra.mxu2 %v3659_v7  ;;  %v3177_v59 = vld [vmem:[#allocation2 + $0x1c] sm:$0xf] }
  0x79   :  { %1262 = vmatpush.bf16.msrb.mxu2 %v2785_v1  ;;  %1275 = vmatpush.bf16.msrb.mxu3 %v2597_v2  ;;  %v3201_v1 = vld [vmem:[#allocation2 + $0xdc] sm:$0xf]  ;;  %v2614_v2 = vld [vmem:[#allocation2 + $0xe4] sm:$0xf0]  ;;  %v2521_v10 = vor.u32 %v3177_v59, %v2518_v60  ;;  %v2620_v59 = vld [vmem:[#allocation2 + $0xe0] sm:$0xf] }
  0x7a   :  { %1231 = vmatmul.bf16.vlgmr.msra.gmra.mxu3 %v3663_v11  ;;  %v3203_v60 = vld [vmem:[#allocation2 + $0xe8] sm:$0xf0] }
  0x7b   :  { %1237 = vmatpush.bf16.msrb.mxu0 %v2581_v12  ;;  %v2617_v12 = vor.u32 %v3201_v1, %v2614_v2  ;;  %v2621_v1 = vor.u32 %v3203_v60, %v2620_v59 }
  0x7c   :  { %1250 = vmatpush.bf16.msrb.mxu1 %v2677_v13  ;;  %v3174_v13 = vld [vmem:[#allocation2 + $0x4] sm:$0xf] }
  0x7d   :  { %1263 = vmatpush.bf16.msrb.mxu2 %v2773_v15  ;;  %1276 = vmatpush.bf16.msrb.mxu3 %v2585_v31  ;;  %v2713_v15 = vor.u32 %v3225_v3, %v2710_v4  ;;  %v2525_v31 = vor.u32 %v3179_v9, %v2524_v8  ;;  %v2509_v24 = vor.u32 %v3174_v13, %v2506_v14  ;;  %v2608_v3 = vld [vmem:[#allocation2 + $0xc8] sm:$0xf]  ;;  %v3200_v4 = vld [vmem:[#allocation2 + $0xd0] sm:$0xf0] }
  0x7e   :  { %v2704_v8 = vld [vmem:[#allocation2 + $0x188] sm:$0xf]  ;;  %v3224_v9 = vld [vmem:[#allocation2 + $0x190] sm:$0xf0] }
  0x7f   :  { %1238 = vmatpush.bf16.msrb.mxu0 %v2569_v21  ;;  %v3221_v21 = vld [vmem:[#allocation2 + $0x178] sm:$0xf0]  ;;  %v2876_v13 = vld [vmem:[#allocation7 + $0xa8] sm:$0xf]  ;;  %v3340_v14 = vld [vmem:[#allocation7 + $0xb0] sm:$0xf0] }
  0x80   :  { %1251 = vmatpush.bf16.msrb.mxu1 %v2665_v22  ;;  %v2788_v22 = vld [vmem:[#allocation2 + $0x230] sm:$0xf]  ;;  %v2693_v28 = vor.u32 %v3221_v21, %v2692_v20  ;;  %v3336_v21 = vld [vmem:[#allocation7 + $0x94] sm:$0xf] }
  0x81   :  { %1264 = vmatpush.bf16.msrb.mxu2 %v2761_v25  ;;  %1277 = vmatpush.bf16.msrb.mxu3 %v2573_v26  ;;  %v2605_v25 = vor.u32 %v3198_v30, %v2602_v16  ;;  %v2701_v26 = vor.u32 %v3222_v17, %v2698_v18  ;;  %v2789_v29 = vor.u32 %v3245_v23, %v2788_v22  ;;  %v3339_v16 = vld [vmem:[#allocation7 + $0xac] sm:$0xf]  ;;  %v2878_v18 = vld [vmem:[#allocation7 + $0xb4] sm:$0xf0]  ;;  %v2866_v22 = vld [vmem:[#allocation7 + $0x9c] sm:$0xf0] }
  0x82   :  { %v2877_v30 = vor.u32 %v3340_v14, %v2876_v13  ;;  %v2881_v20 = vor.u32 %v3339_v16, %v2878_v18  ;;  %v2853_v23 = vor.u32 %v3334_v35, %v2852_v19  ;;  %v2960_v13 = vld [vmem:[#allocation7 + $0x150] sm:$0xf]  ;;  %v3361_v14 = vld [vmem:[#allocation7 + $0x158] sm:$0xf0]  ;;  %v2948_v35 = vld [vmem:[#allocation7 + $0x138] sm:$0xf] }
  0x83   :  { %1239 = vmatpush.bf16.msrb.mxu0 %v2557_v0  ;;  %v3242_v0 = vld [vmem:[#allocation2 + $0x220] sm:$0xf0]  ;;  %v2980_v16 = vld [vmem:[#allocation7 + $0x170] sm:$0xf] }
  0x84   :  { %1252 = vmatpush.bf16.msrb.mxu1 %v2653_v5  ;;  %v2681_v5 = vor.u32 %v3218_v63, %v2680_v32  ;;  %v2777_v34 = vor.u32 %v3242_v0, %v2776_v33  ;;  %v3330_v63 = vld [vmem:[#allocation7 + $0x64] sm:$0xf]  ;;  %v2842_v33 = vld [vmem:[#allocation7 + $0x6c] sm:$0xf0] }
  0x85   :  { %1265 = vmatpush.bf16.msrb.mxu2 %v2749_v37  ;;  %1278 = vmatpush.bf16.msrb.mxu3 %v2561_v38  ;;  %v3215_v37 = vld [vmem:[#allocation2 + $0x148] sm:$0xf0]  ;;  %v2764_v38 = vld [vmem:[#allocation2 + $0x200] sm:$0xf] }
  0x86   :  { %v2669_v40 = vor.u32 %v3215_v37, %v2668_v36  ;;  %v2765_v41 = vor.u32 %v3239_v39, %v2764_v38  ;;  %v2845_v36 = vor.u32 %v3330_v63, %v2842_v33  ;;  %v2816_v37 = vld [vmem:[#allocation7 + $0x30] sm:$0xf]  ;;  %v3325_v38 = vld [vmem:[#allocation7 + $0x38] sm:$0xf0]  ;;  %v3327_v39 = vld [vmem:[#allocation7 + $0x4c] sm:$0xf] }
  0x87   :  { %1240 = vmatpush.bf16.msrb.mxu0 %v2545_v45  ;;  %v3236_v45 = vld [vmem:[#allocation2 + $0x1f0] sm:$0xf0]  ;;  %v2956_v63 = vld [vmem:[#allocation7 + $0x140] sm:$0xf]  ;;  %v3359_v33 = vld [vmem:[#allocation7 + $0x148] sm:$0xf0] }
  0x88   :  { %1253 = vmatpush.bf16.msrb.mxu1 %v2641_v46  ;;  %v2657_v46 = vor.u32 %v3212_v43, %v2656_v42  ;;  %v2753_v47 = vor.u32 %v3236_v45, %v2752_v44  ;;  %v2804_v45 = vld [vmem:[#allocation7 + $0x18] sm:$0xf] }
  0x89   :  { %1266 = vmatpush.bf16.msrb.mxu2 %v2737_v49  ;;  %1279 = vmatpush.bf16.msrb.mxu3 %v2549_v50  ;;  %v3209_v49 = vld [vmem:[#allocation2 + $0x118] sm:$0xf0]  ;;  %v2740_v50 = vld [vmem:[#allocation2 + $0x1d0] sm:$0xf] }
  0x8a   :  { %v2645_v52 = vor.u32 %v3209_v49, %v2644_v48 }
  0x8b   :  { %1241 = vmatpush.bf16.msrb.mxu0 %v2533_v57  ;;  %v2633_v57 = vor.u32 %v3206_v54, %v2632_v53  ;;  %v3319_v53 = vld [vmem:[#allocation7 + $0x8] sm:$0xf0]  ;;  %v3321_v54 = vld [vmem:[#allocation7 + $0x1c] sm:$0xf] }
  0x8c   :  { %1254 = vmatpush.bf16.msrb.mxu1 %v2629_v58  ;;  %v2729_v58 = vor.u32 %v3230_v56, %v2728_v55  ;;  %v2806_v56 = vld [vmem:[#allocation7 + $0x24] sm:$0xf0] }
  0x8d   :  { %1267 = vmatpush.bf16.msrb.mxu2 %v2725_v61  ;;  %1280 = vmatpush.bf16.msrb.mxu3 %v2537_v62  ;;  %v2716_v61 = vld [vmem:[#allocation2 + $0x1a0] sm:$0xf]  ;;  %v3227_v62 = vld [vmem:[#allocation2 + $0x1a8] sm:$0xf0]  ;;  %v2809_v59 = vor.u32 %v3321_v54, %v2806_v56  ;;  %v3349_v56 = vld [vmem:[#allocation7 + $0xf8] sm:$0xf0] }
  0x8e   :  { %v2717_v2 = vor.u32 %v3227_v62, %v2716_v61  ;;  %v3363_v61 = vld [vmem:[#allocation7 + $0x16c] sm:$0xf]  ;;  %v2974_v62 = vld [vmem:[#allocation7 + $0x174] sm:$0xf0] }
  0x8f   :  { %1242 = vmatpush.bf16.msrb.mxu0 %v2521_v10  ;;  %v2609_v10 = vor.u32 %v3200_v4, %v2608_v3  ;;  %v3318_v4 = vld [vmem:[#allocation7 + $0x4] sm:$0xf] }
  0x90   :  { %1255 = vmatpush.bf16.msrb.mxu1 %v2617_v12  ;;  %v2705_v12 = vor.u32 %v3224_v9, %v2704_v8  ;;  %v2794_v8 = vld [vmem:[#allocation7 + $0xc] sm:$0xf0] }
  0x91   :  { %1268 = vmatpush.bf16.msrb.mxu2 %v2713_v15  ;;  %1281 = vmatpush.bf16.msrb.mxu3 %v2525_v31  ;;  %v2864_v15 = vld [vmem:[#allocation7 + $0x90] sm:$0xf]  ;;  %v3337_v31 = vld [vmem:[#allocation7 + $0x98] sm:$0xf0] }
  0x92   :  { %v2865_v17 = vor.u32 %v3337_v31, %v2864_v15  ;;  %v2961_v15 = vor.u32 %v3361_v14, %v2960_v13  ;;  %v2962_v31 = vld [vmem:[#allocation7 + $0x15c] sm:$0xf0]  ;;  %v2900_v14 = vld [vmem:[#allocation7 + $0xd8] sm:$0xf] }
  0x93   :  { %1243 = vmatpush.bf16.msrb.mxu0 %v2509_v24  ;;  %v3331_v24 = vld [vmem:[#allocation7 + $0x68] sm:$0xf0] }
  0x94   :  { %1256 = vmatpush.bf16.msrb.mxu1 %v2605_v25  ;;  %v3333_v25 = vld [vmem:[#allocation7 + $0x7c] sm:$0xf] }
  0x95   :  { %1269 = vmatpush.bf16.msrb.mxu2 %v2701_v26  ;;  %1282 = vmatpush.bf16.msrb.mxu3 %v2513_v27  ;;  %v2854_v27 = vld [vmem:[#allocation7 + $0x84] sm:$0xf0] }
  0x96   :  { %1244 = vmatmul.bf16.vlgmr.msrb.gmra.mxu0 %v3655_v6  ;;  %v2857_v32 = vor.u32 %v3333_v25, %v2854_v27  ;;  %v3355_v27 = vld [vmem:[#allocation7 + $0x128] sm:$0xf0] }
  0x97   :  { %1288 = vmatpush.bf16.msra.mxu0 %v2693_v28  ;;  %1257 = vmatmul.bf16.vlgmr.msrb.gmra.mxu1 %v3659_v7  ;;  %v2828_v28 = vld [vmem:[#allocation7 + $0x48] sm:$0xf] }
  0x98   :  { %1301 = vmatpush.bf16.msra.mxu1 %v2789_v29  ;;  %1270 = vmatmul.bf16.vlgmr.msrb.gmra.mxu2 %v3663_v11  ;;  %v3328_v29 = vld [vmem:[#allocation7 + $0x50] sm:$0xf0] }
  0x99   :  { %1283 = vmatmul.bf16.vlgmr.msrb.gmra.mxu3 %v3655_v6  ;;  %v2741_v6 = vor.u32 %v3233_v51, %v2740_v50  ;;  %1819 = vmatpush.bf16.msra.mxu2 %v2877_v30  ;;  %v2829_v0 = vor.u32 %v3328_v29, %v2828_v28  ;;  %v2818_v51 = vld [vmem:[#allocation7 + $0x3c] sm:$0xf0]  ;;  %v3360_v30 = vld [vmem:[#allocation7 + $0x154] sm:$0xf]  ;;  %v3354_v28 = vld [vmem:[#allocation7 + $0x124] sm:$0xf] }
  0x9a   :  { %v2965_v18 = vor.u32 %v3360_v30, %v2962_v31  ;;  %v3346_v30 = vld [vmem:[#allocation7 + $0xe0] sm:$0xf0] }
  0x9b   :  { %1289 = vmatpush.bf16.msra.mxu0 %v2681_v5 }
  0x9c   :  { %1302 = vmatpush.bf16.msra.mxu1 %v2777_v34 }
  0x9d   :  { %1820 = vmatpush.bf16.msra.mxu2 %v2865_v17  ;;  %v3365_v17 = vld [vmem:[#allocation7 + $0x178] sm:$0xf0] }
  0x9e   :  { %v2981_v19 = vor.u32 %v3365_v17, %v2980_v16  ;;  %v2901_v16 = vor.u32 %v3346_v30, %v2900_v14  ;;  %v3382_v17 = vld [vmem:[#allocation7 + $0x200] sm:$0xf0] }
  0x9f   :  { %1290 = vmatpush.bf16.msra.mxu0 %v2669_v40  ;;  %v2817_v40 = vor.u32 %v3325_v38, %v2816_v37  ;;  %v2957_v38 = vor.u32 %v3359_v33, %v2956_v63  ;;  %v3386_v14 = vld [vmem:[#allocation7 + $0x220] sm:$0xf0] }
  0xa0   :  { %1303 = vmatpush.bf16.msra.mxu1 %v2765_v41  ;;  %v2830_v41 = vld [vmem:[#allocation7 + $0x54] sm:$0xf0] }
  0xa1   :  { %1821 = vmatpush.bf16.msra.mxu2 %v2853_v23  ;;  %v2833_v42 = vor.u32 %v3327_v39, %v2830_v41  ;;  %v2950_v23 = vld [vmem:[#allocation7 + $0x144] sm:$0xf0] }
  0xa2   :  { %v2924_v39 = vld [vmem:[#allocation7 + $0x108] sm:$0xf] }
  0xa3   :  { %1291 = vmatpush.bf16.msra.mxu0 %v2657_v46  ;;  %v3322_v46 = vld [vmem:[#allocation7 + $0x20] sm:$0xf0]  ;;  %v3068_v41 = vld [vmem:[#allocation7 + $0x228] sm:$0xf] }
  0xa4   :  { %1304 = vmatpush.bf16.msra.mxu1 %v2753_v47  ;;  %v3324_v47 = vld [vmem:[#allocation7 + $0x34] sm:$0xf]  ;;  %v2805_v50 = vor.u32 %v3322_v46, %v2804_v45  ;;  %v3351_v45 = vld [vmem:[#allocation7 + $0x10c] sm:$0xf]  ;;  %v2926_v46 = vld [vmem:[#allocation7 + $0x114] sm:$0xf0] }
  0xa7   :  { %1292 = vmatpush.bf16.msra.mxu0 %v2645_v52  ;;  %v2821_v52 = vor.u32 %v3324_v47, %v2818_v51  ;;  %v2944_v51 = vld [vmem:[#allocation7 + $0x128] sm:$0xf] }
  0xa8   :  { %1305 = vmatpush.bf16.msra.mxu1 %v2741_v6  ;;  %v2792_v6 = vld [vmem:[#allocation7] sm:$0xf] }
  0xa9   :  { %v2793_v55 = vor.u32 %v3319_v53, %v2792_v6  ;;  %v2929_v53 = vor.u32 %v3351_v45, %v2926_v46  ;;  %v3376_v45 = vld [vmem:[#allocation7 + $0x1d0] sm:$0xf0] }
  0xab   :  { %1293 = vmatpush.bf16.msra.mxu0 %v2633_v57  ;;  %v2972_v57 = vld [vmem:[#allocation7 + $0x168] sm:$0xf] }
  0xac   :  { %1306 = vmatpush.bf16.msra.mxu1 %v2729_v58  ;;  %v3364_v58 = vld [vmem:[#allocation7 + $0x170] sm:$0xf0] }
  0xad   :  { %v2973_v60 = vor.u32 %v3364_v58, %v2972_v57  ;;  %v3056_v57 = vld [vmem:[#allocation7 + $0x210] sm:$0xf] }
  0xaf   :  { %1294 = vmatpush.bf16.msra.mxu0 %v2621_v1  ;;  %v2977_v1 = vor.u32 %v3363_v61, %v2974_v62  ;;  %1832 = vmatpush.bf16.msra.mxu3 %v2973_v60  ;;  %v3385_v61 = vld [vmem:[#allocation7 + $0x218] sm:$0xf0]  ;;  %v3348_v62 = vld [vmem:[#allocation7 + $0xf4] sm:$0xf] }
  0xb0   :  { %1307 = vmatpush.bf16.msra.mxu1 %v2717_v2 }
  0xb3   :  { %1295 = vmatpush.bf16.msra.mxu0 %v2609_v10  ;;  %1833 = vmatpush.bf16.msra.mxu3 %v2961_v15  ;;  %v3044_v15 = vld [vmem:[#allocation7 + $0x1f8] sm:$0xf] }
  0xb4   :  { %1308 = vmatpush.bf16.msra.mxu1 %v2705_v12  ;;  %v2797_v12 = vor.u32 %v3318_v4, %v2794_v8  ;;  %v2932_v4 = vld [vmem:[#allocation7 + $0x110] sm:$0xf]  ;;  %v3353_v8 = vld [vmem:[#allocation7 + $0x118] sm:$0xf0] }
  0xb6   :  { %1296 = vmatmul.bf16.vlgmr.msra.gmra.mxu0 %v3659_v7  ;;  %v2869_v7 = vor.u32 %v3336_v21, %v2866_v22  ;;  %v3357_v21 = vld [vmem:[#allocation7 + $0x13c] sm:$0xf] }
  0xb7   :  { %1309 = vmatmul.bf16.vlgmr.msra.gmra.mxu1 %v3663_v11  ;;  %v2840_v11 = vld [vmem:[#allocation7 + $0x60] sm:$0xf] }
  0xb8   :  { %1858 = vmatpush.bf16.msrb.mxu1 %v2881_v20  ;;  %v2841_v26 = vor.u32 %v3331_v24, %v2840_v11  ;;  %v3358_v20 = vld [vmem:[#allocation7 + $0x140] sm:$0xf0]  ;;  %v2953_v24 = vor.u32 %v3357_v21, %v2950_v23 }
  0xb9   :  { %v2949_v22 = vor.u32 %v3358_v20, %v2948_v35  ;;  %v3362_v11 = vld [vmem:[#allocation7 + $0x160] sm:$0xf0]  ;;  %v3045_v20 = vor.u32 %v3382_v17, %v3044_v15  ;;  %v2996_v15 = vld [vmem:[#allocation7 + $0x198] sm:$0xf] }
  0xba   :  { %1822 = vmatpush.bf16.msra.mxu2 %v2841_v26  ;;  %v2936_v26 = vld [vmem:[#allocation7 + $0x120] sm:$0xf]  ;;  %v3350_v23 = vld [vmem:[#allocation7 + $0x100] sm:$0xf0] }
  0xbb   :  { %1834 = vmatpush.bf16.msra.mxu3 %v2949_v22  ;;  %v2937_v29 = vor.u32 %v3355_v27, %v2936_v26  ;;  %v2920_v22 = vld [vmem:[#allocation7 + $0xf8] sm:$0xf]  ;;  %v3379_v27 = vld [vmem:[#allocation7 + $0x1e8] sm:$0xf0]  ;;  %v3370_v17 = vld [vmem:[#allocation7 + $0x1a0] sm:$0xf0] }
  0xbc   :  { %1859 = vmatpush.bf16.msrb.mxu1 %v2869_v7  ;;  %v2968_v7 = vld [vmem:[#allocation7 + $0x158] sm:$0xf] }
  0xbd   :  { %v2969_v25 = vor.u32 %v3362_v11, %v2968_v7  ;;  %v2888_v11 = vld [vmem:[#allocation7 + $0xc0] sm:$0xf] }
  0xbe   :  { %1823 = vmatpush.bf16.msra.mxu2 %v2829_v0 }
  0xbf   :  { %1835 = vmatpush.bf16.msra.mxu3 %v2937_v29  ;;  %v2890_v29 = vld [vmem:[#allocation7 + $0xcc] sm:$0xf0] }
  0xc0   :  { %1860 = vmatpush.bf16.msrb.mxu1 %v2857_v32  ;;  %v2938_v32 = vld [vmem:[#allocation7 + $0x12c] sm:$0xf0] }
  0xc1   :  { %v2941_v37 = vor.u32 %v3354_v28, %v2938_v32  ;;  %v3342_v28 = vld [vmem:[#allocation7 + $0xc4] sm:$0xf] }
  0xc2   :  { %1824 = vmatpush.bf16.msra.mxu2 %v2817_v40  ;;  %v3352_v40 = vld [vmem:[#allocation7 + $0x110] sm:$0xf0]  ;;  %v2893_v33 = vor.u32 %v3342_v28, %v2890_v29  ;;  %v3022_v28 = vld [vmem:[#allocation7 + $0x1d4] sm:$0xf0] }
  0xc3   :  { %v3675_v5 = vpop.f32.mrf.mxu0  ;;  %v3677_v34 = vpop.f32.mrf.mxu1  ;;  %v2925_v6 = vor.u32 %v3352_v40, %v2924_v39  ;;  %v3387_v39 = vld [vmem:[#allocation7 + $0x22c] sm:$0xf] }
  0xc4   :  { %1861 = vmatpush.bf16.msrb.mxu1 %v2845_v36  ;;  %v719_v13 = vadd.f32 %v3677_v34, %v3675_v5  ;;  %v3696_v5 = vld [vmem:[%s3725_s4] sm:$0x7]  ;;  %v2921_v34 = vor.u32 %v3350_v23, %v2920_v22  ;;  %v3367_v22 = vld [vmem:[#allocation7 + $0x188] sm:$0xf0] }
  0xc5   :  { %1836 = vmatpush.bf16.msra.mxu3 %v2925_v6  ;;  %v3384_v6 = vld [vmem:[#allocation7 + $0x214] sm:$0xf] }
  0xc6   :  { %1825 = vmatpush.bf16.msra.mxu2 %v2805_v50 }
  0xc8   :  { %1862 = vmatpush.bf16.msrb.mxu1 %v2833_v42 }
  0xca   :  { %v3679_v48 = vpop.f32.mrf.mxu2  ;;  %1826 = vmatpush.bf16.msra.mxu2 %v2793_v55  ;;  %v2912_v55 = vld [vmem:[#allocation7 + $0xf0] sm:$0xf] }
  0xcb   :  { %v707_v43 = vpop.f32.mrf.mxu0  ;;  %v720_v44 = vpop.f32.mrf.mxu1  ;;  %v2913_v60 = vor.u32 %v3349_v56, %v2912_v55  ;;  %v732_v7 = vadd.f32 %v3679_v48, %v719_v13  ;;  %v3070_v48 = vld [vmem:[#allocation7 + $0x234] sm:$0xf0]  ;;  %v3058_v56 = vld [vmem:[#allocation7 + $0x21c] sm:$0xf0] }
  0xcc   :  { %v3681_v49 = vpop.f32.mrf.mxu3  ;;  %1863 = vmatpush.bf16.msrb.mxu1 %v2821_v52  ;;  %v3388_v44 = vld [vmem:[#allocation7 + $0x230] sm:$0xf0]  ;;  %v3064_v13 = vld [vmem:[#allocation7 + $0x218] sm:$0xf] }
  0xcd   :  { %v3069_v50 = vor.u32 %v3388_v44, %v3068_v41  ;;  %v3356_v52 = vld [vmem:[#allocation7 + $0x130] sm:$0xf0]  ;;  %1837 = vmatpush.bf16.msra.mxu3 %v2913_v60  ;;  %v3020_v44 = vld [vmem:[#allocation7 + $0x1c8] sm:$0xf]  ;;  %v3389_v60 = vld [vmem:[#allocation7 + $0x238] sm:$0xf0]  ;;  %v3065_v23 = vor.u32 %v3386_v14, %v3064_v13 }
  0xce   :  { %1871 = vmatpush.bf16.msrb.mxu2 %v2977_v1  ;;  %v2945_v54 = vor.u32 %v3356_v52, %v2944_v51  ;;  %v2914_v1 = vld [vmem:[#allocation7 + $0xfc] sm:$0xf0]  ;;  %v2896_v51 = vld [vmem:[#allocation7 + $0xc8] sm:$0xf]  ;;  %v3344_v52 = vld [vmem:[#allocation7 + $0xd0] sm:$0xf0] }
  0xcf   :  { %1845 = vmatpush.bf16.msrb.mxu0 %v3069_v50  ;;  %v3021_v50 = vor.u32 %v3376_v45, %v3020_v44  ;;  %v2897_v55 = vor.u32 %v3344_v52, %v2896_v51  ;;  %v3369_v51 = vld [vmem:[#allocation7 + $0x19c] sm:$0xf]  ;;  %v2998_v52 = vld [vmem:[#allocation7 + $0x1a4] sm:$0xf0] }
  0xd0   :  { %1864 = vmatpush.bf16.msrb.mxu1 %v2809_v59 }
  0xd1   :  { %1838 = vmatpush.bf16.msra.mxu3 %v2901_v16 }
  0xd2   :  { %v733_v2 = vpop.f32.mrf.mxu2  ;;  %1872 = vmatpush.bf16.msrb.mxu2 %v2965_v18  ;;  %v3345_v18 = vld [vmem:[#allocation7 + $0xdc] sm:$0xf] }
  0xd3   :  { %v3685_v10 = vpop.f32.mrf.mxu0  ;;  %v3057_v2 = vor.u32 %v3385_v61, %v3056_v57  ;;  %v3061_v57 = vor.u32 %v3384_v6, %v3058_v56  ;;  %v3008_v61 = vld [vmem:[#allocation7 + $0x1b0] sm:$0xf]  ;;  %v2860_v6 = vld [vmem:[#allocation7 + $0x80] sm:$0xf]  ;;  %v3374_v56 = vld [vmem:[#allocation7 + $0x1c0] sm:$0xf0] }
  0xd4   :  { %v746_v3 = vpop.f32.mrf.mxu3  ;;  %v3683_v9 = vpop.f32.mrf.mxu1  ;;  %1865 = vmatpush.bf16.msrb.mxu1 %v2797_v12  ;;  %v2933_v12 = vor.u32 %v3353_v8, %v2932_v4  ;;  %v3046_v4 = vld [vmem:[#allocation7 + $0x204] sm:$0xf0] }
  0xd5   :  { %v2917_v3 = vor.u32 %v3348_v62, %v2914_v1  ;;  %1846 = vmatpush.bf16.msrb.mxu0 %v3057_v2  ;;  %v3373_v62 = vld [vmem:[#allocation7 + $0x1b8] sm:$0xf0] }
  0xd6   :  { %1873 = vmatpush.bf16.msrb.mxu2 %v2953_v24  ;;  %v3343_v24 = vld [vmem:[#allocation7 + $0xc8] sm:$0xf0]  ;;  %v3009_v2 = vor.u32 %v3373_v62, %v3008_v61  ;;  %v3332_v62 = vld [vmem:[#allocation7 + $0x70] sm:$0xf0] }
  0xd7   :  { %v2889_v26 = vor.u32 %v3343_v24, %v2888_v11  ;;  %v2884_v11 = vld [vmem:[#allocation7 + $0xb0] sm:$0xf]  ;;  %v3341_v24 = vld [vmem:[#allocation7 + $0xb8] sm:$0xf0] }
  0xd8   :  { %1910 = vmatpush.bf16.msra.mxu1 %v2981_v19  ;;  %v2902_v19 = vld [vmem:[#allocation7 + $0xe4] sm:$0xf0]  ;;  %v2885_v29 = vor.u32 %v3341_v24, %v2884_v11 }
  0xd9   :  { %v2905_v21 = vor.u32 %v3345_v18, %v2902_v19  ;;  %1847 = vmatpush.bf16.msrb.mxu0 %v3045_v20  ;;  %1839 = vmatpush.bf16.msra.mxu3 %v2889_v26  ;;  %v3378_v18 = vld [vmem:[#allocation7 + $0x1e4] sm:$0xf]  ;;  %v3034_v19 = vld [vmem:[#allocation7 + $0x1ec] sm:$0xf0]  ;;  %v2997_v20 = vor.u32 %v3370_v17, %v2996_v15  ;;  %v3329_v17 = vld [vmem:[#allocation7 + $0x58] sm:$0xf0] }
  0xda   :  { %1874 = vmatpush.bf16.msrb.mxu2 %v2941_v37 }
  0xdb   :  { %v759_v36 = vpop.f32.mrf.mxu0  ;;  %v783_v42 = vpop.f32.mrf.mxu2 }
  0xdc   :  { %v772_v0 = vpop.f32.mrf.mxu1  ;;  %1911 = vmatpush.bf16.msra.mxu1 %v2969_v25  ;;  %v3032_v25 = vld [vmem:[#allocation7 + $0x1e0] sm:$0xf]  ;;  %v3347_v36 = vld [vmem:[#allocation7 + $0xe8] sm:$0xf0] }
  0xdd   :  { %v796_v43 = vpop.f32.mrf.mxu3  ;;  %v3033_v63 = vor.u32 %v3379_v27, %v3032_v25  ;;  %v2908_v0 = vld [vmem:[#allocation7 + $0xe0] sm:$0xf]  ;;  %v3383_v25 = vld [vmem:[#allocation7 + $0x208] sm:$0xf0] }
  0xde   :  { %v3687_v47 = vadd.f32 %v796_v43, %v783_v42  ;;  %1875 = vmatpush.bf16.msrb.mxu2 %v2929_v53  ;;  %v1316_v42 = vperm.slane %v3696_v5, 0  ;;  %v3073_v43 = vor.u32 %v3387_v39, %v3070_v48  ;;  %v3375_v27 = vld [vmem:[#allocation7 + $0x1cc] sm:$0xf]  ;;  %v2872_v39 = vld [vmem:[#allocation7 + $0x98] sm:$0xf] }
  0xdf   :  { %1848 = vmatpush.bf16.msrb.mxu0 %v3033_v63  ;;  %v3025_v63 = vor.u32 %v3375_v27, %v3022_v28  ;;  %v2812_v28 = vld [vmem:[#allocation7 + $0x20] sm:$0xf] }
  0xe0   :  { %1912 = vmatpush.bf16.msra.mxu1 %v2957_v38  ;;  %v2909_v38 = vor.u32 %v3347_v36, %v2908_v0  ;;  %1884 = vmatpush.bf16.msrb.mxu3 %v3073_v43  ;;  %v3380_v0 = vld [vmem:[#allocation7 + $0x1f0] sm:$0xf0]  ;;  %v758_v36 = vadd.f32 %v3685_v10, %v3681_v49  ;;  %v3377_v43 = vld [vmem:[#allocation7 + $0x1d8] sm:$0xf0]  ;;  %v3001_v10 = vor.u32 %v3369_v51, %v2998_v52  ;;  %v3395_v52 = vld [vmem:[#allocation8 + $0x28] sm:$0xff] }
  0xe1   :  { %v3405_v51 = vld [vmem:[#allocation8 + $0x78] sm:$0xff] }
  0xe2   :  { %1876 = vmatpush.bf16.msrb.mxu2 %v2917_v3  ;;  %v3381_v3 = vld [vmem:[#allocation7 + $0x1fc] sm:$0xf]  ;;  %v771_v45 = vadd.f32 %v3683_v9, %v758_v36 }
  0xe3   :  { %v785_v58 = vpop.f32.mrf.mxu2  ;;  %1849 = vmatpush.bf16.msrb.mxu0 %v3021_v50  ;;  %v3049_v30 = vor.u32 %v3381_v3, %v3046_v4  ;;  %v3004_v3 = vld [vmem:[#allocation7 + $0x1a0] sm:$0xf]  ;;  %v3371_v4 = vld [vmem:[#allocation7 + $0x1a8] sm:$0xf0] }
  0xe4   :  { %1913 = vmatpush.bf16.msra.mxu1 %v2945_v54  ;;  %1885 = vmatpush.bf16.msrb.mxu3 %v3061_v57 }
  0xe5   :  { %v798_v59 = vpop.f32.mrf.mxu3 }
  0xe6   :  { %1877 = vmatpush.bf16.msrb.mxu2 %v2905_v21  ;;  %v3076_v59 = vld [vmem:[#allocation7 + $0x230] sm:$0xf]  ;;  %v2984_v21 = vld [vmem:[#allocation7 + $0x180] sm:$0xf] }
  0xe7   :  { %1850 = vmatpush.bf16.msrb.mxu0 %v3009_v2  ;;  %v2985_v26 = vor.u32 %v3367_v22, %v2984_v21  ;;  %v1317_v2 = vperm.slane %v3696_v5, 1  ;;  %v2992_v21 = vld [vmem:[#allocation7 + $0x188] sm:$0xf]  ;;  %v3368_v22 = vld [vmem:[#allocation7 + $0x190] sm:$0xf0] }
  0xe8   :  { %1914 = vmatpush.bf16.msra.mxu1 %v2933_v12  ;;  %v3077_v12 = vor.u32 %v3389_v60, %v3076_v59  ;;  %1886 = vmatpush.bf16.msrb.mxu3 %v3049_v30  ;;  %v2986_v59 = vld [vmem:[#allocation7 + $0x18c] sm:$0xf0]  ;;  %v2848_v60 = vld [vmem:[#allocation7 + $0x68] sm:$0xf]  ;;  %v2993_v11 = vor.u32 %v3368_v22, %v2992_v21 }
  0xea   :  { %1878 = vmatpush.bf16.msrb.mxu2 %v2893_v33  ;;  %v3040_v33 = vld [vmem:[#allocation7 + $0x1e8] sm:$0xf] }
  0xeb   :  { %1851 = vmatpush.bf16.msrb.mxu0 %v2997_v20  ;;  %v3041_v48 = vor.u32 %v3380_v0, %v3040_v33  ;;  %v3320_v33 = vld [vmem:[#allocation7 + $0x10] sm:$0xf0] }
  0xec   :  { %1915 = vmatpush.bf16.msra.mxu1 %v2921_v34  ;;  %v3052_v34 = vld [vmem:[#allocation7 + $0x200] sm:$0xf] }
  0xef   :  { %1852 = vmatpush.bf16.msrb.mxu0 %v2985_v26 }
  0xf0   :  { %1916 = vmatpush.bf16.msra.mxu1 %v2909_v38  ;;  %v3010_v38 = vld [vmem:[#allocation7 + $0x1bc] sm:$0xf0] }
  0xf3   :  { %v3691_v35 = vpop.f32.mrf.mxu0  ;;  %1897 = vmatpush.bf16.msra.mxu0 %v2885_v29  ;;  %v3323_v29 = vld [vmem:[#allocation7 + $0x28] sm:$0xf0] }
  0xf4   :  { %v1206_v31 = vpop.f32.mrf.mxu1  ;;  %1917 = vmatpush.bf16.msra.mxu1 %v2897_v55  ;;  %v3016_v55 = vld [vmem:[#allocation7 + $0x1b8] sm:$0xf]  ;;  %v810_v36 = vadd.f32 %v3691_v35, %v3687_v47  ;;  %v3396_v47 = vld [vmem:[#allocation8 + $0x30] sm:$0xff] }
  0xf5   :  { %v1207_v32 = vadd.f32 %v1206_v31, %v732_v7  ;;  %v3037_v7 = vor.u32 %v3378_v18, %v3034_v19  ;;  %v3017_v9 = vor.u32 %v3374_v56, %v3016_v55  ;;  %v3005_v18 = vor.u32 %v3371_v4, %v3004_v3  ;;  %v3413_v55 = vld [vmem:[#allocation8 + $0xb8] sm:$0xff]  ;;  %v3398_v4 = vld [vmem:[#allocation8 + $0x40] sm:$0xff] }
  0xf7   :  { %1887 = vmatpush.bf16.msrb.mxu3 %v3037_v7 }
  0xfb   :  { %v1219_v37 = vpop.f32.mrf.mxu2  ;;  %v811_v54 = vpop.f32.mrf.mxu0  ;;  %1888 = vmatpush.bf16.msrb.mxu3 %v3025_v63  ;;  %v2800_v63 = vld [vmem:[#allocation7 + $0x8] sm:$0xf] }
  0xfc   :  { %v1220_v40 = vadd.f32 %v1219_v37, %v1207_v32  ;;  %v1208_v46 = vpop.f32.mrf.mxu1  ;;  %v3053_v32 = vor.u32 %v3383_v25, %v3052_v34  ;;  %v3372_v37 = vld [vmem:[#allocation7 + $0x1b4] sm:$0xf]  ;;  %v3326_v34 = vld [vmem:[#allocation7 + $0x40] sm:$0xf0]  ;;  %v2801_v0 = vor.u32 %v3320_v33, %v2800_v63 }
  0xfd   :  { %v1232_v41 = vpop.f32.mrf.mxu3 }
  0xfe   :  { %v1233_v53 = vadd.f32 %v1232_v41, %v1220_v40  ;;  %v3013_v40 = vor.u32 %v3372_v37, %v3010_v38  ;;  %v3338_v41 = vld [vmem:[#allocation7 + $0xa0] sm:$0xf0] }
  0xff   :  { %v2873_v44 = vor.u32 %v3338_v41, %v2872_v39 }
 0x100   :  { %v1322_v58 = vadd.f32 %v1316_v42, %v1233_v53  ;;  %v3028_v42 = vld [vmem:[#allocation7 + $0x1d0] sm:$0xf]  ;;  %1889 = vmatpush.bf16.msrb.mxu3 %v3013_v40  ;;  %v3335_v53 = vld [vmem:[#allocation7 + $0x88] sm:$0xf0]  ;;  %v1318_v40 = vperm.slane %v3696_v5, 2 }
 0x101   :  { %1898 = vmatpush.bf16.msra.mxu0 %v2873_v44  ;;  %v3029_v49 = vor.u32 %v3377_v43, %v3028_v42  ;;  %v2861_v57 = vor.u32 %v3335_v53, %v2860_v6  ;;  %v3404_v5 = vld [vmem:[#allocation8 + $0x70] sm:$0xff]  ;;  %v3403_v53 = vld [vmem:[#allocation8 + $0x68] sm:$0xff] }
 0x102   :  { %v1325_v1 = vmax.f32 %v1322_v58, 0.0  ;;  %v3366_v58 = vld [vmem:[#allocation7 + $0x184] sm:$0xf] }
 0x103   :  { %v1221_v8 = vpop.f32.mrf.mxu2  ;;  %v2989_v61 = vor.u32 %v3366_v58, %v2986_v59  ;;  %v3401_v58 = vld [vmem:[#allocation8 + $0x58] sm:$0xff]  ;;  %v3391_v59 = vld [vmem:[#allocation8 + $0x8] sm:$0xff] }
 0x104   :  { %v3700_v31 = vpack.c.bf16 %v1325_v1, %v1325_v1  ;;  %1890 = vmatpush.bf16.msrb.mxu3 %v3001_v10  ;;  %v2849_v8 = vor.u32 %v3332_v62, %v2848_v60  ;;  %v3412_v60 = vld [vmem:[#allocation8 + $0xb0] sm:$0xff]  ;;  %v3411_v62 = vld [vmem:[#allocation8 + $0xa8] sm:$0xff] }
 0x105   :  { %v1234_v16 = vpop.f32.mrf.mxu3  ;;  %1899 = vmatpush.bf16.msra.mxu0 %v2861_v57  ;;  %v3392_v57 = vld [vmem:[#allocation8 + $0x10] sm:$0xff] }
 0x106   :  { %1827 = vmatmul.bf16.vlgmr.msra.gmra.mxu2 %v3700_v31  ;;  %1866 = vmatmul.bf16.vlgmr.msrb.gmra.mxu1 %v3700_v31  ;;  %v2836_v16 = vld [vmem:[#allocation7 + $0x50] sm:$0xf] }
 0x107   :  { %1923 = vmatpush.bf16.msra.mxu2 %v3077_v12  ;;  %v2837_v19 = vor.u32 %v3329_v17, %v2836_v16  ;;  %2164 = vmatpush.bf16.msrb.mxu1 %v3413_v55 }
 0x108   :  { %1891 = vmatpush.bf16.msrb.mxu3 %v2989_v61  ;;  %v3390_v61 = vld [vmem:[#allocation8] sm:$0xff] }
 0x109   :  { %1900 = vmatpush.bf16.msra.mxu0 %v2849_v8  ;;  %v3409_v8 = vld [vmem:[#allocation8 + $0x98] sm:$0xff] }
 0x10b   :  { %1924 = vmatpush.bf16.msra.mxu2 %v3065_v23  ;;  %v2824_v23 = vld [vmem:[#allocation7 + $0x38] sm:$0xf]  ;;  %2165 = vmatpush.bf16.msrb.mxu1 %v3412_v60 }
 0x10c   :  { %v2825_v25 = vor.u32 %v3326_v34, %v2824_v23 }
 0x10d   :  { %1901 = vmatpush.bf16.msra.mxu0 %v2837_v19  ;;  %v1427_v19 = vld [vmem:[%s3727_s6] sm:$0x7] }
 0x10e   :  { %v1430_v22 = vperm.slane %v1427_v19, 1 }
 0x10f   :  { %1925 = vmatpush.bf16.msra.mxu2 %v3053_v32  ;;  %v2813_v32 = vor.u32 %v3323_v29, %v2812_v28  ;;  %2166 = vmatpush.bf16.msrb.mxu1 %v3411_v62 }
 0x111   :  { %1902 = vmatpush.bf16.msra.mxu0 %v2825_v25 }
 0x113   :  { %v1245_v46 = vpop.f32.mrf.mxu0  ;;  %1926 = vmatpush.bf16.msra.mxu2 %v3041_v48 }
 0x114   :  { %v1258_v50 = vpop.f32.mrf.mxu1  ;;  %v1246_v54 = vadd.f32 %v1245_v46, %v771_v45 }
 0x115   :  { %1903 = vmatpush.bf16.msra.mxu0 %v2813_v32 }
 0x116   :  { %v1259_v1 = vadd.f32 %v1258_v50, %v1246_v54  ;;  %v3397_v50 = vld [vmem:[#allocation8 + $0x38] sm:$0xff] }
 0x117   :  { %1927 = vmatpush.bf16.msra.mxu2 %v3029_v49  ;;  %v3394_v49 = vld [vmem:[#allocation8 + $0x20] sm:$0xff]  ;;  %v3393_v54 = vld [vmem:[#allocation8 + $0x18] sm:$0xff] }
 0x119   :  { %1904 = vmatpush.bf16.msra.mxu0 %v2801_v0  ;;  %v1431_v0 = vperm.slane %v1427_v19, 2 }
 0x11b   :  { %v1271_v12 = vpop.f32.mrf.mxu2  ;;  %v1247_v30 = vpop.f32.mrf.mxu0  ;;  %1928 = vmatpush.bf16.msra.mxu2 %v3017_v9  ;;  %v3400_v9 = vld [vmem:[#allocation8 + $0x50] sm:$0xff] }
 0x11c   :  { %v1284_v13 = vpop.f32.mrf.mxu3  ;;  %v1272_v14 = vadd.f32 %v1271_v12, %v1259_v1  ;;  %v1260_v15 = vpop.f32.mrf.mxu1  ;;  %v3399_v1 = vld [vmem:[#allocation8 + $0x48] sm:$0xff] }
 0x11d   :  { %v1285_v37 = vadd.f32 %v1284_v13, %v810_v36  ;;  %v3407_v15 = vld [vmem:[#allocation8 + $0x88] sm:$0xff] }
 0x11e   :  { %v1323_v20 = vadd.f32 %v1317_v2, %v1272_v14  ;;  %v3410_v2 = vld [vmem:[#allocation8 + $0xa0] sm:$0xff]  ;;  %v3408_v14 = vld [vmem:[#allocation8 + $0x90] sm:$0xff] }
 0x11f   :  { %1929 = vmatpush.bf16.msra.mxu2 %v3005_v18  ;;  %2167 = vmatpush.bf16.msrb.mxu1 %v3410_v2  ;;  %v3406_v18 = vld [vmem:[#allocation8 + $0x80] sm:$0xff] }
 0x120   :  { %v1326_v7 = vmax.f32 %v1323_v20, 0.0  ;;  %v1429_v20 = vperm.slane %v1427_v19, 0 }
 0x122   :  { %v1425_v24 = vpack.c.bf16 %v1326_v7, %v1326_v7 }
 0x123   :  { %v1273_v26 = vpop.f32.mrf.mxu2  ;;  %1930 = vmatpush.bf16.msra.mxu2 %v2993_v11  ;;  %2168 = vmatpush.bf16.msrb.mxu1 %v3409_v8 }
 0x124   :  { %v1286_v27 = vpop.f32.mrf.mxu3  ;;  %1840 = vmatmul.bf16.vlgmr.msra.gmra.mxu3 %v1425_v24  ;;  %1879 = vmatmul.bf16.vlgmr.msrb.gmra.mxu2 %v1425_v24 }
 0x125   :  { %1918 = vmatmul.bf16.vlgmr.msra.gmra.mxu1 %v1425_v24  ;;  %2138 = vmatpush.bf16.msra.mxu3 %v3397_v50  ;;  %v2177_v50 = vlaneseq }
 0x127   :  { %2169 = vmatpush.bf16.msrb.mxu1 %v3408_v14 }
 0x129   :  { %2139 = vmatpush.bf16.msra.mxu3 %v3396_v47 }
 0x12b   :  { %2170 = vmatpush.bf16.msrb.mxu1 %v3407_v15 }
 0x12d   :  { %2140 = vmatpush.bf16.msra.mxu3 %v3395_v52  ;;  %v2178_v52 = vand.u32 127, %v2177_v50 }
 0x12f   :  { %2171 = vmatpush.bf16.msrb.mxu1 %v3406_v18  ;;  %vm2179_vm0 = vcmp.lt.s32.totalorder %v2178_v52, 3 }
 0x131   :  { %2141 = vmatpush.bf16.msra.mxu3 %v3394_v49 }
 0x133   :  { %v1297_v38 = vpop.f32.mrf.mxu0 }
 0x134   :  { %v1310_v39 = vpop.f32.mrf.mxu1  ;;  %v1298_v48 = vadd.f32 %v1297_v38, %v1285_v37 }
 0x135   :  { %2142 = vmatpush.bf16.msra.mxu3 %v3393_v54 }
 0x136   :  { %v1311_v41 = vadd.f32 %v1310_v39, %v1298_v48 }
 0x138   :  { %v1324_v42 = vadd.f32 %v1318_v40, %v1311_v41 }
 0x139   :  { %2143 = vmatpush.bf16.msra.mxu3 %v3392_v57 }
 0x13a   :  { %v1327_v43 = vmax.f32 %v1324_v42, 0.0 }
 0x13b   :  { %v1299_v44 = vpop.f32.mrf.mxu0 }
 0x13c   :  { %v1312_v45 = vpop.f32.mrf.mxu1  ;;  %v1426_v46 = vpack.c.bf16 %v1327_v43, %v1327_v43 }
 0x13d   :  { %2144 = vmatpush.bf16.msra.mxu3 %v3391_v59 }
 0x13e   :  { %1853 = vmatmul.bf16.vlgmr.msrb.gmra.mxu0 %v1426_v46  ;;  %1892 = vmatmul.bf16.vlgmr.msrb.gmra.mxu3 %v1426_v46 }
 0x13f   :  { %1931 = vmatmul.bf16.vlgmr.msra.gmra.mxu2 %v1426_v46  ;;  %2151 = vmatpush.bf16.msrb.mxu0 %v3405_v51  ;;  %v3423_v46 = vld [vmem:[%s3729_s8] ss:$0 sm:$0xff]  ;;  %s3564_s8 = smov [#allocation10]  }
 0x140   :  { %s2200_s14 = sshll.u32 %s3564_s8, 4  ;;  %s2201_s14 = int_to_ptr.vmem [resolvable:$true] %s2200_s14 }
 0x141   :  { %2145 = vmatpush.bf16.msra.mxu3 %v3390_v61 }
 0x143   :  { %2152 = vmatpush.bf16.msrb.mxu0 %v3404_v5 }
 0x147   :  { %2153 = vmatpush.bf16.msrb.mxu0 %v3403_v53 }
 0x14e   :  { %1905 = vmatmul.bf16.vlgmr.msra.gmra.mxu0 %v3700_v31  ;;  %v3402_v31 = vld [vmem:[#allocation8 + $0x60] sm:$0xff] }
 0x14f   :  { %2154 = vmatpush.bf16.msrb.mxu0 %v3402_v31 }
 0x153   :  { %2155 = vmatpush.bf16.msrb.mxu0 %v3401_v58 }
 0x157   :  { %2156 = vmatpush.bf16.msrb.mxu0 %v3400_v9 }
 0x15b   :  { %2157 = vmatpush.bf16.msrb.mxu0 %v3399_v1 }
 0x15f   :  { %2158 = vmatpush.bf16.msrb.mxu0 %v3398_v4 }
 0x183   :  { %v1867_v35 = vpop.f32.mrf.mxu1 }
 0x184   :  { %v1868_v11 = vadd.f32 %v1867_v35, %v1430_v22 }
 0x189   :  { %v1828_v6 = vpop.f32.mrf.mxu2 }
 0x18a   :  { %v1829_v21 = vadd.f32 %v1828_v6, %v1429_v20 }
 0x18b   :  { %v1869_v10 = vpop.f32.mrf.mxu1 }
 0x191   :  { %v1830_v56 = vpop.f32.mrf.mxu2 }
 0x1a2   :  { %v1919_v3 = vpop.f32.mrf.mxu1 }
 0x1a7   :  { %v1841_v12 = vpop.f32.mrf.mxu3  ;;  %v1880_v13 = vpop.f32.mrf.mxu2 }
 0x1a8   :  { %v1842_v23 = vadd.f32 %v1841_v12, %v1829_v21  ;;  %v1881_v25 = vadd.f32 %v1880_v13, %v1868_v11 }
 0x1aa   :  { %v1921_v30 = vpop.f32.mrf.mxu1 }
 0x1af   :  { %v1843_v16 = vpop.f32.mrf.mxu3  ;;  %v1882_v17 = vpop.f32.mrf.mxu2 }
 0x1bb   :  { %v1854_v34 = vpop.f32.mrf.mxu0 }
 0x1bc   :  { %v1855_v7 = vadd.f32 %v1854_v34, %v1842_v23 }
 0x1be   :  { %v1936_v24 = vmax.f32 %v1855_v7, 0.0 }
 0x1c0   :  { %v1987_v26 = vpack.c.bf16 %v1936_v24, %v1936_v24 }
 0x1c1   :  { %v1893_v27 = vpop.f32.mrf.mxu3 }
 0x1c2   :  { %v1894_v28 = vadd.f32 %v1893_v27, %v1881_v25  ;;  %v1932_v29 = vpop.f32.mrf.mxu2  ;;  %2146 = vmatmul.bf16.vlgmr.msra.gmra.mxu3 %v1987_v26 }
 0x1c3   :  { %v1856_v32 = vpop.f32.mrf.mxu0 }
 0x1c4   :  { %v1937_v63 = vmax.f32 %v1894_v28, 0.0 }
 0x1c6   :  { %v1988_v33 = vpack.c.bf16 %v1937_v63, %v1937_v63 }
 0x1c8   :  { %2159 = vmatmul.bf16.vlgmr.msrb.gmra.mxu0 %v1988_v33 }
 0x1c9   :  { %v1895_v36 = vpop.f32.mrf.mxu3 }
 0x1ca   :  { %v1934_v37 = vpop.f32.mrf.mxu2 }
 0x1cb   :  { %v1906_v38 = vpop.f32.mrf.mxu0 }
 0x1cc   :  { %v1907_v39 = vadd.f32 %v1906_v38, %v1431_v0 }
 0x1ce   :  { %v1920_v48 = vadd.f32 %v1919_v3, %v1907_v39 }
 0x1d0   :  { %v1933_v40 = vadd.f32 %v1932_v29, %v1920_v48 }
 0x1d2   :  { %v1938_v41 = vmax.f32 %v1933_v40, 0.0 }
 0x1d3   :  { %v1908_v42 = vpop.f32.mrf.mxu0 }
 0x1d4   :  { %v1989_v43 = vpack.c.bf16 %v1938_v41, %v1938_v41 }
 0x1d6   :  { %2172 = vmatmul.bf16.vlgmr.msrb.gmra.mxu1 %v1989_v43 }
 0x245   :  { %v2147_v44 = vpop.f32.mrf.mxu3  ;;  %v2160_v45 = vpop.f32.mrf.mxu0 }
 0x246   :  { %v2148_v51 = vadd.f32 %v3423_v46, %v2147_v44 }
 0x248   :  { %v2161_v5 = vadd.f32 %v2160_v45, %v2148_v51 }
 0x24d   :  { %v2149_v47 = vpop.f32.mrf.mxu3  ;;  %v2162_v35 = vpop.f32.mrf.mxu0 }
 0x253   :  { %v2173_v6 = vpop.f32.mrf.mxu1 }
 0x254   :  { %v2174_v49 = vadd.f32 %v2173_v6, %v2161_v5 }
 0x256   :  { %v2180_v10 = vsel %vm2179_vm0, %v2174_v49, -1e+30 }
 0x257   :  { %v2182_v53 = vsel %vm2181_vm1, %v2180_v10, -inf }
 0x258   :  { %2183 = vmax.xlane.f32.xlu0 %v2182_v53 }
 0x25b   :  { %v2175_v54 = vpop.f32.mrf.mxu1 }
 0x2cb   :  { %v2184_v55 = vpop.xlane.xlu0 %2183 }
 0x2cc   :  { %v2185_v31 = vsub.f32 %v2180_v10, %v2184_v55 }
 0x2ce   :  { %v2186_v56 = vmul.f32 1.442695, %v2185_v31 }
 0x2d0   :  { %3424 = vpow2.f32 %v2186_v56 }
 0x2d6   :  { %v3425_v57 = vpop.eup %3424 }
 0x2d7   :  { %v2188_v58 = vsel %vm2181_vm1, %v3425_v57, 0.0 }
 0x2d8   :  { %2189 = vadd.xlane.f32.xlu0 %v2188_v58 }
 0x34b   :  { %v2190_v59 = vpop.xlane.xlu0 %2189 }
 0x34c   :  { %3426 = vlog2.f32 %v2190_v59 }
 0x352   :  { %v3427_v60 = vpop.eup %3426 }
 0x353   :  { %v2192_v9 = vmul.f32 0.6931472, %v3427_v60 }
 0x355   :  { %v2193_v61 = vsub.f32 %v2185_v31, %v2192_v9 }
 0x357   :  { %2194 = vst [vmem:[#allocation10] sm:$0x3] %v2193_v61 }
 0x358   :  { %2205 = dma.vmem_to_hbm [thread:$0]  %s2201_s14, 32, %s2203_s17, [#allocation4]  }
 0x359   :  { %3554 = dma.done.wait [#allocation4], 32  }
 0x35a   :  { %3555 = vsyncadd [#allocation4], 4294967264 }
 0x35b   :  { %2210 = vsyncpa [#allocation3], 1 }
 0x35c   :  { %2211 = vsyncpa [#allocation6], 1 }
 0x35d   :  { %2212 = vsyncpa [#allocation9], 1 }
 0x35e   :  { %2213 = vsyncpa [#allocation4], 1 }

// kernel: _lambda_.2
= control target key start
LH: loop header
LB: loop body
LE: loop exit
PB: predicated region body
PF: predicated region fallthrough
CT: control target
= control target key end

     0   :  { %s6560_s0 = inlined_call_operand.vmem [shape: f32[2,8,384], index: 0, kind: input, shape index: {}]   ;;  %s6561_s1 = inlined_call_operand.vmem [shape: f32[2,8,384], index: 1, kind: input, shape index: {}]   ;;  %s6562_s2 = inlined_call_operand.hbm [shape: bf16[384,384], index: 2, kind: input, shape index: {}]   ;;  %s6563_s3 = inlined_call_operand.vmem [shape: f32[1,384], index: 3, kind: input, shape index: {}]   ;;  %s6564_s4 = inlined_call_operand.hbm [shape: bf16[384,384], index: 4, kind: input, shape index: {}]   ;;  %s6565_s5 = inlined_call_operand.vmem [shape: f32[1,384], index: 5, kind: input, shape index: {}]   ;;  %s6566_s6 = inlined_call_operand.hbm [shape: bf16[384,384], index: 6, kind: input, shape index: {}]   ;;  %s6567_s7 = inlined_call_operand.hbm [shape: bf16[384,384], index: 7, kind: input, shape index: {}]   ;;  %s6568_s8 = inlined_call_operand.vmem [shape: f32[1,384], index: 8, kind: input, shape index: {}]   ;;  %s6569_s9 = inlined_call_operand.hbm [shape: bf16[384,384], index: 9, kind: input, shape index: {}]   ;;  %s6570_s10 = inlined_call_operand.vmem [shape: f32[1,384], index: 10, kind: input, shape index: {}]   ;;  %s6571_s11 = inlined_call_operand.vmem [shape: f32[2,1,384], index: 11, kind: output, shape index: {0}]   ;;  %s6572_s12 = inlined_call_operand.vmem [shape: f32[2,1,384], index: 12, kind: output, shape index: {1}]  }
   0x1   :  { %6573 = sst [smem:[#allocation13_spill]] %s6562_s2 }
   0x2   :  { %6574 = sst [smem:[#allocation14_spill]] %s6564_s4 }
   0x3   :  { %18 = vsyncpa [#allocation3], 0 }
   0x4   :  { %19 = vsyncpa [#allocation5], 0 }
   0x5   :  { %20 = vsyncpa [#allocation8], 0  ;;  %s6288_s21 = smov 0  }
   0x6 LB: > { %s6294_s22 = sadd.s32 4294967295, %s6214_s21   ;;  %p4146_p0 = scmp.ge.s32.totalorder %s6214_s21, 1  ;;  %s6214_s21 = sphi %s6288_s21, %s26_s21  }
   0x7   : > { %p324_p1 = scmp.lt.s32.totalorder %s6214_s21, 3  ;;  %p6007_p2 = scmp.eq.s32.totalorder %s6294_s22, 0 }
   0x8   : > { %s6575_s4 = sld [smem:[#allocation14_spill]]  ;;  %s383_s29 = sshll.u32 %s6567_s7, 4  ;;  %s384_s29 = int_to_ptr.hbm [resolvable:$true] %s383_s29 }
   0x9   : > { %p6302_p3 = pnand %p4146_p0, %p324_p1  ;;  %s6216_s30 = smov [#allocation4]  }
   0xa   : > { %s354_s13 = sshll.u32 %s6216_s30, 4  ;;  %s6217_s15 = smov [#allocation7]   ;;  %s355_s13 = int_to_ptr.vmem [resolvable:$true] %s354_s13 }
   0xb   : > { %p5991_p4 = pneg %p6302_p3  ;;  %s385_s16 = sshll.u32 %s6217_s15, 4  ;;  %s386_s16 = int_to_ptr.vmem [resolvable:$true] %s385_s16 }
   0xc   : > { %s6578_s2 = sld [smem:[#allocation13_spill]]  ;;  %s6218_s20 = smov 192  }
   0xd   : > { %p6313_p5 = pnand %p6007_p2, %p5991_p4  ;;  %s6219_s23 = smov 12  }
   0xe   : > { %s352_s25 = sshll.u32 %s6575_s4, 4  ;;  %s6220_s24 = smov [#allocation2]   ;;  %s353_s25 = int_to_ptr.hbm [resolvable:$true] %s352_s25 }
   0xf   : > { %5997 = dma.hbm_to_vmem [thread:$0]  (!%p6313_p5), %s353_s25, 9216, %s355_s13, [#allocation5], %s6218_s20, %s6218_s20, %s6219_s23  }
  0x10   : > { %6003 = dma.hbm_to_vmem [thread:$0]  (!%p6313_p5), %s384_s29, 9216, %s386_s16, [#allocation8], %s6218_s20, %s6218_s20, %s6219_s23  }
  0x11   : > { %s337_s27 = sshll.u32 %s6220_s24, 4  ;;  %s369_s15 = sshll.u32 %s6566_s6, 4  ;;  %s338_s27 = int_to_ptr.vmem [resolvable:$true] %s337_s27  ;;  %s370_s15 = int_to_ptr.hbm [resolvable:$true] %s369_s15 }
  0x12   : > { %s335_s19 = sshll.u32 %s6578_s2, 4  ;;  %s400_s2 = sshll.u32 %s6569_s9, 4  ;;  %s336_s19 = int_to_ptr.hbm [resolvable:$true] %s335_s19  ;;  %s401_s2 = int_to_ptr.hbm [resolvable:$true] %s400_s2 }
  0x13   : > { %5994 = dma.hbm_to_vmem [thread:$0]  (!%p6313_p5), %s336_s19, 9216, %s338_s27, [#allocation3], %s6218_s20, %s6218_s20, %s6219_s23  }
  0x14   : > { %s6221_s4 = smov [#allocation6]   ;;  %s6222_s29 = smov [#allocation9]  }
  0x15   : > { %s371_s25 = sshll.u32 %s6221_s4, 4  ;;  %s402_s13 = sshll.u32 %s6222_s29, 4  ;;  %s372_s25 = int_to_ptr.vmem [resolvable:$true] %s371_s25  ;;  %s403_s13 = int_to_ptr.vmem [resolvable:$true] %s402_s13 }
  0x16   : > { %6000 = dma.hbm_to_vmem [thread:$0]  (!%p6313_p5), %s370_s15, 9216, %s372_s25, [#allocation5], %s6218_s20, %s6218_s20, %s6219_s23  }
  0x17   : > { %6006 = dma.hbm_to_vmem [thread:$0]  (!%p6313_p5), %s401_s2, 9216, %s403_s13, [#allocation8], %s6218_s20, %s6218_s20, %s6219_s23  }
  0x18   : > { %437 = sbr.rel (%p6302_p3) target bundleno = 1212 (0x4bc), region = 64 }
  0x1d   : > { %6201 = dma.done.wait (%p6007_p2), [#allocation3], 9216  }
  0x1e   : > { %6203 = vsyncadd (%p6007_p2), [#allocation3], 4294958080 }
  0x1f   : > { %6205 = dma.done.wait (%p6007_p2), [#allocation5], 18432  }
  0x20   : > { %6207 = vsyncadd (%p6007_p2), [#allocation5], 4294948864 }
  0x21   : > { %6209 = dma.done.wait (%p6007_p2), [#allocation8], 18432  }
  0x22   : > { %6211 = vsyncadd (%p6007_p2), [#allocation8], 4294948864  ;;  %v4247_v0 = vld [vmem:[#allocation2 + $0xa8] sm:$0xf]  ;;  %v5631_v1 = vld [vmem:[#allocation2 + $0xb0] sm:$0xf0] }
  0x23   : > { %v4343_v2 = vld [vmem:[#allocation2 + $0x168] sm:$0xf]  ;;  %v4248_v3 = vor.u32 %v5631_v1, %v4247_v0  ;;  %v5655_v4 = vld [vmem:[#allocation2 + $0x170] sm:$0xf0]  ;;  %v4235_v5 = vld [vmem:[#allocation2 + $0x90] sm:$0xf] }
  0x24   : > { %v5628_v6 = vld [vmem:[#allocation2 + $0x98] sm:$0xf0]  ;;  %v4344_v7 = vor.u32 %v5655_v4, %v4343_v2  ;;  %v4331_v8 = vld [vmem:[#allocation2 + $0x150] sm:$0xf]  ;;  %v4439_v10 = vld [vmem:[#allocation2 + $0x228] sm:$0xf] }
  0x25   : > { %v5652_v9 = vld [vmem:[#allocation2 + $0x158] sm:$0xf0]  ;;  %1024 = vmatpush.bf16.msra.mxu0 %v4248_v3  ;;  %v4236_v11 = vor.u32 %v5628_v6, %v4235_v5  ;;  %v5679_v12 = vld [vmem:[#allocation2 + $0x230] sm:$0xf0]  ;;  %v4223_v15 = vld [vmem:[#allocation2 + $0x78] sm:$0xf] }
  0x26   : > { %1038 = vmatpush.bf16.msra.mxu1 %v4344_v7  ;;  %v4332_v13 = vor.u32 %v5652_v9, %v4331_v8  ;;  %v4440_v14 = vor.u32 %v5679_v12, %v4439_v10  ;;  %v5625_v16 = vld [vmem:[#allocation2 + $0x80] sm:$0xf0]  ;;  %v4427_v17 = vld [vmem:[#allocation2 + $0x210] sm:$0xf]  ;;  %v4319_v18 = vld [vmem:[#allocation2 + $0x138] sm:$0xf] }
  0x27   : > { %v5649_v19 = vld [vmem:[#allocation2 + $0x140] sm:$0xf0]  ;;  %v5676_v20 = vld [vmem:[#allocation2 + $0x218] sm:$0xf0]  ;;  %v5630_v22 = vld [vmem:[#allocation2 + $0xac] sm:$0xf]  ;;  %v4224_v24 = vor.u32 %v5625_v16, %v4223_v15 }
  0x28   : > { %1052 = vmatpush.bf16.msra.mxu2 %v4440_v14  ;;  %v4428_v21 = vor.u32 %v5676_v20, %v4427_v17  ;;  %v4249_v23 = vld [vmem:[#allocation2 + $0xb4] sm:$0xf0]  ;;  %v5673_v27 = vld [vmem:[#allocation2 + $0x200] sm:$0xf0]  ;;  %v4320_v28 = vor.u32 %v5649_v19, %v4319_v18  ;;  %v4211_v29 = vld [vmem:[#allocation2 + $0x60] sm:$0xf] }
  0x29   : > { %1025 = vmatpush.bf16.msra.mxu0 %v4236_v11  ;;  %v4252_v25 = vor.u32 %v5630_v22, %v4249_v23  ;;  %v4415_v26 = vld [vmem:[#allocation2 + $0x1f8] sm:$0xf]  ;;  %v5622_v30 = vld [vmem:[#allocation2 + $0x68] sm:$0xf0]  ;;  %v5627_v31 = vld [vmem:[#allocation2 + $0x94] sm:$0xf] }
  0x2a   : > { %1039 = vmatpush.bf16.msra.mxu1 %v4332_v13  ;;  %v4307_v32 = vld [vmem:[#allocation2 + $0x120] sm:$0xf]  ;;  %v5646_v33 = vld [vmem:[#allocation2 + $0x128] sm:$0xf0]  ;;  %v4416_v35 = vor.u32 %v5673_v27, %v4415_v26  ;;  %v4212_v38 = vor.u32 %v5622_v30, %v4211_v29  ;;  %v5624_v40 = vld [vmem:[#allocation2 + $0x7c] sm:$0xf] }
  0x2b   : > { %1066 = vmatpush.bf16.msra.mxu3 %v4252_v25  ;;  %v4237_v34 = vld [vmem:[#allocation2 + $0x9c] sm:$0xf0]  ;;  %v5670_v39 = vld [vmem:[#allocation2 + $0x1e8] sm:$0xf0]  ;;  %v4225_v41 = vld [vmem:[#allocation2 + $0x84] sm:$0xf0]  ;;  %v4308_v42 = vor.u32 %v5646_v33, %v4307_v32 }
  0x2c   : > { %1053 = vmatpush.bf16.msra.mxu2 %v4428_v21  ;;  %v4240_v36 = vor.u32 %v5627_v31, %v4237_v34  ;;  %v4403_v37 = vld [vmem:[#allocation2 + $0x1e0] sm:$0xf]  ;;  %v4199_v43 = vld [vmem:[#allocation2 + $0x48] sm:$0xf]  ;;  %v5619_v44 = vld [vmem:[#allocation2 + $0x50] sm:$0xf0]  ;;  %v4228_v47 = vor.u32 %v5624_v40, %v4225_v41 }
  0x2d   : > { %1026 = vmatpush.bf16.msra.mxu0 %v4224_v24  ;;  %v4295_v45 = vld [vmem:[#allocation2 + $0x108] sm:$0xf]  ;;  %v5643_v46 = vld [vmem:[#allocation2 + $0x110] sm:$0xf0]  ;;  %p508_p6 = scmp.lt.s32.totalorder %s6294_s22, 1  ;;  %v4404_v48 = vor.u32 %v5670_v39, %v4403_v37  ;;  %v4200_v51 = vor.u32 %v5619_v44, %v4199_v43  ;;  %vm1983_vm1 = vcmask 64512  }
  0x2e   : > { %1040 = vmatpush.bf16.msra.mxu1 %v4320_v28  ;;  %v5621_v49 = vld [vmem:[#allocation2 + $0x64] sm:$0xf]  ;;  %v4213_v50 = vld [vmem:[#allocation2 + $0x6c] sm:$0xf0]  ;;  %v4391_v52 = vld [vmem:[#allocation2 + $0x1c8] sm:$0xf]  ;;  %v4296_v54 = vor.u32 %v5643_v46, %v4295_v45 }
  0x2f   : > { %1067 = vmatpush.bf16.msra.mxu3 %v4240_v36  ;;  %v5667_v53 = vld [vmem:[#allocation2 + $0x1d0] sm:$0xf0]  ;;  %v4187_v55 = vld [vmem:[#allocation2 + $0x30] sm:$0xf]  ;;  %v5616_v56 = vld [vmem:[#allocation2 + $0x38] sm:$0xf0]  ;;  %v4216_v59 = vor.u32 %v5621_v49, %v4213_v50 }
  0x30   : > { %1054 = vmatpush.bf16.msra.mxu2 %v4416_v35  ;;  %v4283_v57 = vld [vmem:[#allocation2 + $0xf0] sm:$0xf]  ;;  %v5640_v58 = vld [vmem:[#allocation2 + $0xf8] sm:$0xf0]  ;;  %s6582_s22 = smov (!%p508_p6, %s6294_s22), 1  ;;  %v4392_v60 = vor.u32 %v5667_v53, %v4391_v52  ;;  %v4188_v63 = vor.u32 %v5616_v56, %v4187_v55  ;;  %vm2065_vm2 = vcmask 1043456  }
  0x31   : > { %1027 = vmatpush.bf16.msra.mxu0 %v4212_v38  ;;  %v5618_v61 = vld [vmem:[#allocation2 + $0x4c] sm:$0xf]  ;;  %v4201_v62 = vld [vmem:[#allocation2 + $0x54] sm:$0xf0]  ;;  %v4379_v0 = vld [vmem:[#allocation2 + $0x1b0] sm:$0xf]  ;;  %v4284_v2 = vor.u32 %v5640_v58, %v4283_v57 }
  0x32   : > { %1041 = vmatpush.bf16.msra.mxu1 %v4308_v42  ;;  %v5664_v1 = vld [vmem:[#allocation2 + $0x1b8] sm:$0xf0]  ;;  %v4175_v3 = vld [vmem:[#allocation2 + $0x18] sm:$0xf]  ;;  %v5613_v4 = vld [vmem:[#allocation2 + $0x20] sm:$0xf0]  ;;  %v4204_v7 = vor.u32 %v5618_v61, %v4201_v62 }
  0x33   : > { %1068 = vmatpush.bf16.msra.mxu3 %v4228_v47  ;;  %v4271_v5 = vld [vmem:[#allocation2 + $0xd8] sm:$0xf]  ;;  %v5637_v6 = vld [vmem:[#allocation2 + $0xe0] sm:$0xf0]  ;;  %s5969_s2 = smul.u32 24, %s6582_s22  ;;  %v4380_v8 = vor.u32 %v5664_v1, %v4379_v0  ;;  %v4176_v13 = vor.u32 %v5613_v4, %v4175_v3  ;;  %vm3961_vm11 = vcmask 1040384  }
  0x34   : > { %1055 = vmatpush.bf16.msra.mxu2 %v4404_v48  ;;  %v4163_v9 = vld [vmem:[#allocation2] sm:$0xf]  ;;  %v5610_v10 = vld [vmem:[#allocation2 + $0x8] sm:$0xf0]  ;;  %v5615_v11 = vld [vmem:[#allocation2 + $0x34] sm:$0xf]  ;;  %v4272_v17 = vor.u32 %v5637_v6, %v4271_v5 }
  0x35   : > { %1028 = vmatpush.bf16.msra.mxu0 %v4200_v51  ;;  %v4189_v12 = vld [vmem:[#allocation2 + $0x3c] sm:$0xf0]  ;;  %v5654_v14 = vld [vmem:[#allocation2 + $0x16c] sm:$0xf]  ;;  %v4367_v15 = vld [vmem:[#allocation2 + $0x198] sm:$0xf]  ;;  %s6360_s14 = scalar_lea.vmem %s6560_s0, %s5969_s2  ;;  %s6365_s20 = scalar_lea.vmem %s6561_s1, %s5969_s2  ;;  %v4164_v29 = vor.u32 %v5610_v10, %v4163_v9 }
  0x36   : > { %1042 = vmatpush.bf16.msra.mxu1 %v4296_v54  ;;  %v5661_v16 = vld [vmem:[#allocation2 + $0x1a0] sm:$0xf0]  ;;  %v4345_v18 = vld [vmem:[#allocation2 + $0x174] sm:$0xf0]  ;;  %v4259_v19 = vld [vmem:[#allocation2 + $0xc0] sm:$0xf]  ;;  %v4192_v23 = vor.u32 %v5615_v11, %v4189_v12 }
  0x37   : > { %1069 = vmatpush.bf16.msra.mxu3 %v4216_v59  ;;  %v5634_v20 = vld [vmem:[#allocation2 + $0xc8] sm:$0xf0]  ;;  %v4441_v22 = vld [vmem:[#allocation2 + $0x234] sm:$0xf0]  ;;  %v4355_v24 = vld [vmem:[#allocation2 + $0x180] sm:$0xf]  ;;  %v4368_v25 = vor.u32 %v5661_v16, %v4367_v15  ;;  %v4348_v33 = vor.u32 %v5654_v14, %v4345_v18 }
  0x38   : > { %1056 = vmatpush.bf16.msra.mxu2 %v4392_v60  ;;  %v5678_v21 = vld [vmem:[#allocation2 + $0x22c] sm:$0xf]  ;;  %v5612_v27 = vld [vmem:[#allocation2 + $0x1c] sm:$0xf]  ;;  %v4177_v28 = vld [vmem:[#allocation2 + $0x24] sm:$0xf0]  ;;  %v4260_v34 = vor.u32 %v5634_v20, %v4259_v19 }
  0x39   : > { %1029 = vmatpush.bf16.msra.mxu0 %v4188_v63  ;;  %v5658_v26 = vld [vmem:[#allocation2 + $0x188] sm:$0xf0]  ;;  %v527_v30 = vld [vmem:[%s6360_s14] sm:$0xff]  ;;  %v4255_v32 = vld [vmem:[#allocation2 + $0xb0] sm:$0xf]  ;;  %v4444_v38 = vor.u32 %v5678_v21, %v4441_v22  ;;  %v4180_v42 = vor.u32 %v5612_v27, %v4177_v28  ;;  %s5970_s25 = smul.u32 3, %s6582_s22 }
  0x3a   : > { %1043 = vmatpush.bf16.msra.mxu1 %v4284_v2  ;;  %v530_v31 = vld [vmem:[%s6365_s20] sm:$0xff]  ;;  %v5632_v35 = vld [vmem:[#allocation2 + $0xb8] sm:$0xf0]  ;;  %v528_v36 = vld [vmem:[%s6360_s14 + $0x8] sm:$0xff]  ;;  %v4356_v43 = vor.u32 %v5658_v26, %v4355_v24  ;;  %vm3963_vm12 = vcmask 1041408  }
  0x3b   : > { %1070 = vmatpush.bf16.msra.mxu3 %v4204_v7  ;;  %v531_v37 = vld [vmem:[%s6365_s20 + $0x8] sm:$0xff]  ;;  %v5651_v39 = vld [vmem:[#allocation2 + $0x154] sm:$0xf]  ;;  %v4333_v40 = vld [vmem:[#allocation2 + $0x15c] sm:$0xf0]  ;;  %v6373_v47 = vpack.c.bf16 %v530_v31, %v527_v30  ;;  %v4256_v48 = vor.u32 %v5632_v35, %v4255_v32  ;;  %s521_s13 = scalar_lea.vmem %s6571_s11, %s5970_s25  ;;  %s525_s26 = scalar_lea.vmem %s6572_s12, %s5970_s25 }
  0x3c   : > { %1057 = vmatpush.bf16.msra.mxu2 %v4380_v8  ;;  %v5675_v41 = vld [vmem:[#allocation2 + $0x214] sm:$0xf]  ;;  %v4429_v44 = vld [vmem:[#allocation2 + $0x21c] sm:$0xf0]  ;;  %v6375_v49 = vpack.c.bf16 %v531_v37, %v528_v36  ;;  %v5609_v50 = vld [vmem:[#allocation2 + $0x4] sm:$0xf]  ;;  %v4336_v53 = vor.u32 %v5651_v39, %v4333_v40 }
  0x3d   : > { %1030 = vmatpush.bf16.msra.mxu0 %v4176_v13  ;;  %v529_v45 = vld [vmem:[%s6360_s14 + $0x10] sm:$0xff]  ;;  %v5656_v54 = vld [vmem:[#allocation2 + $0x178] sm:$0xf0]  ;;  %v4243_v55 = vld [vmem:[#allocation2 + $0x98] sm:$0xf]  ;;  %v4432_v57 = vor.u32 %v5675_v41, %v4429_v44 }
  0x3e   : > { %1044 = vmatpush.bf16.msra.mxu1 %v4272_v17  ;;  %v532_v46 = vld [vmem:[%s6365_s20 + $0x10] sm:$0xff]  ;;  %v5629_v56 = vld [vmem:[#allocation2 + $0xa0] sm:$0xf0]  ;;  %v5648_v59 = vld [vmem:[#allocation2 + $0x13c] sm:$0xf] }
  0x3f   : > { %1071 = vmatpush.bf16.msra.mxu3 %v4192_v23  ;;  %v4165_v51 = vld [vmem:[#allocation2 + $0xc] sm:$0xf0]  ;;  %v6377_v58 = vpack.c.bf16 %v532_v46, %v529_v45  ;;  %v4321_v60 = vld [vmem:[#allocation2 + $0x144] sm:$0xf0]  ;;  %v5672_v61 = vld [vmem:[#allocation2 + $0x1fc] sm:$0xf]  ;;  %v4244_v1 = vor.u32 %v5629_v56, %v4243_v55 }
  0x40   : > { %1058 = vmatpush.bf16.msra.mxu2 %v4368_v25  ;;  %v4351_v52 = vld [vmem:[#allocation2 + $0x170] sm:$0xf]  ;;  %v4417_v62 = vld [vmem:[#allocation2 + $0x204] sm:$0xf0]  ;;  %v4168_v63 = vor.u32 %v5609_v50, %v4165_v51  ;;  %v4339_v2 = vld [vmem:[#allocation2 + $0x158] sm:$0xf]  ;;  %v4324_v3 = vor.u32 %v5648_v59, %v4321_v60 }
  0x41   : > { %1031 = vmatpush.bf16.msra.mxu0 %v4164_v29  ;;  %v4352_v0 = vor.u32 %v5656_v54, %v4351_v52  ;;  %v5653_v4 = vld [vmem:[#allocation2 + $0x160] sm:$0xf0]  ;;  %v4231_v5 = vld [vmem:[#allocation2 + $0x80] sm:$0xf]  ;;  %v5626_v6 = vld [vmem:[#allocation2 + $0x88] sm:$0xf0]  ;;  %v4420_v7 = vor.u32 %v5672_v61, %v4417_v62 }
  0x42   : > { %1045 = vmatpush.bf16.msra.mxu1 %v4260_v34  ;;  %v5645_v8 = vld [vmem:[#allocation2 + $0x124] sm:$0xf]  ;;  %v4309_v9 = vld [vmem:[#allocation2 + $0x12c] sm:$0xf0]  ;;  %v4340_v12 = vor.u32 %v5653_v4, %v4339_v2  ;;  %v4232_v13 = vor.u32 %v5626_v6, %v4231_v5  ;;  %v4327_v14 = vld [vmem:[#allocation2 + $0x140] sm:$0xf] }
  0x43   : > { %1072 = vmatpush.bf16.msra.mxu3 %v4180_v42  ;;  %v5669_v10 = vld [vmem:[#allocation2 + $0x1e4] sm:$0xf]  ;;  %v4405_v11 = vld [vmem:[#allocation2 + $0x1ec] sm:$0xf0]  ;;  %v4312_v15 = vor.u32 %v5645_v8, %v4309_v9  ;;  %v5650_v16 = vld [vmem:[#allocation2 + $0x148] sm:$0xf0] }
  0x44   : > { %1059 = vmatpush.bf16.msra.mxu2 %v4356_v43  ;;  %1032 = vmatmul.bf16.vlgmr.msra.gmra.mxu0 %v6373_v47  ;;  %v4219_v17 = vld [vmem:[#allocation2 + $0x68] sm:$0xf]  ;;  %v5623_v18 = vld [vmem:[#allocation2 + $0x70] sm:$0xf0]  ;;  %v4408_v19 = vor.u32 %v5669_v10, %v4405_v11  ;;  %v5642_v20 = vld [vmem:[#allocation2 + $0x10c] sm:$0xf]  ;;  %v4328_v24 = vor.u32 %v5650_v16, %v4327_v14 }
  0x45   : > { %1080 = vmatpush.bf16.msrb.mxu0 %v4348_v33  ;;  %1046 = vmatmul.bf16.vlgmr.msra.gmra.mxu1 %v6375_v49  ;;  %v4297_v21 = vld [vmem:[#allocation2 + $0x114] sm:$0xf0]  ;;  %v5666_v22 = vld [vmem:[#allocation2 + $0x1cc] sm:$0xf]  ;;  %v4220_v25 = vor.u32 %v5623_v18, %v4219_v17  ;;  %v4315_v26 = vld [vmem:[#allocation2 + $0x128] sm:$0xf] }
  0x46   : > { %1094 = vmatpush.bf16.msrb.mxu1 %v4444_v38  ;;  %v4393_v23 = vld [vmem:[#allocation2 + $0x1d4] sm:$0xf0]  ;;  %v4300_v27 = vor.u32 %v5642_v20, %v4297_v21  ;;  %v5647_v28 = vld [vmem:[#allocation2 + $0x130] sm:$0xf0]  ;;  %v4207_v29 = vld [vmem:[#allocation2 + $0x50] sm:$0xf] }
  0x47   : > { %1060 = vmatmul.bf16.vlgmr.msra.gmra.mxu2 %v6377_v58  ;;  %1073 = vmatpush.bf16.msra.mxu3 %v4168_v63  ;;  %v5620_v30 = vld [vmem:[#allocation2 + $0x58] sm:$0xf0]  ;;  %v4396_v31 = vor.u32 %v5666_v22, %v4393_v23  ;;  %v5639_v32 = vld [vmem:[#allocation2 + $0xf4] sm:$0xf]  ;;  %v4285_v33 = vld [vmem:[#allocation2 + $0xfc] sm:$0xf0]  ;;  %v4316_v36 = vor.u32 %v5647_v28, %v4315_v26 }
  0x48   : > { %1108 = vmatpush.bf16.msrb.mxu2 %v4256_v48  ;;  %v5663_v34 = vld [vmem:[#allocation2 + $0x1b4] sm:$0xf]  ;;  %v4381_v35 = vld [vmem:[#allocation2 + $0x1bc] sm:$0xf0]  ;;  %v4208_v37 = vor.u32 %v5620_v30, %v4207_v29  ;;  %v4303_v38 = vld [vmem:[#allocation2 + $0x110] sm:$0xf]  ;;  %v4288_v39 = vor.u32 %v5639_v32, %v4285_v33 }
  0x49   : > { %1081 = vmatpush.bf16.msrb.mxu0 %v4336_v53  ;;  %v5644_v40 = vld [vmem:[#allocation2 + $0x118] sm:$0xf0]  ;;  %v4195_v41 = vld [vmem:[#allocation2 + $0x38] sm:$0xf]  ;;  %v5617_v42 = vld [vmem:[#allocation2 + $0x40] sm:$0xf0]  ;;  %v4384_v43 = vor.u32 %v5663_v34, %v4381_v35 }
  0x4a   : > { %1095 = vmatpush.bf16.msrb.mxu1 %v4432_v57  ;;  %1074 = vmatmul.bf16.vlgmr.msra.gmra.mxu3 %v6373_v47  ;;  %v5636_v44 = vld [vmem:[#allocation2 + $0xdc] sm:$0xf]  ;;  %v4273_v45 = vld [vmem:[#allocation2 + $0xe4] sm:$0xf0]  ;;  %v4304_v50 = vor.u32 %v5644_v40, %v4303_v38  ;;  %v4196_v51 = vor.u32 %v5617_v42, %v4195_v41  ;;  %v4291_v52 = vld [vmem:[#allocation2 + $0xf8] sm:$0xf] }
  0x4b   : > { %1122 = vmatpush.bf16.msrb.mxu3 %v4352_v0  ;;  %v5660_v46 = vld [vmem:[#allocation2 + $0x19c] sm:$0xf]  ;;  %v4369_v48 = vld [vmem:[#allocation2 + $0x1a4] sm:$0xf0]  ;;  %v4276_v53 = vor.u32 %v5636_v44, %v4273_v45  ;;  %v5641_v54 = vld [vmem:[#allocation2 + $0x100] sm:$0xf0] }
  0x4c   : > { %1109 = vmatpush.bf16.msrb.mxu2 %v4244_v1  ;;  %v4183_v55 = vld [vmem:[#allocation2 + $0x20] sm:$0xf]  ;;  %v5614_v56 = vld [vmem:[#allocation2 + $0x28] sm:$0xf0]  ;;  %v4372_v57 = vor.u32 %v5660_v46, %v4369_v48  ;;  %v5633_v59 = vld [vmem:[#allocation2 + $0xc4] sm:$0xf]  ;;  %v4292_v1 = vor.u32 %v5641_v54, %v4291_v52 }
  0x4d   : > { %1082 = vmatpush.bf16.msrb.mxu0 %v4324_v3  ;;  %v4261_v60 = vld [vmem:[#allocation2 + $0xcc] sm:$0xf0]  ;;  %v5680_v62 = vld [vmem:[#allocation2 + $0x238] sm:$0xf0]  ;;  %v5657_v63 = vld [vmem:[#allocation2 + $0x184] sm:$0xf]  ;;  %v4184_v2 = vor.u32 %v5614_v56, %v4183_v55 }
  0x4e   : > { %1096 = vmatpush.bf16.msrb.mxu1 %v4420_v7  ;;  %v4447_v61 = vld [vmem:[#allocation2 + $0x230] sm:$0xf]  ;;  %v4264_v3 = vor.u32 %v5633_v59, %v4261_v60  ;;  %v4279_v4 = vld [vmem:[#allocation2 + $0xe0] sm:$0xf]  ;;  %v5638_v5 = vld [vmem:[#allocation2 + $0xe8] sm:$0xf0] }
  0x4f   : > { %1123 = vmatpush.bf16.msrb.mxu3 %v4340_v12  ;;  %v4357_v0 = vld [vmem:[#allocation2 + $0x18c] sm:$0xf0]  ;;  %v4448_v6 = vor.u32 %v5680_v62, %v4447_v61  ;;  %v4171_v8 = vld [vmem:[#allocation2 + $0x8] sm:$0xf]  ;;  %v5611_v9 = vld [vmem:[#allocation2 + $0x10] sm:$0xf0]  ;;  %v4280_v12 = vor.u32 %v5638_v5, %v4279_v4 }
  0x50   : > { %1110 = vmatpush.bf16.msrb.mxu2 %v4232_v13  ;;  %v4360_v7 = vor.u32 %v5657_v63, %v4357_v0  ;;  %v4435_v10 = vld [vmem:[#allocation2 + $0x218] sm:$0xf]  ;;  %v5677_v11 = vld [vmem:[#allocation2 + $0x220] sm:$0xf0]  ;;  %v4267_v13 = vld [vmem:[#allocation2 + $0xc8] sm:$0xf]  ;;  %v4172_v14 = vor.u32 %v5611_v9, %v4171_v8 }
  0x51   : > { %1083 = vmatpush.bf16.msrb.mxu0 %v4312_v15  ;;  %v5635_v15 = vld [vmem:[#allocation2 + $0xd0] sm:$0xf0]  ;;  %v4535_v16 = vld [vmem:[#allocation4 + $0xa8] sm:$0xf]  ;;  %v4436_v18 = vor.u32 %v5677_v11, %v4435_v10  ;;  %v5674_v21 = vld [vmem:[#allocation2 + $0x208] sm:$0xf0] }
  0x52   : > { %1097 = vmatpush.bf16.msrb.mxu1 %v4408_v19  ;;  %v5703_v17 = vld [vmem:[#allocation4 + $0xb0] sm:$0xf0]  ;;  %v4423_v19 = vld [vmem:[#allocation2 + $0x200] sm:$0xf]  ;;  %v4523_v22 = vld [vmem:[#allocation4 + $0x90] sm:$0xf] }
  0x53   : > { %1124 = vmatpush.bf16.msrb.mxu3 %v4328_v24  ;;  %v4536_v20 = vor.u32 %v5703_v17, %v4535_v16  ;;  %v5700_v23 = vld [vmem:[#allocation4 + $0x98] sm:$0xf0]  ;;  %v4268_v24 = vor.u32 %v5635_v15, %v4267_v13  ;;  %v4411_v26 = vld [vmem:[#allocation2 + $0x1e8] sm:$0xf]  ;;  %v5671_v28 = vld [vmem:[#allocation2 + $0x1f0] sm:$0xf0] }
  0x54   : > { %1111 = vmatpush.bf16.msrb.mxu2 %v4220_v25  ;;  %v4424_v25 = vor.u32 %v5674_v21, %v4423_v19  ;;  %v4511_v29 = vld [vmem:[#allocation4 + $0x78] sm:$0xf]  ;;  %v5697_v30 = vld [vmem:[#allocation4 + $0x80] sm:$0xf0]  ;;  %v4399_v32 = vld [vmem:[#allocation2 + $0x1d0] sm:$0xf] }
  0x55   : > { %1084 = vmatpush.bf16.msrb.mxu0 %v4300_v27  ;;  %v4524_v27 = vor.u32 %v5700_v23, %v4523_v22  ;;  %v4512_v33 = vor.u32 %v5697_v30, %v4511_v29  ;;  %v5668_v34 = vld [vmem:[#allocation2 + $0x1d8] sm:$0xf0]  ;;  %v4499_v35 = vld [vmem:[#allocation4 + $0x60] sm:$0xf]  ;;  %v4387_v38 = vld [vmem:[#allocation2 + $0x1b8] sm:$0xf] }
  0x56   : > { %1098 = vmatpush.bf16.msrb.mxu1 %v4396_v31  ;;  %v4412_v31 = vor.u32 %v5671_v28, %v4411_v26  ;;  %v5665_v40 = vld [vmem:[#allocation2 + $0x1c0] sm:$0xf0]  ;;  %v4487_v41 = vld [vmem:[#allocation4 + $0x48] sm:$0xf]  ;;  %v5691_v42 = vld [vmem:[#allocation4 + $0x50] sm:$0xf0] }
  0x57   : > { %1125 = vmatpush.bf16.msrb.mxu3 %v4316_v36  ;;  %v5694_v36 = vld [vmem:[#allocation4 + $0x68] sm:$0xf0]  ;;  %v4375_v44 = vld [vmem:[#allocation2 + $0x1a0] sm:$0xf]  ;;  %v4488_v45 = vor.u32 %v5691_v42, %v4487_v41  ;;  %v4475_v48 = vld [vmem:[#allocation4 + $0x30] sm:$0xf] }
  0x58   : > { %1112 = vmatpush.bf16.msrb.mxu2 %v4208_v37  ;;  %v4400_v37 = vor.u32 %v5668_v34, %v4399_v32  ;;  %v5662_v46 = vld [vmem:[#allocation2 + $0x1a8] sm:$0xf0]  ;;  %v5659_v54 = vld [vmem:[#allocation2 + $0x190] sm:$0xf0]  ;;  %v4537_v56 = vld [vmem:[#allocation4 + $0xb4] sm:$0xf0] }
  0x59   : > { %1085 = vmatpush.bf16.msrb.mxu0 %v4288_v39  ;;  %v4500_v39 = vor.u32 %v5694_v36, %v4499_v35  ;;  %v5702_v55 = vld [vmem:[#allocation4 + $0xac] sm:$0xf]  ;;  %v5699_v60 = vld [vmem:[#allocation4 + $0x94] sm:$0xf]  ;;  %v4525_v61 = vld [vmem:[#allocation4 + $0x9c] sm:$0xf0] }
  0x5a   : > { %1099 = vmatpush.bf16.msrb.mxu1 %v4384_v43  ;;  %v4388_v43 = vor.u32 %v5665_v40, %v4387_v38  ;;  %v4540_v59 = vor.u32 %v5702_v55, %v4537_v56  ;;  %v4528_v62 = vor.u32 %v5699_v60, %v4525_v61  ;;  %v5696_v63 = vld [vmem:[#allocation4 + $0x7c] sm:$0xf]  ;;  %v4513_v0 = vld [vmem:[#allocation4 + $0x84] sm:$0xf0]  ;;  %v5690_v5 = vld [vmem:[#allocation4 + $0x4c] sm:$0xf] }
  0x5b   : > { %1126 = vmatpush.bf16.msrb.mxu3 %v4304_v50  ;;  %v5688_v50 = vld [vmem:[#allocation4 + $0x38] sm:$0xf0]  ;;  %v5687_v8 = vld [vmem:[#allocation4 + $0x34] sm:$0xf]  ;;  %v4477_v9 = vld [vmem:[#allocation4 + $0x3c] sm:$0xf0] }
  0x5c   : > { %1113 = vmatpush.bf16.msrb.mxu2 %v4196_v51  ;;  %v4376_v51 = vor.u32 %v5662_v46, %v4375_v44  ;;  %v4476_v52 = vor.u32 %v5688_v50, %v4475_v48  ;;  %v4480_v10 = vor.u32 %v5687_v8, %v4477_v9  ;;  %v4463_v11 = vld [vmem:[#allocation4 + $0x18] sm:$0xf]  ;;  %v4465_v15 = vld [vmem:[#allocation4 + $0x24] sm:$0xf0]  ;;  %v4451_v17 = vld [vmem:[#allocation4] sm:$0xf] }
  0x5d   : > { %1086 = vmatpush.bf16.msrb.mxu0 %v4276_v53  ;;  %v4363_v53 = vld [vmem:[#allocation2 + $0x188] sm:$0xf]  ;;  %v5727_v21 = vld [vmem:[#allocation4 + $0x170] sm:$0xf0]  ;;  %v5726_v22 = vld [vmem:[#allocation4 + $0x16c] sm:$0xf] }
  0x5e   : > { %1100 = vmatpush.bf16.msrb.mxu1 %v4372_v57  ;;  %v4364_v57 = vor.u32 %v5659_v54, %v4363_v53  ;;  %v4453_v26 = vld [vmem:[#allocation4 + $0xc] sm:$0xf0]  ;;  %v5728_v30 = vld [vmem:[#allocation4 + $0x178] sm:$0xf0]  ;;  %v5723_v34 = vld [vmem:[#allocation4 + $0x154] sm:$0xf] }
  0x5f   : > { %1127 = vmatpush.bf16.msrb.mxu3 %v4292_v1  ;;  %v4516_v1 = vor.u32 %v5696_v63, %v4513_v0  ;;  %v4639_v29 = vld [vmem:[#allocation4 + $0x170] sm:$0xf]  ;;  %v4621_v35 = vld [vmem:[#allocation4 + $0x15c] sm:$0xf0]  ;;  %v4627_v38 = vld [vmem:[#allocation4 + $0x158] sm:$0xf] }
  0x60   : > { %1114 = vmatpush.bf16.msrb.mxu2 %v4184_v2  ;;  %v5693_v2 = vld [vmem:[#allocation4 + $0x64] sm:$0xf]  ;;  %v4640_v32 = vor.u32 %v5728_v30, %v4639_v29  ;;  %v4607_v41 = vld [vmem:[#allocation4 + $0x138] sm:$0xf]  ;;  %v4615_v48 = vld [vmem:[#allocation4 + $0x140] sm:$0xf] }
  0x61   : > { %1087 = vmatpush.bf16.msrb.mxu0 %v4264_v3  ;;  %v4501_v3 = vld [vmem:[#allocation4 + $0x6c] sm:$0xf0]  ;;  %v5721_v42 = vld [vmem:[#allocation4 + $0x140] sm:$0xf0]  ;;  %v5722_v50 = vld [vmem:[#allocation4 + $0x148] sm:$0xf0] }
  0x62   : > { %1101 = vmatpush.bf16.msrb.mxu1 %v4360_v7  ;;  %v4504_v4 = vor.u32 %v5693_v2, %v4501_v3  ;;  %v4608_v44 = vor.u32 %v5721_v42, %v4607_v41  ;;  %v5718_v53 = vld [vmem:[#allocation4 + $0x128] sm:$0xf0]  ;;  %v5717_v54 = vld [vmem:[#allocation4 + $0x124] sm:$0xf]  ;;  %v4597_v56 = vld [vmem:[#allocation4 + $0x12c] sm:$0xf0] }
  0x63   : > { %1128 = vmatpush.bf16.msrb.mxu3 %v4280_v12  ;;  %v5685_v12 = vld [vmem:[#allocation4 + $0x20] sm:$0xf0]  ;;  %v5719_v60 = vld [vmem:[#allocation4 + $0x130] sm:$0xf0]  ;;  %v4727_v0 = vld [vmem:[#allocation4 + $0x228] sm:$0xf] }
  0x64   : > { %1088 = vmatmul.bf16.vlgmr.msrb.gmra.mxu0 %v6375_v49  ;;  %1115 = vmatpush.bf16.msrb.mxu2 %v4172_v14  ;;  %v4464_v13 = vor.u32 %v5685_v12, %v4463_v11  ;;  %v5684_v14 = vld [vmem:[#allocation4 + $0x1c] sm:$0xf]  ;;  %v5715_v63 = vld [vmem:[#allocation4 + $0x110] sm:$0xf0]  ;;  %v5714_v3 = vld [vmem:[#allocation4 + $0x10c] sm:$0xf] }
  0x65   : > { %1136 = vmatpush.bf16.msra.mxu0 %v4448_v6  ;;  %1102 = vmatmul.bf16.vlgmr.msrb.gmra.mxu1 %v6377_v58  ;;  %v4489_v6 = vld [vmem:[#allocation4 + $0x54] sm:$0xf0]  ;;  %v4468_v16 = vor.u32 %v5684_v14, %v4465_v15  ;;  %v5751_v2 = vld [vmem:[#allocation4 + $0x230] sm:$0xf0]  ;;  %v5716_v8 = vld [vmem:[#allocation4 + $0x118] sm:$0xf0] }
  0x66   : > { %1647 = vmatpush.bf16.msra.mxu1 %v4536_v20  ;;  %v4492_v7 = vor.u32 %v5690_v5, %v4489_v6  ;;  %v4631_v20 = vld [vmem:[#allocation4 + $0x168] sm:$0xf]  ;;  %v4728_v5 = vor.u32 %v5751_v2, %v4727_v0  ;;  %v6391_v9 = vld [vmem:[%s6563_s3] sm:$0x7]  ;;  %v4571_v11 = vld [vmem:[#allocation4 + $0xf0] sm:$0xf] }
  0x67   : > { %1129 = vmatpush.bf16.msrb.mxu3 %v4268_v24  ;;  %1116 = vmatmul.bf16.vlgmr.msrb.gmra.mxu2 %v6373_v47  ;;  %v4632_v23 = vor.u32 %v5727_v21, %v4631_v20  ;;  %v4633_v24 = vld [vmem:[#allocation4 + $0x174] sm:$0xf0]  ;;  %v5712_v12 = vld [vmem:[#allocation4 + $0xf8] sm:$0xf0]  ;;  %v5745_v30 = vld [vmem:[#allocation4 + $0x200] sm:$0xf0] }
  0x68   : > { %v4572_v14 = vor.u32 %v5712_v12, %v4571_v11  ;;  %v5748_v15 = vld [vmem:[#allocation4 + $0x218] sm:$0xf0]  ;;  %v4579_v21 = vld [vmem:[#allocation4 + $0xf8] sm:$0xf]  ;;  %v4691_v41 = vld [vmem:[#allocation4 + $0x1e0] sm:$0xf] }
  0x69   : > { %1137 = vmatpush.bf16.msra.mxu0 %v4436_v18  ;;  %v5682_v18 = vld [vmem:[#allocation4 + $0x8] sm:$0xf0]  ;;  %1661 = vmatpush.bf16.msra.mxu2 %v4632_v23  ;;  %v634_v23 = vperm.slane %v6391_v9, 0  ;;  %v4717_v2 = vld [vmem:[#allocation4 + $0x21c] sm:$0xf0] }
  0x6a   : > { %1648 = vmatpush.bf16.msra.mxu1 %v4524_v27  ;;  %1130 = vmatmul.bf16.vlgmr.msrb.gmra.mxu3 %v6375_v49  ;;  %v4452_v19 = vor.u32 %v5682_v18, %v4451_v17  ;;  %v4636_v27 = vor.u32 %v5726_v22, %v4633_v24  ;;  %v4573_v17 = vld [vmem:[#allocation4 + $0xfc] sm:$0xf0]  ;;  %v5713_v22 = vld [vmem:[#allocation4 + $0x100] sm:$0xf0]  ;;  %v4705_v12 = vld [vmem:[#allocation4 + $0x204] sm:$0xf0] }
  0x6b   : > { %1675 = vmatpush.bf16.msra.mxu3 %v4728_v5 }
  0x6d   : > { %1138 = vmatpush.bf16.msra.mxu0 %v4424_v25  ;;  %v5681_v25 = vld [vmem:[#allocation4 + $0x4] sm:$0xf] }
  0x6e   : > { %1649 = vmatpush.bf16.msra.mxu1 %v4512_v33  ;;  %v4456_v28 = vor.u32 %v5681_v25, %v4453_v26  ;;  %v5724_v33 = vld [vmem:[#allocation4 + $0x158] sm:$0xf0]  ;;  %v4580_v25 = vor.u32 %v5713_v22, %v4579_v21  ;;  %v4559_v26 = vld [vmem:[#allocation4 + $0xd8] sm:$0xf]  ;;  %v4693_v22 = vld [vmem:[#allocation4 + $0x1ec] sm:$0xf0] }
  0x71   : > { %1139 = vmatpush.bf16.msra.mxu0 %v4412_v31  ;;  %v4619_v31 = vld [vmem:[#allocation4 + $0x150] sm:$0xf] }
  0x72   : > { %1650 = vmatpush.bf16.msra.mxu1 %v4500_v39  ;;  %v4620_v36 = vor.u32 %v5724_v33, %v4619_v31  ;;  %v5725_v39 = vld [vmem:[#allocation4 + $0x160] sm:$0xf0]  ;;  %v5708_v31 = vld [vmem:[#allocation4 + $0xdc] sm:$0xf] }
  0x73   : > { %v4628_v40 = vor.u32 %v5725_v39, %v4627_v38  ;;  %v4547_v39 = vld [vmem:[#allocation4 + $0xc0] sm:$0xf] }
  0x74   : > { %1662 = vmatpush.bf16.msra.mxu2 %v4620_v36  ;;  %v5710_v36 = vld [vmem:[#allocation4 + $0xe8] sm:$0xf0] }
  0x75   : > { %1140 = vmatpush.bf16.msra.mxu0 %v4400_v37  ;;  %v4624_v37 = vor.u32 %v5723_v34, %v4621_v35  ;;  %v4567_v35 = vld [vmem:[#allocation4 + $0xe0] sm:$0xf] }
  0x76   : > { %1651 = vmatpush.bf16.msra.mxu1 %v4488_v45  ;;  %v4609_v45 = vld [vmem:[#allocation4 + $0x144] sm:$0xf0] }
  0x78   : > { %1663 = vmatpush.bf16.msra.mxu2 %v4608_v44  ;;  %v5705_v44 = vld [vmem:[#allocation4 + $0xc4] sm:$0xf] }
  0x79   : > { %1141 = vmatpush.bf16.msra.mxu0 %v4388_v43  ;;  %v5720_v43 = vld [vmem:[#allocation4 + $0x13c] sm:$0xf] }
  0x7a   : > { %1652 = vmatpush.bf16.msra.mxu1 %v4476_v52  ;;  %v4612_v46 = vor.u32 %v5720_v43, %v4609_v45  ;;  %v4595_v52 = vld [vmem:[#allocation4 + $0x120] sm:$0xf]  ;;  %v5742_v43 = vld [vmem:[#allocation4 + $0x1e8] sm:$0xf0]  ;;  %v4549_v45 = vld [vmem:[#allocation4 + $0xcc] sm:$0xf0] }
  0x7b   : > { %v4596_v55 = vor.u32 %v5718_v53, %v4595_v52  ;;  %v4729_v52 = vld [vmem:[#allocation4 + $0x234] sm:$0xf0] }
  0x7d   : > { %1142 = vmatpush.bf16.msra.mxu0 %v4376_v51  ;;  %v4616_v51 = vor.u32 %v5722_v50, %v4615_v48  ;;  %1664 = vmatpush.bf16.msra.mxu2 %v4596_v55  ;;  %v4692_v48 = vor.u32 %v5742_v43, %v4691_v41  ;;  %v4552_v50 = vor.u32 %v5705_v44, %v4549_v45  ;;  %v4555_v55 = vld [vmem:[#allocation4 + $0xc8] sm:$0xf]  ;;  %v5746_v41 = vld [vmem:[#allocation4 + $0x208] sm:$0xf0]  ;;  %v5735_v44 = vld [vmem:[#allocation4 + $0x1b4] sm:$0xf] }
  0x7e   : > { %1653 = vmatpush.bf16.msra.mxu1 %v4464_v13  ;;  %v4715_v13 = vld [vmem:[#allocation4 + $0x210] sm:$0xf]  ;;  %v4669_v45 = vld [vmem:[#allocation4 + $0x1bc] sm:$0xf0] }
  0x81   : > { %1143 = vmatpush.bf16.msra.mxu0 %v4364_v57  ;;  %v4600_v57 = vor.u32 %v5717_v54, %v4597_v56  ;;  %v5707_v56 = vld [vmem:[#allocation4 + $0xd0] sm:$0xf0] }
  0x82   : > { %1654 = vmatpush.bf16.msra.mxu1 %v4452_v19  ;;  %v4716_v19 = vor.u32 %v5748_v15, %v4715_v13  ;;  %v4655_v15 = vld [vmem:[#allocation4 + $0x198] sm:$0xf] }
  0x84   : > { %1144 = vmatmul.bf16.vlgmr.msra.gmra.mxu0 %v6377_v58  ;;  %1676 = vmatpush.bf16.msra.mxu3 %v4716_v19 }
  0x85   : > { %1689 = vmatpush.bf16.msrb.mxu0 %v4540_v59  ;;  %v4603_v59 = vld [vmem:[#allocation4 + $0x128] sm:$0xf] }
  0x86   : > { %1703 = vmatpush.bf16.msrb.mxu1 %v4636_v27  ;;  %v4604_v61 = vor.u32 %v5719_v60, %v4603_v59  ;;  %v5709_v27 = vld [vmem:[#allocation4 + $0xe0] sm:$0xf0]  ;;  %v4556_v60 = vor.u32 %v5707_v56, %v4555_v55  ;;  %v5743_v55 = vld [vmem:[#allocation4 + $0x1f0] sm:$0xf0] }
  0x87   : > { %v4560_v29 = vor.u32 %v5709_v27, %v4559_v26 }
  0x89   : > { %1690 = vmatpush.bf16.msrb.mxu0 %v4528_v62  ;;  %v4583_v62 = vld [vmem:[#allocation4 + $0x108] sm:$0xf] }
  0x8a   : > { %1704 = vmatpush.bf16.msrb.mxu1 %v4624_v37  ;;  %v4568_v37 = vor.u32 %v5710_v36, %v4567_v35  ;;  %v4681_v35 = vld [vmem:[#allocation4 + $0x1d4] sm:$0xf0]  ;;  %v4543_v36 = vld [vmem:[#allocation4 + $0xb0] sm:$0xf] }
  0x8d   : > { %1691 = vmatpush.bf16.msrb.mxu0 %v4516_v1  ;;  %v4584_v1 = vor.u32 %v5715_v63, %v4583_v62  ;;  %v5739_v62 = vld [vmem:[#allocation4 + $0x1d0] sm:$0xf0] }
  0x8e   : > { %1705 = vmatpush.bf16.msrb.mxu1 %v4612_v46 }
  0x8f   : > { %1665 = vmatpush.bf16.msra.mxu2 %v4584_v1  ;;  %v5747_v1 = vld [vmem:[#allocation4 + $0x214] sm:$0xf] }
  0x91   : > { %1692 = vmatpush.bf16.msrb.mxu0 %v4504_v4  ;;  %v4585_v4 = vld [vmem:[#allocation4 + $0x114] sm:$0xf0] }
  0x92   : > { %1706 = vmatpush.bf16.msrb.mxu1 %v4600_v57  ;;  %v4588_v6 = vor.u32 %v5714_v3, %v4585_v4  ;;  %v4720_v3 = vor.u32 %v5747_v1, %v4717_v2  ;;  %v5698_v1 = vld [vmem:[#allocation4 + $0x88] sm:$0xf0] }
  0x93   : > { %1666 = vmatpush.bf16.msra.mxu2 %v4572_v14 }
  0x95   : > { %1693 = vmatpush.bf16.msrb.mxu0 %v4492_v7  ;;  %v4591_v7 = vld [vmem:[#allocation4 + $0x110] sm:$0xf] }
  0x96   : > { %1707 = vmatpush.bf16.msrb.mxu1 %v4588_v6  ;;  %v4667_v6 = vld [vmem:[#allocation4 + $0x1b0] sm:$0xf] }
  0x97   : > { %1667 = vmatpush.bf16.msra.mxu2 %v4560_v29 }
  0x99   : > { %1694 = vmatpush.bf16.msrb.mxu0 %v4480_v10  ;;  %v4592_v10 = vor.u32 %v5716_v8, %v4591_v7  ;;  %v5736_v7 = vld [vmem:[#allocation4 + $0x1b8] sm:$0xf0] }
  0x9a   : > { %v5744_v8 = vld [vmem:[#allocation4 + $0x1fc] sm:$0xf]  ;;  %v4668_v11 = vor.u32 %v5736_v7, %v4667_v6  ;;  %v5729_v7 = vld [vmem:[#allocation4 + $0x184] sm:$0xf] }
  0x9b   : > { %v4708_v14 = vor.u32 %v5744_v8, %v4705_v12  ;;  %v4645_v8 = vld [vmem:[#allocation4 + $0x18c] sm:$0xf0] }
  0x9d   : > { %1695 = vmatpush.bf16.msrb.mxu0 %v4468_v16  ;;  %v5711_v16 = vld [vmem:[#allocation4 + $0xf4] sm:$0xf] }
  0x9e   : > { %v4576_v20 = vor.u32 %v5711_v16, %v4573_v17  ;;  %v5733_v16 = vld [vmem:[#allocation4 + $0x1a0] sm:$0xf0] }
  0x9f   : > { %v5741_v17 = vld [vmem:[#allocation4 + $0x1e4] sm:$0xf]  ;;  %v4656_v21 = vor.u32 %v5733_v16, %v4655_v15 }
  0xa0   : > { %1708 = vmatpush.bf16.msrb.mxu1 %v4576_v20  ;;  %v5752_v20 = vld [vmem:[#allocation4 + $0x238] sm:$0xf0] }
  0xa1   : > { %1696 = vmatpush.bf16.msrb.mxu0 %v4456_v28  ;;  %v4703_v28 = vld [vmem:[#allocation4 + $0x1f8] sm:$0xf] }
  0xa2   : > { %v4704_v33 = vor.u32 %v5745_v30, %v4703_v28  ;;  %v4723_v30 = vld [vmem:[#allocation4 + $0x218] sm:$0xf] }
  0xa4   : > { %1677 = vmatpush.bf16.msra.mxu3 %v4704_v33  ;;  %v635_v33 = vperm.slane %v6391_v9, 1 }
  0xa5   : > { %1745 = vmatpush.bf16.msra.mxu0 %v4640_v32  ;;  %v4561_v32 = vld [vmem:[#allocation4 + $0xe4] sm:$0xf0] }
  0xa6   : > { %v4564_v34 = vor.u32 %v5708_v31, %v4561_v32  ;;  %v5749_v31 = vld [vmem:[#allocation4 + $0x220] sm:$0xf0] }
  0xa8   : > { %1709 = vmatpush.bf16.msrb.mxu1 %v4564_v34  ;;  %1678 = vmatpush.bf16.msra.mxu3 %v4692_v48  ;;  %v5738_v34 = vld [vmem:[#allocation4 + $0x1cc] sm:$0xf] }
  0xa9   : > { %1746 = vmatpush.bf16.msra.mxu0 %v4628_v40  ;;  %v5706_v40 = vld [vmem:[#allocation4 + $0xc8] sm:$0xf0] }
  0xaa   : > { %v4548_v42 = vor.u32 %v5706_v40, %v4547_v39  ;;  %v5704_v39 = vld [vmem:[#allocation4 + $0xb8] sm:$0xf0]  ;;  %v4711_v40 = vld [vmem:[#allocation4 + $0x200] sm:$0xf] }
  0xac   : > { %1668 = vmatpush.bf16.msra.mxu2 %v4548_v42  ;;  %1710 = vmatpush.bf16.msrb.mxu1 %v4552_v50  ;;  %v4544_v42 = vor.u32 %v5704_v39, %v4543_v36  ;;  %v4712_v50 = vor.u32 %v5746_v41, %v4711_v40  ;;  %v5686_v36 = vld [vmem:[#allocation4 + $0x28] sm:$0xf0] }
  0xad   : > { %1747 = vmatpush.bf16.msra.mxu0 %v4616_v51  ;;  %v5750_v51 = vld [vmem:[#allocation4 + $0x22c] sm:$0xf] }
  0xae   : > { %v4732_v54 = vor.u32 %v5750_v51, %v4729_v52  ;;  %v4672_v51 = vor.u32 %v5735_v44, %v4669_v45  ;;  %v5701_v52 = vld [vmem:[#allocation4 + $0xa0] sm:$0xf0] }
  0xb0   : > { %1717 = vmatpush.bf16.msrb.mxu2 %v4732_v54  ;;  %v4699_v54 = vld [vmem:[#allocation4 + $0x1e8] sm:$0xf] }
  0xb1   : > { %1748 = vmatpush.bf16.msra.mxu0 %v4604_v61  ;;  %v4679_v61 = vld [vmem:[#allocation4 + $0x1c8] sm:$0xf] }
  0xb2   : > { %v4680_v0 = vor.u32 %v5739_v62, %v4679_v61  ;;  %v4657_v61 = vld [vmem:[#allocation4 + $0x1a4] sm:$0xf0]  ;;  %v4519_v62 = vld [vmem:[#allocation4 + $0x80] sm:$0xf] }
  0xb4   : > { %1679 = vmatpush.bf16.msra.mxu3 %v4680_v0  ;;  %1718 = vmatpush.bf16.msrb.mxu2 %v4720_v3  ;;  %v4687_v3 = vld [vmem:[#allocation4 + $0x1d0] sm:$0xf] }
  0xb5   : > { %1749 = vmatpush.bf16.msra.mxu0 %v4592_v10  ;;  %v4735_v10 = vld [vmem:[#allocation4 + $0x230] sm:$0xf] }
  0xb6   : > { %v4736_v28 = vor.u32 %v5752_v20, %v4735_v10  ;;  %v4507_v10 = vld [vmem:[#allocation4 + $0x68] sm:$0xf] }
  0xb8   : > { %1680 = vmatpush.bf16.msra.mxu3 %v4668_v11  ;;  %1719 = vmatpush.bf16.msrb.mxu2 %v4708_v14  ;;  %v5695_v14 = vld [vmem:[#allocation4 + $0x70] sm:$0xf0] }
  0xb9   : > { %1750 = vmatpush.bf16.msra.mxu0 %v4580_v25  ;;  %v5730_v25 = vld [vmem:[#allocation4 + $0x188] sm:$0xf0] }
  0xbc   : > { %1681 = vmatpush.bf16.msra.mxu3 %v4656_v21 }
  0xbd   : > { %1751 = vmatpush.bf16.msra.mxu0 %v4568_v37  ;;  %v4724_v37 = vor.u32 %v5749_v31, %v4723_v30  ;;  %v4483_v30 = vld [vmem:[#allocation4 + $0x38] sm:$0xf]  ;;  %v5689_v31 = vld [vmem:[#allocation4 + $0x40] sm:$0xf0] }
  0xc1   : > { %v1033_v18 = vpop.f32.mrf.mxu0  ;;  %1752 = vmatpush.bf16.msra.mxu0 %v4556_v60  ;;  %v5732_v60 = vld [vmem:[#allocation4 + $0x19c] sm:$0xf] }
  0xc2   : > { %v1047_v24 = vpop.f32.mrf.mxu1  ;;  %v1034_v38 = vadd.f32 %v1033_v18, %v634_v23  ;;  %v4660_v0 = vor.u32 %v5732_v60, %v4657_v61 }
  0xc4   : > { %v1048_v57 = vadd.f32 %v1047_v24, %v1034_v38  ;;  %v4643_v24 = vld [vmem:[#allocation4 + $0x180] sm:$0xf]  ;;  %v4684_v38 = vor.u32 %v5738_v34, %v4681_v35 }
  0xc5   : > { %v4644_v32 = vor.u32 %v5730_v25, %v4643_v24  ;;  %v4663_v25 = vld [vmem:[#allocation4 + $0x1a0] sm:$0xf] }
  0xc6   : > { %v4471_v35 = vld [vmem:[#allocation4 + $0x20] sm:$0xf] }
  0xc7   : > { %1682 = vmatpush.bf16.msra.mxu3 %v4644_v32  ;;  %v4472_v40 = vor.u32 %v5686_v36, %v4471_v35 }
  0xc9   : > { %v1035_v46 = vpop.f32.mrf.mxu0 }
  0xca   : > { %v1061_v53 = vpop.f32.mrf.mxu2  ;;  %v1036_v59 = vadd.f32 %v1035_v46, %v634_v23  ;;  %v1049_v63 = vpop.f32.mrf.mxu1  ;;  %v4696_v23 = vor.u32 %v5741_v17, %v4693_v22  ;;  %v4531_v46 = vld [vmem:[#allocation4 + $0x98] sm:$0xf]  ;;  %v4495_v22 = vld [vmem:[#allocation4 + $0x50] sm:$0xf] }
  0xcb   : > { %v1062_v4 = vadd.f32 %v1061_v53, %v1048_v57  ;;  %1731 = vmatpush.bf16.msrb.mxu3 %v4544_v42  ;;  %v4532_v56 = vor.u32 %v5701_v52, %v4531_v46  ;;  %v4675_v17 = vld [vmem:[#allocation4 + $0x1b8] sm:$0xf]  ;;  %v4459_v42 = vld [vmem:[#allocation4 + $0x8] sm:$0xf]  ;;  %v636_v46 = vperm.slane %v6391_v9, 2 }
  0xcc   : > { %v1050_v5 = vadd.f32 %v1049_v63, %v1036_v59  ;;  %1720 = vmatpush.bf16.msrb.mxu2 %v4696_v23  ;;  %v4700_v63 = vor.u32 %v5743_v55, %v4699_v54  ;;  %v5692_v23 = vld [vmem:[#allocation4 + $0x58] sm:$0xf0] }
  0xcd   : > { %v1150_v18 = vmax.f32 %v1062_v4, 0.0  ;;  %v1075_v27 = vpop.f32.mrf.mxu3  ;;  %v5740_v4 = vld [vmem:[#allocation4 + $0x1d8] sm:$0xf0] }
  0xce   : > { %v1076_v43 = vadd.f32 %v1075_v27, %v635_v33  ;;  %v4688_v12 = vor.u32 %v5740_v4, %v4687_v3  ;;  %v4496_v27 = vor.u32 %v5692_v23, %v4495_v22 }
  0xcf   : > { %1732 = vmatpush.bf16.msrb.mxu3 %v4532_v56 }
  0xd0   : > { %1721 = vmatpush.bf16.msrb.mxu2 %v4684_v38  ;;  %v5731_v38 = vld [vmem:[#allocation4 + $0x190] sm:$0xf0] }
  0xd2   : > { %v1063_v13 = vpop.f32.mrf.mxu2 }
  0xd3   : > { %v1064_v19 = vadd.f32 %v1063_v13, %v1050_v5  ;;  %v4520_v5 = vor.u32 %v5698_v1, %v4519_v62  ;;  %v4648_v13 = vor.u32 %v5729_v7, %v4645_v8  ;;  %v1255_v1 = vld [vmem:[%s6565_s5] sm:$0x7] }
  0xd4   : > { %1722 = vmatpush.bf16.msrb.mxu2 %v4672_v51  ;;  %v1257_v4 = vperm.slane %v1255_v1, 0  ;;  %v1259_v36 = vperm.slane %v1255_v1, 2 }
  0xd5   : > { %v1153_v26 = vmax.f32 %v1064_v19, 0.0  ;;  %v1077_v57 = vpop.f32.mrf.mxu3  ;;  %1733 = vmatpush.bf16.msrb.mxu3 %v4520_v5  ;;  %v4508_v19 = vor.u32 %v5695_v14, %v4507_v10  ;;  %v1258_v5 = vperm.slane %v1255_v1, 1 }
  0xd6   : > { %v1078_v2 = vadd.f32 %v1077_v57, %v635_v33  ;;  %v4484_v33 = vor.u32 %v5689_v31, %v4483_v30 }
  0xd7   : > { %v6394_v29 = vpack.c.bf16 %v1153_v26, %v1150_v18  ;;  %v5737_v18 = vld [vmem:[#allocation4 + $0x1c0] sm:$0xf0]  ;;  %v5734_v26 = vld [vmem:[#allocation4 + $0x1a8] sm:$0xf0] }
  0xd8   : > { %1723 = vmatpush.bf16.msrb.mxu2 %v4660_v0  ;;  %v4676_v24 = vor.u32 %v5737_v18, %v4675_v17  ;;  %v4664_v34 = vor.u32 %v5734_v26, %v4663_v25 }
  0xd9   : > { %1655 = vmatmul.bf16.vlgmr.msra.gmra.mxu1 %v6394_v29  ;;  %1697 = vmatmul.bf16.vlgmr.msrb.gmra.mxu0 %v6394_v29 }
  0xda   : > { %1759 = vmatpush.bf16.msra.mxu1 %v4736_v28  ;;  %1734 = vmatpush.bf16.msrb.mxu3 %v4508_v19 }
  0xdc   : > { %1724 = vmatpush.bf16.msrb.mxu2 %v4648_v13 }
  0xde   : > { %1760 = vmatpush.bf16.msra.mxu1 %v4724_v37  ;;  %1735 = vmatpush.bf16.msrb.mxu3 %v4496_v27  ;;  %v4651_v37 = vld [vmem:[#allocation4 + $0x188] sm:$0xf] }
  0xdf   : > { %v4652_v41 = vor.u32 %v5731_v38, %v4651_v37 }
  0xe1   : > { %v1089_v48 = vpop.f32.mrf.mxu0 }
  0xe2   : > { %v1103_v53 = vpop.f32.mrf.mxu1  ;;  %v1090_v59 = vadd.f32 %v1089_v48, %v1076_v43  ;;  %1761 = vmatpush.bf16.msra.mxu1 %v4712_v50  ;;  %1736 = vmatpush.bf16.msrb.mxu3 %v4484_v33  ;;  %v5683_v43 = vld [vmem:[#allocation4 + $0x10] sm:$0xf0] }
  0xe3   : > { %v4460_v45 = vor.u32 %v5683_v43, %v4459_v42 }
  0xe4   : > { %v1104_v6 = vadd.f32 %v1103_v53, %v1090_v59 }
  0xe6   : > { %1762 = vmatpush.bf16.msra.mxu1 %v4700_v63  ;;  %v1151_v20 = vmax.f32 %v1104_v6, 0.0  ;;  %1737 = vmatpush.bf16.msrb.mxu3 %v4472_v40 }
  0xe9   : > { %v1091_v11 = vpop.f32.mrf.mxu0 }
  0xea   : > { %v1092_v15 = vadd.f32 %v1091_v11, %v1078_v2  ;;  %v1105_v16 = vpop.f32.mrf.mxu1  ;;  %1763 = vmatpush.bf16.msra.mxu1 %v4688_v12  ;;  %v1117_v39 = vpop.f32.mrf.mxu2  ;;  %1738 = vmatpush.bf16.msrb.mxu3 %v4460_v45 }
  0xeb   : > { %v1118_v48 = vadd.f32 %v1117_v39, %v636_v46 }
  0xec   : > { %v1106_v21 = vadd.f32 %v1105_v16, %v1092_v15 }
  0xed   : > { %v1131_v44 = vpop.f32.mrf.mxu3 }
  0xee   : > { %v1154_v28 = vmax.f32 %v1106_v21, 0.0  ;;  %1764 = vmatpush.bf16.msra.mxu1 %v4676_v24  ;;  %v1132_v52 = vadd.f32 %v1131_v44, %v1118_v48 }
  0xf0   : > { %v1253_v32 = vpack.c.bf16 %v1154_v28, %v1151_v20 }
  0xf2   : > { %1669 = vmatmul.bf16.vlgmr.msra.gmra.mxu2 %v1253_v32  ;;  %1711 = vmatmul.bf16.vlgmr.msrb.gmra.mxu1 %v1253_v32  ;;  %v1119_v50 = vpop.f32.mrf.mxu2 }
  0xf3   : > { %1753 = vmatmul.bf16.vlgmr.msra.gmra.mxu0 %v1253_v32  ;;  %1765 = vmatpush.bf16.msra.mxu1 %v4664_v34  ;;  %v1120_v53 = vadd.f32 %v1119_v50, %v636_v46 }
  0xf5   : > { %v1133_v54 = vpop.f32.mrf.mxu3 }
  0xf6   : > { %v1134_v55 = vadd.f32 %v1133_v54, %v1120_v53 }
  0xf7   : > { %1766 = vmatpush.bf16.msra.mxu1 %v4652_v41 }
 0x101   : > { %v1145_v51 = vpop.f32.mrf.mxu0 }
 0x102   : > { %v1146_v56 = vadd.f32 %v1145_v51, %v1132_v52 }
 0x104   : > { %v1152_v60 = vmax.f32 %v1146_v56, 0.0 }
 0x109   : > { %v1147_v57 = vpop.f32.mrf.mxu0 }
 0x10a   : > { %v1148_v59 = vadd.f32 %v1147_v57, %v1134_v55 }
 0x10c   : > { %v1155_v61 = vmax.f32 %v1148_v59, 0.0 }
 0x10e   : > { %v1254_v62 = vpack.c.bf16 %v1155_v61, %v1152_v60 }
 0x110   : > { %1683 = vmatmul.bf16.vlgmr.msra.gmra.mxu3 %v1254_v62  ;;  %1725 = vmatmul.bf16.vlgmr.msrb.gmra.mxu2 %v1254_v62 }
 0x111   : > { %1767 = vmatmul.bf16.vlgmr.msra.gmra.mxu1 %v1254_v62 }
 0x120   : > { %1739 = vmatmul.bf16.vlgmr.msrb.gmra.mxu3 %v6394_v29 }
 0x156   : > { %v1656_v9 = vpop.f32.mrf.mxu1  ;;  %v1698_v2 = vpop.f32.mrf.mxu0 }
 0x157   : > { %v1657_v7 = vadd.f32 %v1656_v9, %v1257_v4  ;;  %v1699_v8 = vadd.f32 %v1698_v2, %v1258_v5 }
 0x15e   : > { %v1658_v0 = vpop.f32.mrf.mxu1  ;;  %v1700_v15 = vpop.f32.mrf.mxu0 }
 0x15f   : > { %v1659_v19 = vadd.f32 %v1658_v0, %v1257_v4  ;;  %v1701_v20 = vadd.f32 %v1700_v15, %v1258_v5 }
 0x16f   : > { %v1712_v6 = vpop.f32.mrf.mxu1 }
 0x170   : > { %v1713_v10 = vadd.f32 %v1712_v6, %v1699_v8  ;;  %v1754_v39 = vpop.f32.mrf.mxu0 }
 0x175   : > { %v1670_v63 = vpop.f32.mrf.mxu2 }
 0x176   : > { %v1671_v11 = vadd.f32 %v1670_v63, %v1657_v7 }
 0x177   : > { %v1714_v18 = vpop.f32.mrf.mxu1 }
 0x178   : > { %v1715_v22 = vadd.f32 %v1714_v18, %v1701_v20  ;;  %v1756_v53 = vpop.f32.mrf.mxu0 }
 0x17d   : > { %v1672_v3 = vpop.f32.mrf.mxu2 }
 0x17e   : > { %v1673_v23 = vadd.f32 %v1672_v3, %v1659_v19  ;;  %v1979_v3 = vlaneseq }
 0x180   : > { %v6405_v5 = vshrl.u32 %v1979_v3, 7  ;;  %vm6539_vm13 = vcmp.lt.s32.totalorder %v1979_v3, 384 }
 0x182   : > { %vm1981_vm0 = vcmp.lt.s32.totalorder %v6405_v5, 6 }
 0x18e   : > { %v1768_v44 = vpop.f32.mrf.mxu1 }
 0x193   : > { %v1684_v12 = vpop.f32.mrf.mxu3  ;;  %v1726_v13 = vpop.f32.mrf.mxu2 }
 0x194   : > { %v1685_v14 = vadd.f32 %v1684_v12, %v1671_v11  ;;  %v1727_v29 = vadd.f32 %v1726_v13, %v1713_v10 }
 0x196   : > { %v1773_v16 = vmax.f32 %v1685_v14, 0.0  ;;  %v1774_v17 = vmax.f32 %v1727_v29, 0.0  ;;  %v1770_v56 = vpop.f32.mrf.mxu1 }
 0x198   : > { %v1875_v21 = vpack.c.bf16 %v1774_v17, %v1773_v16 }
 0x19a   : > { %v1892_v24 = vunpack.c.l.b16 %v1875_v21  ;;  %v1893_v25 = vunpack.c.h.b16 %v1875_v21 }
 0x19b   : > { %v1686_v26 = vpop.f32.mrf.mxu3  ;;  %v1728_v27 = vpop.f32.mrf.mxu2 }
 0x19c   : > { %v1895_v28 = vpack.c.b16 %v1892_v24, %v1892_v24  ;;  %v1896_v30 = vpack.c.b16 %v1893_v25, %v1893_v25  ;;  %v1687_v31 = vadd.f32 %v1686_v26, %v1673_v23  ;;  %v1729_v32 = vadd.f32 %v1728_v27, %v1715_v22 }
 0x19e   : > { %v1776_v33 = vmax.f32 %v1687_v31, 0.0  ;;  %v1777_v34 = vmax.f32 %v1729_v32, 0.0  ;;  %1908 = vmatpush.bf16.xpose.msra.mxu2 %v1895_v28  ;;  %1921 = vmatpush.bf16.xpose.msra.mxu3 %v1896_v30  ;;  %v6040_v31 = vld [vmem:[%s6360_s14] sm:$0xff]  ;;  %v6041_v32 = vld [vmem:[%s6360_s14 + $0x8] sm:$0xff] }
 0x1a0   : > { %v1877_v35 = vpack.c.bf16 %v1777_v34, %v1776_v33  ;;  %v2050_v33 = vpack.c.bf16 %v6041_v32, %v6040_v31 }
 0x1a2   : > { %v1881_v37 = vunpack.c.l.b16 %v1877_v35  ;;  %v1882_v38 = vunpack.c.h.b16 %v1877_v35  ;;  %v2116_v35 = vunpack.c.l.b16 %v2050_v33 }
 0x1a3   : > { %v1740_v40 = vpop.f32.mrf.mxu3 }
 0x1a4   : > { %v1884_v41 = vpack.c.b16 %v1881_v37, %v1881_v37  ;;  %v1885_v42 = vpack.c.b16 %v1882_v38, %v1882_v38  ;;  %v1741_v43 = vadd.f32 %v1740_v40, %v1259_v36  ;;  %v2119_v37 = vpack.c.b16 %v2116_v35, %v2116_v35  ;;  %v5847_v35 = vld [vmem:[#allocation7 + $0xb0] sm:$0xf0] }
 0x1a6   : > { %v1755_v45 = vadd.f32 %v1754_v39, %v1741_v43  ;;  %1909 = vmatmul.bf16.vlgmr.msra.gmra.mxu2 %v1884_v41  ;;  %1922 = vmatmul.bf16.vlgmr.msra.gmra.mxu3 %v1885_v42  ;;  %v2126_v40 = vsel %vm2065_vm2, %v2119_v37, 0 }
 0x1a7   : > { %1947 = vmatpush.bf16.xpose.msrb.mxu3 %v1884_v41 }
 0x1a8   : > { %v1769_v46 = vadd.f32 %v1768_v44, %v1755_v45  ;;  %v6042_v45 = vld [vmem:[%s6365_s20] sm:$0xff] }
 0x1aa   : > { %v1775_v48 = vmax.f32 %v1769_v46, 0.0  ;;  %v6043_v46 = vld [vmem:[%s6365_s20 + $0x8] sm:$0xff] }
 0x1ab   : > { %v1742_v50 = vpop.f32.mrf.mxu3 }
 0x1ac   : > { %v1876_v51 = vpack.c.bf16 %v1775_v48, %v1775_v48  ;;  %v1743_v52 = vadd.f32 %v1742_v50, %v1259_v36  ;;  %v2052_v48 = vpack.c.bf16 %v6043_v46, %v6042_v45  ;;  %v6044_v50 = vld [vmem:[%s6365_s20 + $0x10] sm:$0xff]  ;;  %v5841_v45 = vld [vmem:[#allocation7 + $0x80] sm:$0xf0] }
 0x1ae   : > { %v1894_v54 = vunpack.c.l.b16 %v1876_v51  ;;  %v1757_v55 = vadd.f32 %v1756_v53, %v1743_v52  ;;  %v2053_v51 = vpack.c.bf16 %v6044_v50, %v6044_v50  ;;  %v4925_v50 = vld [vmem:[#allocation7 + $0x168] sm:$0xf] }
 0x1af   : > { %1960 = vmatpush.bf16.xpose.msra.mxu3 %v1885_v42 }
 0x1b0   : > { %v1897_v57 = vpack.c.b16 %v1894_v54, %v1894_v54  ;;  %v1771_v59 = vadd.f32 %v1770_v56, %v1757_v55  ;;  %v2056_v54 = vunpack.c.l.b16 %v2052_v48  ;;  %v2057_v55 = vunpack.c.h.b16 %v2052_v48 }
 0x1b1   : > { %v2058_v56 = vunpack.c.l.b16 %v2053_v51 }
 0x1b2   : > { %v1778_v60 = vmax.f32 %v1771_v59, 0.0  ;;  %1934 = vmatpush.bf16.xpose.msrb.mxu2 %v1897_v57  ;;  %v2059_v59 = vpack.c.b16 %v2056_v54, %v2056_v54  ;;  %v4793_v54 = vld [vmem:[#allocation7 + $0x60] sm:$0xf] }
 0x1b4   : > { %v1878_v61 = vpack.c.bf16 %v1778_v60, %v1778_v60  ;;  %v2060_v60 = vpack.c.b16 %v2057_v55, %v2057_v55  ;;  %v5838_v55 = vld [vmem:[#allocation7 + $0x68] sm:$0xf0] }
 0x1b6   : > { %v1883_v62 = vunpack.c.l.b16 %v1878_v61  ;;  %1948 = vmatmul.bf16.vlgmr.msrb.gmra.mxu3 %v1895_v28  ;;  %v2061_v61 = vpack.c.b16 %v2058_v56, %v2058_v56 }
 0x1b8   : > { %v1886_v9 = vpack.c.b16 %v1883_v62, %v1883_v62 }
 0x1ba   : > { %1935 = vmatmul.bf16.vlgmr.msrb.gmra.mxu2 %v1886_v9  ;;  %1973 = vmatpush.bf16.xpose.msrb.mxu1 %v1886_v9  ;;  %v2067_v9 = vsel %vm2065_vm2, %v2059_v59, 0  ;;  %v4913_v59 = vld [vmem:[#allocation7 + $0x150] sm:$0xf] }
 0x1bb   : > { %2082 = vmatpush.bf16.msra.mxu2 %v2067_v9  ;;  %v4831_v9 = vld [vmem:[#allocation7 + $0xb4] sm:$0xf0] }
 0x1c1   : > { %1974 = vmatmul.bf16.vlgmr.msrb.gmra.mxu1 %v1897_v57 }
 0x1c2   : > { %2141 = vmatpush.bf16.msra.mxu1 %v2126_v40  ;;  %v5844_v40 = vld [vmem:[#allocation7 + $0x98] sm:$0xf0] }
 0x1c6   : > { %1961 = vmatmul.bf16.vlgmr.msra.gmra.mxu3 %v1896_v30 }
 0x229   : > { %v1910_v63 = vpop.f32.mrf.mxu2  ;;  %v1923_v0 = vpop.f32.mrf.mxu3 }
 0x22a   : > { %v1924_v6 = vadd.f32 %v1923_v0, %v1910_v63  ;;  %v2070_v63 = vsel %vm2065_vm2, %v2060_v60, 0  ;;  %v2073_v0 = vsel %vm2065_vm2, %v2061_v61, 0  ;;  %v5868_v60 = vld [vmem:[#allocation7 + $0x158] sm:$0xf0] }
 0x22b   : > { %2095 = vmatpush.bf16.msrb.mxu3 %v2070_v63  ;;  %2108 = vmatpush.bf16.msrb.mxu0 %v2073_v0  ;;  %v4914_v63 = vor.u32 %v5868_v60, %v4913_v59  ;;  %v5883_v59 = vld [vmem:[#allocation7 + $0x1d0] sm:$0xf0] }
 0x231   : > { %v1912_v1 = vpop.f32.mrf.mxu2  ;;  %v1925_v2 = vpop.f32.mrf.mxu3 }
 0x239   : > { %v1949_v4 = vpop.f32.mrf.mxu3 }
 0x23d   : > { %v1936_v7 = vpop.f32.mrf.mxu2 }
 0x23e   : > { %v1937_v8 = vadd.f32 %v1936_v7, %v1924_v6  ;;  %v1975_v10 = vpop.f32.mrf.mxu1 }
 0x240   : > { %v1982_v11 = vsel %vm1981_vm0, %v1937_v8, -1e+30 }
 0x241   : > { %v2017_v12 = vsel %vm1983_vm1, %v1982_v11, -inf  ;;  %v1951_v13 = vpop.f32.mrf.mxu3 }
 0x242   : > { %v2018_v14 = vrot.slane %v2017_v12, 4 }
 0x244   : > { %v2019_v29 = vmax.f32 %v2017_v12, %v2018_v14 }
 0x245   : > { %v1938_v15 = vpop.f32.mrf.mxu2 }
 0x246   : > { %v2020_v16 = vrot.slane %v2019_v29, 2  ;;  %v1977_v17 = vpop.f32.mrf.mxu1 }
 0x248   : > { %v2021_v18 = vmax.f32 %v2019_v29, %v2020_v16 }
 0x249   : > { %v1962_v19 = vpop.f32.mrf.mxu3 }
 0x24a   : > { %v2022_v20 = vrot.slane %v2021_v18, 1  ;;  %v1963_v21 = vadd.f32 %v1962_v19, %v1949_v4 }
 0x24c   : > { %v2023_v22 = vmax.f32 %v2021_v18, %v2022_v20  ;;  %v1976_v23 = vadd.f32 %v1975_v10, %v1963_v21  ;;  %v2117_v10 = vunpack.c.h.b16 %v2050_v33 }
 0x24e   : > { %v2024_v24 = vsub.f32 %v1982_v11, %v2023_v22  ;;  %v1984_v25 = vsel %vm1983_vm1, %v1976_v23, -inf  ;;  %v6045_v11 = vld [vmem:[%s6360_s14 + $0x10] sm:$0xff]  ;;  %v2120_v29 = vpack.c.b16 %v2117_v10, %v2117_v10 }
 0x24f   : > { %v1985_v26 = vrot.slane %v1984_v25, 4  ;;  %v2051_v12 = vpack.c.bf16 %v6045_v11, %v6045_v11  ;;  %v5835_v10 = vld [vmem:[#allocation7 + $0x50] sm:$0xf0]  ;;  %v4901_v11 = vld [vmem:[#allocation7 + $0x138] sm:$0xf] }
 0x250   : > { %v2025_v27 = vmul.f32 1.442695, %v2024_v24  ;;  %v2129_v18 = vsel %vm2065_vm2, %v2120_v29, 0  ;;  %v5843_v29 = vld [vmem:[#allocation7 + $0x94] sm:$0xf] }
 0x251   : > { %v1986_v28 = vmax.f32 %v1984_v25, %v1985_v26  ;;  %v1964_v30 = vpop.f32.mrf.mxu3  ;;  %v2118_v15 = vunpack.c.l.b16 %v2051_v12  ;;  %2154 = vmatpush.bf16.msrb.mxu2 %v2129_v18  ;;  %v5865_v12 = vld [vmem:[#allocation7 + $0x140] sm:$0xf0] }
 0x252   : > { %6032 = vpow2.f32 %v2025_v27  ;;  %v4902_v18 = vor.u32 %v5865_v12, %v4901_v11  ;;  %v5825_v11 = vld [vmem:[#allocation7 + $0x4] sm:$0xf]  ;;  %v4747_v12 = vld [vmem:[#allocation7 + $0xc] sm:$0xf0] }
 0x253   : > { %v1987_v34 = vrot.slane %v1986_v28, 2  ;;  %v2121_v19 = vpack.c.b16 %v2118_v15, %v2118_v15  ;;  %v4819_v15 = vld [vmem:[#allocation7 + $0x9c] sm:$0xf0] }
 0x255   : > { %v1988_v36 = vmax.f32 %v1986_v28, %v1987_v34  ;;  %v4829_v34 = vld [vmem:[#allocation7 + $0xa8] sm:$0xf] }
 0x256   : > { %v4830_v37 = vor.u32 %v5847_v35, %v4829_v34  ;;  %v4877_v34 = vld [vmem:[#allocation7 + $0x108] sm:$0xf]  ;;  %v5859_v35 = vld [vmem:[#allocation7 + $0x110] sm:$0xf0] }
 0x257   : > { %v1989_v38 = vrot.slane %v1988_v36, 1 }
 0x258   : > { %v6414_v39 = vpop.eup %6032  ;;  %2656 = vmatpush.bf16.msra.mxu0 %v4830_v37  ;;  %v5829_v37 = vld [vmem:[#allocation7 + $0x20] sm:$0xf0] }
 0x259   : > { %v2027_v41 = vsel %vm1983_vm1, %v6414_v39, 0.0  ;;  %v1990_v42 = vmax.f32 %v1988_v36, %v1989_v38  ;;  %v4817_v38 = vld [vmem:[#allocation7 + $0x90] sm:$0xf] }
 0x25a   : > { %v2028_v43 = vrot.slane %v2027_v41, 4 }
 0x25b   : > { %v1991_v44 = vsub.f32 %v1976_v23, %v1990_v42  ;;  %v2132_v23 = vsel %vm2065_vm2, %v2121_v19, 0  ;;  %v4818_v42 = vor.u32 %v5844_v40, %v4817_v38  ;;  %v5837_v40 = vld [vmem:[#allocation7 + $0x64] sm:$0xf] }
 0x25c   : > { %v2029_v52 = vadd.f32 %v2028_v43, %v2027_v41  ;;  %2167 = vmatpush.bf16.msra.mxu3 %v2132_v23  ;;  %v5832_v23 = vld [vmem:[#allocation7 + $0x38] sm:$0xf0] }
 0x25d   : > { %v1992_v53 = vmul.f32 1.442695, %v1991_v44  ;;  %v4805_v44 = vld [vmem:[#allocation7 + $0x78] sm:$0xf]  ;;  %2657 = vmatpush.bf16.msra.mxu0 %v4818_v42 }
 0x25e   : > { %v2030_v57 = vrot.slane %v2029_v52, 2  ;;  %v4806_v51 = vor.u32 %v5841_v45, %v4805_v44  ;;  %v4985_v45 = vld [vmem:[#allocation7 + $0x1e0] sm:$0xf] }
 0x25f   : > { %6034 = vpow2.f32 %v1992_v53 }
 0x260   : > { %v2031_v62 = vadd.f32 %v2030_v57, %v2029_v52  ;;  %v5871_v52 = vld [vmem:[#allocation7 + $0x170] sm:$0xf0] }
 0x261   : > { %v4926_v56 = vor.u32 %v5871_v52, %v4925_v50  ;;  %2658 = vmatpush.bf16.msra.mxu0 %v4806_v51  ;;  %v5834_v51 = vld [vmem:[#allocation7 + $0x4c] sm:$0xf]  ;;  %v4783_v52 = vld [vmem:[#allocation7 + $0x54] sm:$0xf0] }
 0x262   : > { %v2032_v1 = vrot.slane %v2031_v62, 1  ;;  %v4786_v60 = vor.u32 %v5834_v51, %v4783_v52  ;;  %v4879_v51 = vld [vmem:[#allocation7 + $0x114] sm:$0xf0] }
 0x263   : > { %2670 = vmatpush.bf16.msrb.mxu1 %v4926_v56 }
 0x264   : > { %v2033_v2 = vadd.f32 %v2032_v1, %v2031_v62  ;;  %v5846_v62 = vld [vmem:[#allocation7 + $0xac] sm:$0xf]  ;;  %v4794_v1 = vor.u32 %v5838_v55, %v4793_v54  ;;  %v4927_v55 = vld [vmem:[#allocation7 + $0x174] sm:$0xf0] }
 0x265   : > { %v6425_v4 = vpop.eup %6034  ;;  %v5870_v54 = vld [vmem:[#allocation7 + $0x16c] sm:$0xf] }
 0x266   : > { %6036 = vrcp.f32 %v2033_v2  ;;  %v1994_v6 = vsel %vm1983_vm1, %v6425_v4, 0.0  ;;  %v2045_v21 = vand.u32 2147483648, %v2033_v2  ;;  %v2043_v25 = vand.u32 2147483647, %v2033_v2  ;;  %2659 = vmatpush.bf16.msra.mxu0 %v4794_v1  ;;  %v4915_v1 = vld [vmem:[#allocation7 + $0x15c] sm:$0xf0] }
 0x267   : > { %v1995_v7 = vrot.slane %v1994_v6, 4  ;;  %vm2039_vm4 = vweird.f32 %v2033_v2  ;;  %2671 = vmatpush.bf16.msrb.mxu1 %v4914_v63 }
 0x268   : > { %v2046_v28 = vor.u32 1.1754944e-38, %v2045_v21  ;;  %vm2044_vm6 = vcmp.eq.f32.partialorder %v2043_v25, 8.507059e+37  ;;  %v4889_v21 = vld [vmem:[#allocation7 + $0x120] sm:$0xf]  ;;  %v5840_v25 = vld [vmem:[#allocation7 + $0x7c] sm:$0xf] }
 0x269   : > { %v1996_v8 = vadd.f32 %v1995_v7, %v1994_v6  ;;  %v5021_v6 = vld [vmem:[#allocation7 + $0x228] sm:$0xf]  ;;  %v5895_v7 = vld [vmem:[#allocation7 + $0x230] sm:$0xf0] }
 0x26b   : > { %v1997_v14 = vrot.slane %v1996_v8, 2  ;;  %2672 = vmatpush.bf16.msrb.mxu1 %v4902_v18  ;;  %v4865_v18 = vld [vmem:[#allocation7 + $0xf0] sm:$0xf] }
 0x26c   : > { %v6037_v13 = vpop.eup %6036 }
 0x26d   : > { %v2035_v16 = vmul.f32 %v6037_v13, %v2033_v2  ;;  %v1998_v17 = vadd.f32 %v1997_v14, %v1996_v8  ;;  %vm2040_vm3 = vweird.f32 %v6037_v13  ;;  %v4781_v2 = vld [vmem:[#allocation7 + $0x48] sm:$0xf] }
 0x26e   : > { %vm2041_vm5 = vmor %vm2039_vm4, %vm2040_vm3  ;;  %v4782_v19 = vor.u32 %v5835_v10, %v4781_v2 }
 0x26f   : > { %v2036_v20 = vsub.f32 1.0, %v2035_v16  ;;  %v1999_v22 = vrot.slane %v1998_v17, 1  ;;  %v5022_v16 = vor.u32 %v5895_v7, %v5021_v6  ;;  %v5828_v7 = vld [vmem:[#allocation7 + $0x1c] sm:$0xf] }
 0x270   : > { %2660 = vmatpush.bf16.msra.mxu0 %v4782_v19  ;;  %v5856_v19 = vld [vmem:[#allocation7 + $0xf8] sm:$0xf0] }
 0x271   : > { %v2037_v24 = vmul.f32 %v6037_v13, %v2036_v20  ;;  %v2000_v26 = vadd.f32 %v1999_v22, %v1998_v17  ;;  %v5009_v17 = vld [vmem:[#allocation7 + $0x210] sm:$0xf]  ;;  %v5892_v20 = vld [vmem:[#allocation7 + $0x218] sm:$0xf0]  ;;  %v5862_v22 = vld [vmem:[#allocation7 + $0x128] sm:$0xf0] }
 0x273   : > { %v2038_v27 = vadd.f32 %v6037_v13, %v2037_v24  ;;  %6038 = vrcp.f32 %v2000_v26  ;;  %v2012_v46 = vand.u32 2147483648, %v2000_v26  ;;  %vm2006_vm8 = vweird.f32 %v2000_v26 }
 0x274   : > { %v4822_v24 = vor.u32 %v5843_v29, %v4819_v15  ;;  %v4750_v29 = vor.u32 %v5825_v11, %v4747_v12  ;;  %v4873_v12 = vld [vmem:[#allocation7 + $0xf8] sm:$0xf] }
 0x275   : > { %v2042_v30 = vsel %vm2041_vm5, %v6037_v13, %v2038_v27  ;;  %v2013_v57 = vor.u32 1.1754944e-38, %v2012_v46  ;;  %v4834_v13 = vor.u32 %v5846_v62, %v4831_v9  ;;  %v5010_v27 = vor.u32 %v5892_v20, %v5009_v17  ;;  %v5886_v46 = vld [vmem:[#allocation7 + $0x1e8] sm:$0xf0]  ;;  %v4771_v9 = vld [vmem:[#allocation7 + $0x3c] sm:$0xf0] }
 0x276   : > { %v2047_v31 = vsel %vm2044_vm6, %v2046_v28, %v2042_v30  ;;  %v4997_v28 = vld [vmem:[#allocation7 + $0x1f8] sm:$0xf]  ;;  %v4890_v30 = vor.u32 %v5862_v22, %v4889_v21  ;;  %v4930_v62 = vor.u32 %v5870_v54, %v4927_v55  ;;  %v5869_v17 = vld [vmem:[#allocation7 + $0x160] sm:$0xf0]  ;;  %v4961_v20 = vld [vmem:[#allocation7 + $0x1b0] sm:$0xf]  ;;  %v4866_v21 = vor.u32 %v5856_v19, %v4865_v18 }
 0x277   : > { %v2048_v32 = vmul.f32 %v6414_v39, %v2047_v31  ;;  %v2010_v39 = vand.u32 2147483647, %v2000_v26  ;;  %v5880_v22 = vld [vmem:[#allocation7 + $0x1b8] sm:$0xf0]  ;;  %v5894_v54 = vld [vmem:[#allocation7 + $0x22c] sm:$0xf] }
 0x278   : > { %2673 = vmatpush.bf16.msrb.mxu1 %v4890_v30  ;;  %v5023_v55 = vld [vmem:[#allocation7 + $0x234] sm:$0xf0]  ;;  %v4813_v18 = vld [vmem:[#allocation7 + $0x80] sm:$0xf]  ;;  %v5842_v19 = vld [vmem:[#allocation7 + $0x88] sm:$0xf0] }
 0x279   : > { %v6433_v33 = vpack.c.bf16 %v2048_v32, %v2048_v32  ;;  %v6039_v36 = vpop.eup %6038  ;;  %vm2011_vm10 = vcmp.eq.f32.partialorder %v2010_v39, 8.507059e+37  ;;  %v5889_v32 = vld [vmem:[#allocation7 + $0x200] sm:$0xf0]  ;;  %v5826_v39 = vld [vmem:[#allocation7 + $0x8] sm:$0xf0] }
 0x27a   : > { %v2002_v41 = vmul.f32 %v6039_v36, %v2000_v26  ;;  %vm2007_vm7 = vweird.f32 %v6039_v36  ;;  %v4807_v26 = vld [vmem:[#allocation7 + $0x84] sm:$0xf0]  ;;  %v4998_v42 = vor.u32 %v5889_v32, %v4997_v28  ;;  %v4853_v28 = vld [vmem:[#allocation7 + $0xd8] sm:$0xf] }
 0x27b   : > { %4740 = vmatmul.msk.bf16.vlgmr.msra.gmra.mxu1 %vm1983_vm1, %v6433_v33  ;;  %vm2008_vm9 = vmor %vm2006_vm8, %vm2007_vm7  ;;  %v4810_v38 = vor.u32 %v5840_v25, %v4807_v26  ;;  %v4909_v26 = vld [vmem:[#allocation7 + $0x140] sm:$0xf]  ;;  %v4949_v32 = vld [vmem:[#allocation7 + $0x198] sm:$0xf] }
 0x27c   : > { %v2003_v43 = vsub.f32 1.0, %v2002_v41  ;;  %v4795_v41 = vld [vmem:[#allocation7 + $0x6c] sm:$0xf0] }
 0x27d   : > { %v4798_v50 = vor.u32 %v5837_v40, %v4795_v41  ;;  %v4897_v40 = vld [vmem:[#allocation7 + $0x128] sm:$0xf] }
 0x27e   : > { %v2004_v48 = vmul.f32 %v6039_v36, %v2003_v43  ;;  %v4878_v43 = vor.u32 %v5859_v35, %v4877_v34  ;;  %v5877_v34 = vld [vmem:[#allocation7 + $0x1a0] sm:$0xf0] }
 0x280   : > { %v2005_v53 = vadd.f32 %v6039_v36, %v2004_v48  ;;  %v4745_v48 = vld [vmem:[#allocation7] sm:$0xf]  ;;  %2674 = vmatpush.bf16.msrb.mxu1 %v4878_v43 }
 0x281   : > { %v4746_v56 = vor.u32 %v5826_v39, %v4745_v48  ;;  %v5874_v39 = vld [vmem:[#allocation7 + $0x188] sm:$0xf0] }
 0x282   : > { %v2009_v61 = vsel %vm2008_vm9, %v6039_v36, %v2005_v53  ;;  %v4757_v36 = vld [vmem:[#allocation7 + $0x18] sm:$0xf]  ;;  %v4986_v53 = vor.u32 %v5886_v46, %v4985_v45  ;;  %v5850_v45 = vld [vmem:[#allocation7 + $0xc8] sm:$0xf0]  ;;  %v4937_v46 = vld [vmem:[#allocation7 + $0x180] sm:$0xf] }
 0x283   : > { %v2014_v0 = vsel %vm2011_vm10, %v2013_v57, %v2009_v61  ;;  %v4758_v44 = vor.u32 %v5829_v37, %v4757_v36  ;;  %v4973_v57 = vld [vmem:[#allocation7 + $0x1c8] sm:$0xf]  ;;  %v5831_v61 = vld [vmem:[#allocation7 + $0x34] sm:$0xf]  ;;  %v4950_v36 = vor.u32 %v5877_v34, %v4949_v32  ;;  %v5861_v37 = vld [vmem:[#allocation7 + $0x124] sm:$0xf]  ;;  %v4938_v52 = vor.u32 %v5874_v39, %v4937_v46 }
 0x284   : > { %v2015_v8 = vmul.f32 %v6425_v4, %v2014_v0  ;;  %v4769_v4 = vld [vmem:[#allocation7 + $0x30] sm:$0xf]  ;;  %v4974_v63 = vor.u32 %v5883_v59, %v4973_v57  ;;  %v5867_v0 = vld [vmem:[#allocation7 + $0x154] sm:$0xf]  ;;  %v4774_v2 = vor.u32 %v5831_v61, %v4771_v9  ;;  %2675 = vmatpush.bf16.msrb.mxu1 %v4866_v21  ;;  %v5026_v57 = vor.u32 %v5894_v54, %v5023_v55  ;;  %v5848_v59 = vld [vmem:[#allocation7 + $0xb8] sm:$0xf0] }
 0x285   : > { %v4770_v31 = vor.u32 %v5832_v23, %v4769_v4  ;;  %v4918_v6 = vor.u32 %v5867_v0, %v4915_v1  ;;  %v5864_v4 = vld [vmem:[#allocation7 + $0x13c] sm:$0xf]  ;;  %v4903_v23 = vld [vmem:[#allocation7 + $0x144] sm:$0xf0]  ;;  %v4867_v0 = vld [vmem:[#allocation7 + $0xfc] sm:$0xf0]  ;;  %v4814_v21 = vor.u32 %v5842_v19, %v4813_v18 }
 0x286   : > { %v2016_v14 = vpack.c.bf16 %v2015_v8, %v2015_v8  ;;  %v4759_v8 = vld [vmem:[#allocation7 + $0x24] sm:$0xf0]  ;;  %v4906_v25 = vor.u32 %v5864_v4, %v4903_v23  ;;  %v5860_v61 = vld [vmem:[#allocation7 + $0x118] sm:$0xf0]  ;;  %v5891_v1 = vld [vmem:[#allocation7 + $0x214] sm:$0xf] }
 0x287   : > { %2661 = vmatpush.bf16.msra.mxu0 %v4770_v31  ;;  %v4762_v10 = vor.u32 %v5828_v7, %v4759_v8  ;;  %v5853_v31 = vld [vmem:[#allocation7 + $0xe0] sm:$0xf0]  ;;  %v4825_v7 = vld [vmem:[#allocation7 + $0x98] sm:$0xf]  ;;  %v5854_v4 = vld [vmem:[#allocation7 + $0xe8] sm:$0xf0] }
 0x288   : > { %4737 = vmatmul.msk.bf16.vlgmr.msra.gmra.mxu2 %vm1983_vm1, %v2016_v14  ;;  %4738 = vmatmul.msk.bf16.vlgmr.msrb.gmra.mxu3 %vm1983_vm1, %v2016_v14  ;;  %v4854_v35 = vor.u32 %v5853_v31, %v4853_v28  ;;  %v5845_v8 = vld [vmem:[#allocation7 + $0xa0] sm:$0xf0]  ;;  %v4987_v28 = vld [vmem:[#allocation7 + $0x1ec] sm:$0xf0]  ;;  %v5839_v31 = vld [vmem:[#allocation7 + $0x70] sm:$0xf0] }
 0x289   : > { %4739 = vmatmul.msk.bf16.vlgmr.msrb.gmra.mxu0 %vm1983_vm1, %v2016_v14  ;;  %2698 = vmatpush.bf16.msrb.mxu3 %v4834_v13  ;;  %v4933_v13 = vld [vmem:[#allocation7 + $0x170] sm:$0xf]  ;;  %v5872_v14 = vld [vmem:[#allocation7 + $0x178] sm:$0xf0]  ;;  %v4826_v11 = vor.u32 %v5845_v8, %v4825_v7  ;;  %v4963_v46 = vld [vmem:[#allocation7 + $0x1bc] sm:$0xf0] }
 0x28a   : > { %2684 = vmatpush.bf16.msra.mxu2 %v5022_v16  ;;  %v4934_v15 = vor.u32 %v5872_v14, %v4933_v13  ;;  %v4921_v16 = vld [vmem:[#allocation7 + $0x158] sm:$0xf]  ;;  %2676 = vmatpush.bf16.msrb.mxu1 %v4854_v35  ;;  %v5857_v13 = vld [vmem:[#allocation7 + $0x100] sm:$0xf0]  ;;  %v4849_v35 = vld [vmem:[#allocation7 + $0xc8] sm:$0xf] }
 0x28b   : > { %2662 = vmatpush.bf16.msra.mxu0 %v4758_v44  ;;  %v4841_v44 = vld [vmem:[#allocation7 + $0xc0] sm:$0xf]  ;;  %v4874_v14 = vor.u32 %v5857_v13, %v4873_v12  ;;  %v4951_v54 = vld [vmem:[#allocation7 + $0x1a4] sm:$0xf0]  ;;  %v5896_v7 = vld [vmem:[#allocation7 + $0x238] sm:$0xf0] }
 0x28c   : > { %v4842_v48 = vor.u32 %v5850_v45, %v4841_v44  ;;  %v5879_v45 = vld [vmem:[#allocation7 + $0x1b4] sm:$0xf]  ;;  %v4765_v55 = vld [vmem:[#allocation7 + $0x20] sm:$0xf]  ;;  %v5309_v8 = vld [vmem:[#allocation6 + $0x228] sm:$0xf] }
 0x28d   : > { %2699 = vmatpush.bf16.msrb.mxu3 %v4822_v24  ;;  %v4962_v24 = vor.u32 %v5880_v22, %v4961_v20  ;;  %v4861_v22 = vld [vmem:[#allocation7 + $0xe0] sm:$0xf]  ;;  %v4966_v39 = vor.u32 %v5879_v45, %v4963_v46 }
 0x28e   : > { %2685 = vmatpush.bf16.msra.mxu2 %v5010_v27  ;;  %v5866_v27 = vld [vmem:[#allocation7 + $0x148] sm:$0xf0]  ;;  %2677 = vmatpush.bf16.msrb.mxu1 %v4842_v48  ;;  %v4862_v23 = vor.u32 %v5854_v4, %v4861_v22  ;;  %v4777_v48 = vld [vmem:[#allocation7 + $0x38] sm:$0xf] }
 0x28f   : > { %2663 = vmatpush.bf16.msra.mxu0 %v4746_v56  ;;  %v4910_v30 = vor.u32 %v5866_v27, %v4909_v26  ;;  %v4837_v56 = vld [vmem:[#allocation7 + $0xb0] sm:$0xf]  ;;  %v5885_v26 = vld [vmem:[#allocation7 + $0x1e4] sm:$0xf]  ;;  %v5890_v22 = vld [vmem:[#allocation7 + $0x208] sm:$0xf0] }
 0x290   : > { %v4990_v32 = vor.u32 %v5885_v26, %v4987_v28  ;;  %v5285_v4 = vld [vmem:[#allocation6 + $0x1f8] sm:$0xf]  ;;  %v4993_v28 = vld [vmem:[#allocation7 + $0x1e8] sm:$0xf] }
 0x291   : > { %2700 = vmatpush.bf16.msrb.mxu3 %v4810_v38  ;;  %v4891_v38 = vld [vmem:[#allocation7 + $0x12c] sm:$0xf0] }
 0x292   : > { %2686 = vmatpush.bf16.msra.mxu2 %v4998_v42  ;;  %v4894_v41 = vor.u32 %v5861_v37, %v4891_v38  ;;  %v5863_v42 = vld [vmem:[#allocation7 + $0x130] sm:$0xf0]  ;;  %2726 = vmatpush.bf16.msra.mxu1 %v5026_v57  ;;  %v5882_v38 = vld [vmem:[#allocation7 + $0x1cc] sm:$0xf] }
 0x293   : > { %2712 = vmatpush.bf16.msrb.mxu0 %v4930_v62  ;;  %v4898_v43 = vor.u32 %v5863_v42, %v4897_v40  ;;  %v4838_v62 = vor.u32 %v5848_v59, %v4837_v56  ;;  %v4975_v40 = vld [vmem:[#allocation7 + $0x1d4] sm:$0xf0]  ;;  %v5830_v57 = vld [vmem:[#allocation7 + $0x28] sm:$0xf0] }
 0x294   : > { %v4978_v42 = vor.u32 %v5882_v38, %v4975_v40  ;;  %v4766_v59 = vor.u32 %v5830_v57, %v4765_v55  ;;  %v5117_v38 = vld [vmem:[#allocation6 + $0xa8] sm:$0xf]  ;;  %v5775_v40 = vld [vmem:[#allocation6 + $0xb0] sm:$0xf0]  ;;  %v5772_v57 = vld [vmem:[#allocation6 + $0x98] sm:$0xf0] }
 0x295   : > { %2701 = vmatpush.bf16.msrb.mxu3 %v4798_v50  ;;  %v5858_v50 = vld [vmem:[#allocation7 + $0x10c] sm:$0xf] }
 0x296   : > { %2687 = vmatpush.bf16.msra.mxu2 %v4986_v53  ;;  %v4882_v53 = vor.u32 %v5858_v50, %v4879_v51  ;;  %v5833_v50 = vld [vmem:[#allocation7 + $0x40] sm:$0xf0] }
 0x297   : > { %2713 = vmatpush.bf16.msrb.mxu0 %v4918_v6  ;;  %v5011_v6 = vld [vmem:[#allocation7 + $0x21c] sm:$0xf0]  ;;  %v4778_v51 = vor.u32 %v5833_v50, %v4777_v48 }
 0x298   : > { %4741 = vmatmul.msk.bf16.vlgmr.msrb.gmra.mxu2 %vm1983_vm1, %v6433_v33  ;;  %4742 = vmatmul.msk.bf16.vlgmr.msra.gmra.mxu3 %vm1983_vm1, %v6433_v33  ;;  %v4922_v33 = vor.u32 %v5869_v17, %v4921_v16  ;;  %v5888_v16 = vld [vmem:[#allocation7 + $0x1fc] sm:$0xf] }
 0x299   : > { %2702 = vmatpush.bf16.msrb.mxu3 %v4786_v60  ;;  %v4885_v60 = vld [vmem:[#allocation7 + $0x110] sm:$0xf] }
 0x29a   : > { %2688 = vmatpush.bf16.msra.mxu2 %v4974_v63  ;;  %v4886_v9 = vor.u32 %v5860_v61, %v4885_v60  ;;  %v5855_v63 = vld [vmem:[#allocation7 + $0xf4] sm:$0xf]  ;;  %v5873_v60 = vld [vmem:[#allocation7 + $0x184] sm:$0xf]  ;;  %v4939_v61 = vld [vmem:[#allocation7 + $0x18c] sm:$0xf0] }
 0x29b   : > { %2714 = vmatpush.bf16.msrb.mxu0 %v4906_v25  ;;  %v4843_v25 = vld [vmem:[#allocation7 + $0xcc] sm:$0xf0] }
 0x29d   : > { %2703 = vmatpush.bf16.msrb.mxu3 %v4774_v2  ;;  %v4870_v2 = vor.u32 %v5855_v63, %v4867_v0  ;;  %v5827_v63 = vld [vmem:[#allocation7 + $0x10] sm:$0xf0] }
 0x29e   : > { %2689 = vmatpush.bf16.msra.mxu2 %v4962_v24  ;;  %v5849_v24 = vld [vmem:[#allocation7 + $0xc4] sm:$0xf] }
 0x29f   : > { %2715 = vmatpush.bf16.msrb.mxu0 %v4894_v41  ;;  %v4846_v27 = vor.u32 %v5849_v24, %v4843_v25  ;;  %v4789_v41 = vld [vmem:[#allocation7 + $0x50] sm:$0xf] }
 0x2a1   : > { %2704 = vmatpush.bf16.msrb.mxu3 %v4762_v10  ;;  %v5014_v10 = vor.u32 %v5891_v1, %v5011_v6  ;;  %v5029_v6 = vld [vmem:[#allocation7 + $0x230] sm:$0xf] }
 0x2a2   : > { %2690 = vmatpush.bf16.msra.mxu2 %v4950_v36  ;;  %v5851_v36 = vld [vmem:[#allocation7 + $0xd0] sm:$0xf0]  ;;  %v5030_v13 = vor.u32 %v5896_v7, %v5029_v6  ;;  %v5093_v7 = vld [vmem:[#allocation6 + $0x78] sm:$0xf] }
 0x2a3   : > { %2716 = vmatpush.bf16.msrb.mxu0 %v4882_v53  ;;  %2727 = vmatpush.bf16.msra.mxu1 %v5014_v10  ;;  %v4850_v37 = vor.u32 %v5851_v36, %v4849_v35  ;;  %v5876_v53 = vld [vmem:[#allocation7 + $0x19c] sm:$0xf]  ;;  %v5823_v10 = vld [vmem:[#allocation6 + $0x230] sm:$0xf0]  ;;  %v4981_v36 = vld [vmem:[#allocation7 + $0x1d0] sm:$0xf] }
 0x2a4   : > { %v4954_v56 = vor.u32 %v5876_v53, %v4951_v54  ;;  %v5881_v53 = vld [vmem:[#allocation7 + $0x1c0] sm:$0xf0] }
 0x2a5   : > { %2705 = vmatpush.bf16.msrb.mxu3 %v4750_v29  ;;  %v5852_v29 = vld [vmem:[#allocation7 + $0xdc] sm:$0xf] }
 0x2a6   : > { %2691 = vmatpush.bf16.msra.mxu2 %v4938_v52 }
 0x2a7   : > { %2717 = vmatpush.bf16.msrb.mxu0 %v4870_v2 }
 0x2a9   : > { %2754 = vmatpush.bf16.msra.mxu3 %v4934_v15  ;;  %v4855_v15 = vld [vmem:[#allocation7 + $0xe4] sm:$0xf0] }
 0x2aa   : > { %2740 = vmatpush.bf16.msrb.mxu2 %v4838_v62  ;;  %v4858_v17 = vor.u32 %v5852_v29, %v4855_v15  ;;  %v4753_v62 = vld [vmem:[#allocation7 + $0x8] sm:$0xf]  ;;  %v5017_v29 = vld [vmem:[#allocation7 + $0x218] sm:$0xf] }
 0x2ab   : > { %v4754_v0 = vor.u32 %v5827_v63, %v4753_v62  ;;  %v5808_v62 = vld [vmem:[#allocation6 + $0x1b8] sm:$0xf0] }
 0x2ac   : > { %2718 = vmatpush.bf16.msrb.mxu0 %v4858_v17  ;;  %v5297_v17 = vld [vmem:[#allocation6 + $0x210] sm:$0xf] }
 0x2ad   : > { %2755 = vmatpush.bf16.msra.mxu3 %v4922_v33  ;;  %v4999_v33 = vld [vmem:[#allocation7 + $0x204] sm:$0xf0] }
 0x2ae   : > { %2741 = vmatpush.bf16.msrb.mxu2 %v4826_v11  ;;  %v5002_v20 = vor.u32 %v5888_v16, %v4999_v33  ;;  %v5893_v16 = vld [vmem:[#allocation7 + $0x220] sm:$0xf0]  ;;  %v5820_v33 = vld [vmem:[#allocation6 + $0x218] sm:$0xf0] }
 0x2af   : > { %v5018_v19 = vor.u32 %v5893_v16, %v5017_v29 }
 0x2b0   : > { %2728 = vmatpush.bf16.msra.mxu1 %v5002_v20  ;;  %2719 = vmatpush.bf16.msrb.mxu0 %v4846_v27  ;;  %v5298_v20 = vor.u32 %v5820_v33, %v5297_v17  ;;  %v4945_v33 = vld [vmem:[#allocation7 + $0x188] sm:$0xf] }
 0x2b1   : > { %2756 = vmatpush.bf16.msra.mxu3 %v4910_v30  ;;  %v4801_v30 = vld [vmem:[#allocation7 + $0x68] sm:$0xf] }
 0x2b2   : > { %2742 = vmatpush.bf16.msrb.mxu2 %v4814_v21  ;;  %v4802_v34 = vor.u32 %v5839_v31, %v4801_v30  ;;  %v5005_v21 = vld [vmem:[#allocation7 + $0x200] sm:$0xf]  ;;  %v5887_v30 = vld [vmem:[#allocation7 + $0x1f0] sm:$0xf0] }
 0x2b3   : > { %v5006_v26 = vor.u32 %v5890_v22, %v5005_v21  ;;  %v5273_v31 = vld [vmem:[#allocation6 + $0x1e0] sm:$0xf]  ;;  %v5766_v22 = vld [vmem:[#allocation6 + $0x68] sm:$0xf0] }
 0x2b4   : > { %2729 = vmatpush.bf16.msra.mxu1 %v4990_v32  ;;  %v5814_v32 = vld [vmem:[#allocation6 + $0x1e8] sm:$0xf0] }
 0x2b5   : > { %2757 = vmatpush.bf16.msra.mxu3 %v4898_v43  ;;  %v5836_v43 = vld [vmem:[#allocation7 + $0x58] sm:$0xf0]  ;;  %v5274_v35 = vor.u32 %v5814_v32, %v5273_v31 }
 0x2b6   : > { %2743 = vmatpush.bf16.msrb.mxu2 %v4802_v34  ;;  %v4790_v44 = vor.u32 %v5836_v43, %v4789_v41  ;;  %v4994_v34 = vor.u32 %v5887_v30, %v4993_v28  ;;  %v5213_v41 = vld [vmem:[#allocation6 + $0x168] sm:$0xf]  ;;  %v5125_v28 = vld [vmem:[#allocation6 + $0xb0] sm:$0xf]  ;;  %v5776_v30 = vld [vmem:[#allocation6 + $0xb8] sm:$0xf0] }
 0x2b7   : > { %v5261_v43 = vld [vmem:[#allocation6 + $0x1c8] sm:$0xf] }
 0x2b8   : > { %2730 = vmatpush.bf16.msra.mxu1 %v4978_v42  ;;  %v5799_v42 = vld [vmem:[#allocation6 + $0x170] sm:$0xf0] }
 0x2b9   : > { %2758 = vmatpush.bf16.msra.mxu3 %v4886_v9  ;;  %v4942_v9 = vor.u32 %v5873_v60, %v4939_v61  ;;  %v5214_v54 = vor.u32 %v5799_v42, %v5213_v41  ;;  %v5796_v60 = vld [vmem:[#allocation6 + $0x158] sm:$0xf0]  ;;  %v5249_v61 = vld [vmem:[#allocation6 + $0x1b0] sm:$0xf]  ;;  %v5165_v41 = vld [vmem:[#allocation6 + $0x108] sm:$0xf] }
 0x2ba   : > { %2744 = vmatpush.bf16.msrb.mxu2 %v4790_v44  ;;  %v5811_v44 = vld [vmem:[#allocation6 + $0x1d0] sm:$0xf0]  ;;  %v5250_v6 = vor.u32 %v5808_v62, %v5249_v61  ;;  %v5770_v61 = vld [vmem:[#allocation6 + $0x88] sm:$0xf0] }
 0x2bb   : > { %v5262_v55 = vor.u32 %v5811_v44, %v5261_v43  ;;  %v5787_v42 = vld [vmem:[#allocation6 + $0x110] sm:$0xf0]  ;;  %v5107_v44 = vld [vmem:[#allocation6 + $0x9c] sm:$0xf0] }
 0x2bc   : > { %2731 = vmatpush.bf16.msra.mxu1 %v4966_v39  ;;  %v5771_v43 = vld [vmem:[#allocation6 + $0x94] sm:$0xf] }
 0x2bd   : > { %2759 = vmatpush.bf16.msra.mxu3 %v4874_v14  ;;  %v5310_v14 = vor.u32 %v5823_v10, %v5309_v8  ;;  %v5769_v8 = vld [vmem:[#allocation6 + $0x80] sm:$0xf0]  ;;  %v5189_v10 = vld [vmem:[#allocation6 + $0x138] sm:$0xf] }
 0x2be   : > { %2745 = vmatpush.bf16.msrb.mxu2 %v4778_v51  ;;  %v5118_v51 = vor.u32 %v5775_v40, %v5117_v38  ;;  %v5094_v17 = vor.u32 %v5769_v8, %v5093_v7  ;;  %v5126_v40 = vor.u32 %v5776_v30, %v5125_v28  ;;  %v5781_v7 = vld [vmem:[#allocation6 + $0xe0] sm:$0xf0]  ;;  %v5083_v8 = vld [vmem:[#allocation6 + $0x6c] sm:$0xf0] }
 0x2c0   : > { %2732 = vmatpush.bf16.msra.mxu1 %v4954_v56  ;;  %v5105_v56 = vld [vmem:[#allocation6 + $0x90] sm:$0xf] }
 0x2c1   : > { %2760 = vmatpush.bf16.msra.mxu3 %v4862_v23  ;;  %v5817_v23 = vld [vmem:[#allocation6 + $0x200] sm:$0xf0]  ;;  %v5106_v63 = vor.u32 %v5772_v57, %v5105_v56  ;;  %v5784_v56 = vld [vmem:[#allocation6 + $0xf8] sm:$0xf0] }
 0x2c2   : > { %2746 = vmatpush.bf16.msrb.mxu2 %v4766_v59  ;;  %v5286_v27 = vor.u32 %v5817_v23, %v5285_v4  ;;  %v5201_v59 = vld [vmem:[#allocation6 + $0x150] sm:$0xf]  ;;  %v5177_v4 = vld [vmem:[#allocation6 + $0x120] sm:$0xf]  ;;  %v5790_v23 = vld [vmem:[#allocation6 + $0x128] sm:$0xf0] }
 0x2c3   : > { %v5768_v57 = vld [vmem:[#allocation6 + $0x7c] sm:$0xf] }
 0x2c4   : > { %2733 = vmatpush.bf16.msra.mxu1 %v4942_v9 }
 0x2c5   : > { %2761 = vmatpush.bf16.msra.mxu3 %v4850_v37  ;;  %v5884_v37 = vld [vmem:[#allocation7 + $0x1d8] sm:$0xf0] }
 0x2c6   : > { %2747 = vmatpush.bf16.msrb.mxu2 %v4754_v0  ;;  %v4982_v50 = vor.u32 %v5884_v37, %v4981_v36  ;;  %v4957_v0 = vld [vmem:[#allocation7 + $0x1a0] sm:$0xf]  ;;  %v5069_v36 = vld [vmem:[#allocation6 + $0x48] sm:$0xf]  ;;  %v5763_v37 = vld [vmem:[#allocation6 + $0x50] sm:$0xf0] }
 0x2f8   : > { %v2143_v52 = vpop.f32.mrf.mxu1 }
 0x300   : > { %v2145_v1 = vpop.f32.mrf.mxu1 }
 0x301   : > { %v5878_v1 = vld [vmem:[#allocation7 + $0x1a8] sm:$0xf0] }
 0x302   : > { %v4958_v16 = vor.u32 %v5878_v1, %v4957_v0  ;;  %v5757_v0 = vld [vmem:[#allocation6 + $0x20] sm:$0xf0] }
 0x306   : > { %v2110_v2 = vpop.f32.mrf.mxu0 }
 0x30b   : > { %v2084_v11 = vpop.f32.mrf.mxu2  ;;  %v2097_v12 = vpop.f32.mrf.mxu3 }
 0x30c   : > { %v6445_v15 = vpack.c.bf16 %v2143_v52, %v2084_v11  ;;  %v4969_v52 = vld [vmem:[#allocation7 + $0x1b8] sm:$0xf]  ;;  %v5793_v11 = vld [vmem:[#allocation6 + $0x140] sm:$0xf0] }
 0x30d   : > { %v4970_v9 = vor.u32 %v5881_v53, %v4969_v52  ;;  %v5760_v52 = vld [vmem:[#allocation6 + $0x38] sm:$0xf0]  ;;  %v5110_v53 = vor.u32 %v5771_v43, %v5107_v44 }
 0x30e   : > { %v2112_v18 = vpop.f32.mrf.mxu0  ;;  %2664 = vmatmul.bf16.vlgmr.msra.gmra.mxu0 %v6445_v15  ;;  %2706 = vmatmul.bf16.vlgmr.msrb.gmra.mxu3 %v6445_v15 }
 0x30f   : > { %2768 = vmatpush.bf16.msra.mxu0 %v5030_v13  ;;  %3194 = vmatpush.bf16.msrb.mxu3 %v5310_v14  ;;  %v5805_v13 = vld [vmem:[#allocation6 + $0x1a0] sm:$0xf0]  ;;  %v5875_v18 = vld [vmem:[#allocation7 + $0x190] sm:$0xf0] }
 0x310   : > { %v4946_v31 = vor.u32 %v5875_v18, %v4945_v33  ;;  %v5762_v18 = vld [vmem:[#allocation6 + $0x4c] sm:$0xf] }
 0x313   : > { %2769 = vmatpush.bf16.msra.mxu0 %v5018_v19  ;;  %3195 = vmatpush.bf16.msrb.mxu3 %v5298_v20  ;;  %v2086_v24 = vpop.f32.mrf.mxu2  ;;  %v2099_v25 = vpop.f32.mrf.mxu3  ;;  %v5081_v19 = vld [vmem:[#allocation6 + $0x60] sm:$0xf]  ;;  %v5190_v20 = vor.u32 %v5793_v11, %v5189_v10  ;;  %v5089_v10 = vld [vmem:[#allocation6 + $0x68] sm:$0xf]  ;;  %v5767_v11 = vld [vmem:[#allocation6 + $0x70] sm:$0xf0] }
 0x314   : > { %v5225_v24 = vld [vmem:[#allocation6 + $0x180] sm:$0xf]  ;;  %v5802_v25 = vld [vmem:[#allocation6 + $0x188] sm:$0xf0]  ;;  %v5082_v32 = vor.u32 %v5766_v22, %v5081_v19  ;;  %v5090_v33 = vor.u32 %v5767_v11, %v5089_v10 }
 0x315   : > { %v5798_v19 = vld [vmem:[#allocation6 + $0x16c] sm:$0xf] }
 0x316   : > { %v5822_v22 = vld [vmem:[#allocation6 + $0x22c] sm:$0xf] }
 0x317   : > { %2770 = vmatpush.bf16.msra.mxu0 %v5006_v26  ;;  %3196 = vmatpush.bf16.msrb.mxu3 %v5286_v27  ;;  %v5774_v26 = vld [vmem:[#allocation6 + $0xac] sm:$0xf]  ;;  %v5119_v27 = vld [vmem:[#allocation6 + $0xb4] sm:$0xf0] }
 0x318   : > { %v5122_v38 = vor.u32 %v5774_v26, %v5119_v27 }
 0x31b   : > { %2771 = vmatpush.bf16.msra.mxu0 %v4994_v34  ;;  %3197 = vmatpush.bf16.msrb.mxu3 %v5274_v35  ;;  %v2156_v45 = vpop.f32.mrf.mxu2  ;;  %v2169_v46 = vpop.f32.mrf.mxu3  ;;  %v5178_v34 = vor.u32 %v5790_v23, %v5177_v4  ;;  %v5226_v35 = vor.u32 %v5802_v25, %v5225_v24  ;;  %v5311_v4 = vld [vmem:[#allocation6 + $0x234] sm:$0xf0]  ;;  %v5077_v24 = vld [vmem:[#allocation6 + $0x50] sm:$0xf]  ;;  %v5764_v25 = vld [vmem:[#allocation6 + $0x58] sm:$0xf0] }
 0x31c   : > { %v2270_v48 = vpack.c.bf16 %v2156_v45, %v2097_v12  ;;  %v6449_v39 = vpack.c.bf16 %v2169_v46, %v2110_v2  ;;  %v5202_v2 = vor.u32 %v5796_v60, %v5201_v59  ;;  %v5237_v12 = vld [vmem:[#allocation6 + $0x198] sm:$0xf]  ;;  %v5773_v46 = vld [vmem:[#allocation6 + $0xa0] sm:$0xf0]  ;;  %v5095_v59 = vld [vmem:[#allocation6 + $0x84] sm:$0xf0]  ;;  %v5314_v30 = vor.u32 %v5822_v22, %v5311_v4 }
 0x31d   : > { %v5238_v21 = vor.u32 %v5805_v13, %v5237_v12  ;;  %v5113_v45 = vld [vmem:[#allocation6 + $0x98] sm:$0xf]  ;;  %v5101_v60 = vld [vmem:[#allocation6 + $0x80] sm:$0xf]  ;;  %v5098_v1 = vor.u32 %v5768_v57, %v5095_v59  ;;  %v5753_v57 = vld [vmem:[#allocation6 + $0x4] sm:$0xf] }
 0x31e   : > { %2678 = vmatmul.bf16.vlgmr.msrb.gmra.mxu1 %v2270_v48  ;;  %2692 = vmatmul.bf16.vlgmr.msra.gmra.mxu2 %v6449_v39  ;;  %v5033_v12 = vld [vmem:[#allocation6] sm:$0xf]  ;;  %v5807_v4 = vld [vmem:[#allocation6 + $0x1b4] sm:$0xf] }
 0x31f   : > { %2720 = vmatmul.bf16.vlgmr.msrb.gmra.mxu0 %v2270_v48  ;;  %2762 = vmatmul.bf16.vlgmr.msra.gmra.mxu3 %v2270_v48  ;;  %v5070_v48 = vor.u32 %v5763_v37, %v5069_v36  ;;  %v5059_v36 = vld [vmem:[#allocation6 + $0x3c] sm:$0xf0]  ;;  %v5819_v37 = vld [vmem:[#allocation6 + $0x214] sm:$0xf] }
 0x320   : > { %2772 = vmatpush.bf16.msra.mxu0 %v4982_v50  ;;  %3166 = vmatpush.bf16.msrb.mxu1 %v5118_v51  ;;  %v5166_v50 = vor.u32 %v5787_v42, %v5165_v41  ;;  %v5057_v51 = vld [vmem:[#allocation6 + $0x30] sm:$0xf]  ;;  %v5761_v41 = vld [vmem:[#allocation6 + $0x40] sm:$0xf0] }
 0x321   : > { %3180 = vmatpush.bf16.msra.mxu2 %v5214_v54  ;;  %3198 = vmatpush.bf16.msrb.mxu3 %v5262_v55  ;;  %v5114_v54 = vor.u32 %v5773_v46, %v5113_v45  ;;  %v5153_v55 = vld [vmem:[#allocation6 + $0xf0] sm:$0xf]  ;;  %v5058_v62 = vor.u32 %v5760_v52, %v5057_v51  ;;  %v5756_v45 = vld [vmem:[#allocation6 + $0x1c] sm:$0xf]  ;;  %v5047_v51 = vld [vmem:[#allocation6 + $0x24] sm:$0xf0] }
 0x322   : > { %v5792_v46 = vld [vmem:[#allocation6 + $0x13c] sm:$0xf]  ;;  %v5050_v59 = vor.u32 %v5756_v45, %v5047_v51 }
 0x323   : > { %v2158_v14 = vpop.f32.mrf.mxu2  ;;  %v2171_v29 = vpop.f32.mrf.mxu3  ;;  %v5816_v52 = vld [vmem:[#allocation6 + $0x1fc] sm:$0xf] }
 0x324   : > { %2773 = vmatpush.bf16.msra.mxu0 %v4970_v9  ;;  %3167 = vmatpush.bf16.msrb.mxu1 %v5106_v63  ;;  %v5154_v9 = vor.u32 %v5784_v56, %v5153_v55  ;;  %v5045_v63 = vld [vmem:[#allocation6 + $0x18] sm:$0xf]  ;;  %v5754_v14 = vld [vmem:[#allocation6 + $0x8] sm:$0xf0]  ;;  %v5129_v29 = vld [vmem:[#allocation6 + $0xc0] sm:$0xf] }
 0x325   : > { %3181 = vmatpush.bf16.msra.mxu2 %v5202_v2  ;;  %3199 = vmatpush.bf16.msrb.mxu3 %v5250_v6  ;;  %v5102_v2 = vor.u32 %v5770_v61, %v5101_v60  ;;  %v5141_v6 = vld [vmem:[#allocation6 + $0xd8] sm:$0xf]  ;;  %v5034_v23 = vor.u32 %v5754_v14, %v5033_v12  ;;  %v5758_v55 = vld [vmem:[#allocation6 + $0x28] sm:$0xf0]  ;;  %v5035_v61 = vld [vmem:[#allocation6 + $0xc] sm:$0xf0] }
 0x326   : > { %v5142_v13 = vor.u32 %v5781_v7, %v5141_v6  ;;  %v5755_v6 = vld [vmem:[#allocation6 + $0x10] sm:$0xf0]  ;;  %v5221_v7 = vld [vmem:[#allocation6 + $0x170] sm:$0xf]  ;;  %v5038_v10 = vor.u32 %v5753_v57, %v5035_v61  ;;  %v5167_v12 = vld [vmem:[#allocation6 + $0x114] sm:$0xf0] }
 0x327   : > { %v5824_v45 = vld [vmem:[#allocation6 + $0x238] sm:$0xf0]  ;;  %v5785_v57 = vld [vmem:[#allocation6 + $0x100] sm:$0xf0]  ;;  %v5293_v61 = vld [vmem:[#allocation6 + $0x200] sm:$0xf] }
 0x328   : > { %2774 = vmatpush.bf16.msra.mxu0 %v4958_v16  ;;  %3168 = vmatpush.bf16.msrb.mxu1 %v5094_v17  ;;  %v5778_v16 = vld [vmem:[#allocation6 + $0xc8] sm:$0xf0] }
 0x329   : > { %3182 = vmatpush.bf16.msra.mxu2 %v5190_v20  ;;  %3200 = vmatpush.bf16.msrb.mxu3 %v5238_v21  ;;  %v5215_v20 = vld [vmem:[#allocation6 + $0x174] sm:$0xf0]  ;;  %v5130_v26 = vor.u32 %v5778_v16, %v5129_v29  ;;  %v5810_v29 = vld [vmem:[#allocation6 + $0x1cc] sm:$0xf] }
 0x32a   : > { %v5071_v21 = vld [vmem:[#allocation6 + $0x54] sm:$0xf0]  ;;  %v5218_v27 = vor.u32 %v5798_v19, %v5215_v20  ;;  %v5783_v20 = vld [vmem:[#allocation6 + $0xf4] sm:$0xf] }
 0x32b   : > { %v5074_v28 = vor.u32 %v5762_v18, %v5071_v21  ;;  %v5263_v16 = vld [vmem:[#allocation6 + $0x1d4] sm:$0xf0]  ;;  %v5155_v21 = vld [vmem:[#allocation6 + $0xfc] sm:$0xf0] }
 0x32c   : > { %2775 = vmatpush.bf16.msra.mxu0 %v4946_v31  ;;  %3169 = vmatpush.bf16.msrb.mxu1 %v5082_v32  ;;  %v5759_v31 = vld [vmem:[#allocation6 + $0x34] sm:$0xf]  ;;  %v5266_v19 = vor.u32 %v5810_v29, %v5263_v16  ;;  %v5245_v16 = vld [vmem:[#allocation6 + $0x1a0] sm:$0xf] }
 0x32d   : > { %3183 = vmatpush.bf16.msra.mxu2 %v5178_v34  ;;  %3201 = vmatpush.bf16.msrb.mxu3 %v5226_v35  ;;  %v5795_v32 = vld [vmem:[#allocation6 + $0x154] sm:$0xf]  ;;  %v5203_v34 = vld [vmem:[#allocation6 + $0x15c] sm:$0xf0]  ;;  %v5078_v35 = vor.u32 %v5764_v25, %v5077_v24  ;;  %v5062_v43 = vor.u32 %v5759_v31, %v5059_v36  ;;  %v5794_v25 = vld [vmem:[#allocation6 + $0x148] sm:$0xf0] }
 0x32e   : > { %2734 = vmatmul.bf16.vlgmr.msra.gmra.mxu1 %v6449_v39  ;;  %2748 = vmatmul.bf16.vlgmr.msrb.gmra.mxu2 %v6445_v15  ;;  %v5765_v15 = vld [vmem:[#allocation6 + $0x64] sm:$0xf]  ;;  %v5206_v42 = vor.u32 %v5795_v32, %v5203_v34  ;;  %v5197_v24 = vld [vmem:[#allocation6 + $0x140] sm:$0xf]  ;;  %v5804_v32 = vld [vmem:[#allocation6 + $0x19c] sm:$0xf] }
 0x32f   : > { %2776 = vmatmul.bf16.vlgmr.msra.gmra.mxu0 %v6449_v39  ;;  %v5046_v39 = vor.u32 %v5757_v0, %v5045_v63  ;;  %v5086_v17 = vor.u32 %v5765_v15, %v5083_v8  ;;  %v5813_v0 = vld [vmem:[#allocation6 + $0x1e4] sm:$0xf]  ;;  %v5800_v15 = vld [vmem:[#allocation6 + $0x178] sm:$0xf0]  ;;  %v5198_v31 = vor.u32 %v5794_v25, %v5197_v24  ;;  %v5239_v34 = vld [vmem:[#allocation6 + $0x1a4] sm:$0xf0] }
 0x330   : > { %3208 = vmatpush.bf16.msrb.mxu0 %v5122_v38  ;;  %3170 = vmatpush.bf16.msrb.mxu1 %v5070_v48  ;;  %v5299_v38 = vld [vmem:[#allocation6 + $0x21c] sm:$0xf0]  ;;  %v5191_v48 = vld [vmem:[#allocation6 + $0x144] sm:$0xf0]  ;;  %v5222_v14 = vor.u32 %v5800_v15, %v5221_v7  ;;  %v5791_v36 = vld [vmem:[#allocation6 + $0x130] sm:$0xf0] }
 0x331   : > { %3250 = vmatpush.bf16.msra.mxu3 %v5126_v40  ;;  %3184 = vmatpush.bf16.msra.mxu2 %v5166_v50  ;;  %v5065_v40 = vld [vmem:[#allocation6 + $0x38] sm:$0xf]  ;;  %v5302_v44 = vor.u32 %v5819_v37, %v5299_v38  ;;  %v5194_v56 = vor.u32 %v5792_v46, %v5191_v48  ;;  %v5242_v38 = vor.u32 %v5804_v32, %v5239_v34  ;;  %v5173_v46 = vld [vmem:[#allocation6 + $0x110] sm:$0xf]  ;;  %v5788_v48 = vld [vmem:[#allocation6 + $0x118] sm:$0xf0] }
 0x332   : > { %3202 = vmatmul.bf16.vlgmr.msrb.gmra.mxu3 %v6377_v58  ;;  %v5066_v50 = vor.u32 %v5761_v41, %v5065_v40  ;;  %v5777_v40 = vld [vmem:[#allocation6 + $0xc4] sm:$0xf]  ;;  %v5131_v41 = vld [vmem:[#allocation6 + $0xcc] sm:$0xf0]  ;;  %v5137_v7 = vld [vmem:[#allocation6 + $0xc8] sm:$0xf] }
 0x333   : > { %v5779_v15 = vld [vmem:[#allocation6 + $0xd0] sm:$0xf0]  ;;  %v5916_v24 = vld [vmem:[#allocation9 + $0x98] sm:$0xf0]  ;;  %v5918_v25 = vld [vmem:[#allocation9 + $0xac] sm:$0xf] }
 0x334   : > { %3209 = vmatpush.bf16.msrb.mxu0 %v5110_v53  ;;  %3171 = vmatpush.bf16.msrb.mxu1 %v5058_v62  ;;  %v5287_v53 = vld [vmem:[#allocation6 + $0x204] sm:$0xf0]  ;;  %v5789_v62 = vld [vmem:[#allocation6 + $0x124] sm:$0xf]  ;;  %v5395_v34 = vld [vmem:[#allocation9 + $0x9c] sm:$0xf0] }
 0x335   : > { %3251 = vmatpush.bf16.msra.mxu3 %v5114_v54  ;;  %3185 = vmatpush.bf16.msra.mxu2 %v5154_v9  ;;  %v5053_v54 = vld [vmem:[#allocation6 + $0x20] sm:$0xf]  ;;  %v5290_v60 = vor.u32 %v5816_v52, %v5287_v53  ;;  %v5179_v9 = vld [vmem:[#allocation6 + $0x12c] sm:$0xf0]  ;;  %v5174_v53 = vor.u32 %v5788_v48, %v5173_v46 }
 0x336   : > { %v5054_v63 = vor.u32 %v5758_v55, %v5053_v54  ;;  %v5182_v8 = vor.u32 %v5789_v62, %v5179_v9  ;;  %v5305_v54 = vld [vmem:[#allocation6 + $0x218] sm:$0xf]  ;;  %v5821_v55 = vld [vmem:[#allocation6 + $0x220] sm:$0xf0]  ;;  %v5818_v62 = vld [vmem:[#allocation6 + $0x208] sm:$0xf0] }
 0x337   : > { %v5149_v9 = vld [vmem:[#allocation6 + $0xe0] sm:$0xf] }
 0x338   : > { %3210 = vmatpush.bf16.msrb.mxu0 %v5098_v1  ;;  %3172 = vmatpush.bf16.msrb.mxu1 %v5046_v39  ;;  %v5275_v1 = vld [vmem:[#allocation6 + $0x1ec] sm:$0xf0]  ;;  %v5786_v39 = vld [vmem:[#allocation6 + $0x10c] sm:$0xf] }
 0x339   : > { %3252 = vmatpush.bf16.msra.mxu3 %v5102_v2  ;;  %3186 = vmatpush.bf16.msra.mxu2 %v5142_v13  ;;  %v5041_v2 = vld [vmem:[#allocation6 + $0x8] sm:$0xf]  ;;  %v5278_v11 = vor.u32 %v5813_v0, %v5275_v1  ;;  %v5170_v18 = vor.u32 %v5786_v39, %v5167_v12  ;;  %v5294_v0 = vor.u32 %v5818_v62, %v5293_v61  ;;  %v5812_v39 = vld [vmem:[#allocation6 + $0x1d8] sm:$0xf0]  ;;  %v5333_v61 = vld [vmem:[#allocation9 + $0x18] sm:$0xf] }
 0x33a   : > { %v5042_v13 = vor.u32 %v5755_v6, %v5041_v2  ;;  %v5281_v2 = vld [vmem:[#allocation6 + $0x1e8] sm:$0xf]  ;;  %v5815_v6 = vld [vmem:[#allocation6 + $0x1f0] sm:$0xf0]  ;;  %v5901_v62 = vld [vmem:[#allocation9 + $0x20] sm:$0xf0] }
 0x33c   : > { %3211 = vmatpush.bf16.msrb.mxu0 %v5086_v17  ;;  %3173 = vmatpush.bf16.msrb.mxu1 %v5034_v23  ;;  %v5209_v17 = vld [vmem:[#allocation6 + $0x158] sm:$0xf]  ;;  %v5251_v23 = vld [vmem:[#allocation6 + $0x1bc] sm:$0xf0] }
 0x33d   : > { %3253 = vmatpush.bf16.msra.mxu3 %v5090_v33  ;;  %3187 = vmatpush.bf16.msra.mxu2 %v5130_v26  ;;  %v5797_v33 = vld [vmem:[#allocation6 + $0x160] sm:$0xf0]  ;;  %v5158_v26 = vor.u32 %v5783_v20, %v5155_v21  ;;  %v5405_v21 = vld [vmem:[#allocation9 + $0xa8] sm:$0xf] }
 0x33e   : > { %v5210_v22 = vor.u32 %v5797_v33, %v5209_v17  ;;  %v5806_v17 = vld [vmem:[#allocation6 + $0x1a8] sm:$0xf0] }
 0x33f   : > { %3174 = vmatmul.bf16.vlgmr.msrb.gmra.mxu1 %v6373_v47  ;;  %v5246_v33 = vor.u32 %v5806_v17, %v5245_v16  ;;  %v5335_v16 = vld [vmem:[#allocation9 + $0x24] sm:$0xf0] }
 0x340   : > { %3222 = vmatpush.bf16.msra.mxu1 %v5218_v27  ;;  %3212 = vmatpush.bf16.msrb.mxu0 %v5074_v28  ;;  %v5254_v27 = vor.u32 %v5807_v4, %v5251_v23  ;;  %v5780_v28 = vld [vmem:[#allocation6 + $0xdc] sm:$0xf]  ;;  %v5393_v4 = vld [vmem:[#allocation9 + $0x90] sm:$0xf] }
 0x341   : > { %3236 = vmatpush.bf16.msrb.mxu2 %v5314_v30  ;;  %3254 = vmatpush.bf16.msra.mxu3 %v5078_v35  ;;  %v5143_v30 = vld [vmem:[#allocation6 + $0xe4] sm:$0xf0] }
 0x342   : > { %3188 = vmatmul.bf16.vlgmr.msra.gmra.mxu2 %v6375_v49  ;;  %v5185_v35 = vld [vmem:[#allocation6 + $0x128] sm:$0xf]  ;;  %v5146_v37 = vor.u32 %v5780_v28, %v5143_v30  ;;  %v5381_v28 = vld [vmem:[#allocation9 + $0x78] sm:$0xf]  ;;  %v5913_v30 = vld [vmem:[#allocation9 + $0x80] sm:$0xf0] }
 0x343   : > { %v5382_v32 = vor.u32 %v5913_v30, %v5381_v28 }
 0x344   : > { %3223 = vmatpush.bf16.msra.mxu1 %v5206_v42  ;;  %3213 = vmatpush.bf16.msrb.mxu0 %v5062_v43  ;;  %v5801_v42 = vld [vmem:[#allocation6 + $0x184] sm:$0xf]  ;;  %v5186_v43 = vor.u32 %v5791_v36, %v5185_v35  ;;  %v5369_v35 = vld [vmem:[#allocation9 + $0x60] sm:$0xf]  ;;  %v5910_v36 = vld [vmem:[#allocation9 + $0x68] sm:$0xf0] }
 0x345   : > { %3237 = vmatpush.bf16.msrb.mxu2 %v5302_v44  ;;  %3255 = vmatpush.bf16.msra.mxu3 %v5066_v50  ;;  %v5317_v44 = vld [vmem:[#allocation6 + $0x230] sm:$0xf]  ;;  %v5134_v50 = vor.u32 %v5777_v40, %v5131_v41  ;;  %v5912_v40 = vld [vmem:[#allocation9 + $0x7c] sm:$0xf]  ;;  %v5383_v41 = vld [vmem:[#allocation9 + $0x84] sm:$0xf0] }
 0x346   : > { %v5318_v52 = vor.u32 %v5824_v45, %v5317_v44  ;;  %v5907_v44 = vld [vmem:[#allocation9 + $0x50] sm:$0xf0]  ;;  %v5909_v45 = vld [vmem:[#allocation9 + $0x64] sm:$0xf] }
 0x348   : > { %3224 = vmatpush.bf16.msra.mxu1 %v5194_v56  ;;  %3214 = vmatpush.bf16.msrb.mxu0 %v5050_v59  ;;  %v5161_v56 = vld [vmem:[#allocation6 + $0xf8] sm:$0xf]  ;;  %v5306_v59 = vor.u32 %v5821_v55, %v5305_v54 }
 0x349   : > { %3238 = vmatpush.bf16.msrb.mxu2 %v5290_v60  ;;  %3256 = vmatpush.bf16.msra.mxu3 %v5054_v63  ;;  %v5162_v60 = vor.u32 %v5785_v57, %v5161_v56  ;;  %v5782_v63 = vld [vmem:[#allocation6 + $0xe8] sm:$0xf0] }
 0x34a   : > { %v5150_v1 = vor.u32 %v5782_v63, %v5149_v9  ;;  %v5906_v57 = vld [vmem:[#allocation9 + $0x4c] sm:$0xf]  ;;  %v5334_v9 = vor.u32 %v5901_v62, %v5333_v61  ;;  %v5453_v62 = vld [vmem:[#allocation9 + $0x108] sm:$0xf] }
 0x34c   : > { %3225 = vmatpush.bf16.msra.mxu1 %v5182_v8  ;;  %3215 = vmatpush.bf16.msrb.mxu0 %v5038_v10  ;;  %v5282_v8 = vor.u32 %v5815_v6, %v5281_v2  ;;  %v5138_v10 = vor.u32 %v5779_v15, %v5137_v7  ;;  %v5321_v15 = vld [vmem:[#allocation9] sm:$0xf] }
 0x34d   : > { %3239 = vmatpush.bf16.msrb.mxu2 %v5278_v11  ;;  %3257 = vmatpush.bf16.msra.mxu3 %v5042_v13  ;;  %v5269_v11 = vld [vmem:[#allocation6 + $0x1d0] sm:$0xf]  ;;  %v5257_v13 = vld [vmem:[#allocation6 + $0x1b8] sm:$0xf] }
 0x34e   : > { %v5270_v12 = vor.u32 %v5812_v39, %v5269_v11  ;;  %v5501_v11 = vld [vmem:[#allocation9 + $0x168] sm:$0xf]  ;;  %v5943_v39 = vld [vmem:[#allocation9 + $0x170] sm:$0xf0] }
 0x34f   : > { %3216 = vmatmul.bf16.vlgmr.msrb.gmra.mxu0 %v6373_v47 }
 0x350   : > { %3264 = vmatpush.bf16.msra.mxu0 %v5222_v14  ;;  %3226 = vmatpush.bf16.msra.mxu1 %v5170_v18  ;;  %v5809_v14 = vld [vmem:[#allocation6 + $0x1c0] sm:$0xf0]  ;;  %v5233_v18 = vld [vmem:[#allocation6 + $0x188] sm:$0xf] }
 0x351   : > { %3258 = vmatmul.bf16.vlgmr.msra.gmra.mxu3 %v6373_v47  ;;  %3240 = vmatpush.bf16.msrb.mxu2 %v5266_v19  ;;  %v5227_v47 = vld [vmem:[#allocation6 + $0x18c] sm:$0xf0]  ;;  %v5258_v29 = vor.u32 %v5809_v14, %v5257_v13  ;;  %v5803_v19 = vld [vmem:[#allocation6 + $0x190] sm:$0xf0]  ;;  %v5502_v13 = vor.u32 %v5943_v39, %v5501_v11  ;;  %v5503_v14 = vld [vmem:[#allocation9 + $0x174] sm:$0xf0] }
 0x352   : > { %v5230_v51 = vor.u32 %v5801_v42, %v5227_v47  ;;  %v5234_v20 = vor.u32 %v5803_v19, %v5233_v18  ;;  %v5386_v42 = vor.u32 %v5912_v40, %v5383_v41  ;;  %v5357_v47 = vld [vmem:[#allocation9 + $0x48] sm:$0xf]  ;;  %v5489_v19 = vld [vmem:[#allocation9 + $0x150] sm:$0xf] }
 0x353   : > { %v5358_v48 = vor.u32 %v5907_v44, %v5357_v47  ;;  %3817 = vmatpush.bf16.msrb.mxu3 %v5502_v13  ;;  %v5479_v40 = vld [vmem:[#allocation9 + $0x144] sm:$0xf0]  ;;  %v5497_v47 = vld [vmem:[#allocation9 + $0x158] sm:$0xf]  ;;  %v5941_v44 = vld [vmem:[#allocation9 + $0x160] sm:$0xf0] }
 0x354   : > { %3265 = vmatpush.bf16.msra.mxu0 %v5210_v22  ;;  %3227 = vmatpush.bf16.msra.mxu1 %v5158_v26  ;;  %v5919_v22 = vld [vmem:[#allocation9 + $0xb0] sm:$0xf0]  ;;  %v5407_v26 = vld [vmem:[#allocation9 + $0xb4] sm:$0xf0]  ;;  %v5473_v13 = vld [vmem:[#allocation9 + $0x128] sm:$0xf] }
 0x355   : > { %3241 = vmatpush.bf16.msrb.mxu2 %v5254_v27  ;;  %v5406_v23 = vor.u32 %v5919_v22, %v5405_v21  ;;  %v5410_v27 = vor.u32 %v5918_v25, %v5407_v26  ;;  %v5939_v21 = vld [vmem:[#allocation9 + $0x154] sm:$0xf]  ;;  %v5509_v26 = vld [vmem:[#allocation9 + $0x170] sm:$0xf] }
 0x358   : > { %3266 = vmatpush.bf16.msra.mxu0 %v5198_v31  ;;  %3228 = vmatpush.bf16.msra.mxu1 %v5146_v37  ;;  %v5915_v31 = vld [vmem:[#allocation9 + $0x94] sm:$0xf]  ;;  %v5370_v37 = vor.u32 %v5910_v36, %v5369_v35  ;;  %v5937_v35 = vld [vmem:[#allocation9 + $0x140] sm:$0xf0]  ;;  %v5936_v36 = vld [vmem:[#allocation9 + $0x13c] sm:$0xf] }
 0x359   : > { %3242 = vmatpush.bf16.msrb.mxu2 %v5242_v38 }
 0x35c   : > { %3267 = vmatpush.bf16.msra.mxu0 %v5186_v43  ;;  %3229 = vmatpush.bf16.msra.mxu1 %v5134_v50  ;;  %v5371_v50 = vld [vmem:[#allocation9 + $0x6c] sm:$0xf0] }
 0x35d   : > { %3243 = vmatpush.bf16.msrb.mxu2 %v5230_v51  ;;  %v5345_v51 = vld [vmem:[#allocation9 + $0x30] sm:$0xf] }
 0x35f   : > { %3230 = vmatmul.bf16.vlgmr.msra.gmra.mxu1 %v6375_v49 }
 0x360   : > { %3278 = vmatpush.bf16.msrb.mxu1 %v5318_v52  ;;  %3268 = vmatpush.bf16.msra.mxu0 %v5174_v53  ;;  %v5904_v52 = vld [vmem:[#allocation9 + $0x38] sm:$0xf0]  ;;  %v5374_v53 = vor.u32 %v5909_v45, %v5371_v50  ;;  %v5498_v45 = vor.u32 %v5941_v44, %v5497_v47  ;;  %v5934_v50 = vld [vmem:[#allocation9 + $0x128] sm:$0xf0] }
 0x361   : > { %3244 = vmatmul.bf16.vlgmr.msrb.gmra.mxu2 %v6377_v58  ;;  %v5346_v54 = vor.u32 %v5904_v52, %v5345_v51  ;;  %v5933_v51 = vld [vmem:[#allocation9 + $0x124] sm:$0xf] }
 0x362   : > { %3803 = vmatpush.bf16.msra.mxu2 %v5406_v23  ;;  %v5897_v23 = vld [vmem:[#allocation9 + $0x4] sm:$0xf] }
 0x364   : > { %3279 = vmatpush.bf16.msrb.mxu1 %v5306_v59  ;;  %3269 = vmatpush.bf16.msra.mxu0 %v5162_v60  ;;  %v5359_v59 = vld [vmem:[#allocation9 + $0x54] sm:$0xf0] }
 0x365   : > { %v5362_v60 = vor.u32 %v5906_v57, %v5359_v59  ;;  %v5485_v57 = vld [vmem:[#allocation9 + $0x140] sm:$0xf]  ;;  %v5938_v59 = vld [vmem:[#allocation9 + $0x148] sm:$0xf0] }
 0x368   : > { %3280 = vmatpush.bf16.msrb.mxu1 %v5294_v0  ;;  %3270 = vmatpush.bf16.msra.mxu0 %v5150_v1  ;;  %v5903_v0 = vld [vmem:[#allocation9 + $0x34] sm:$0xf]  ;;  %v5347_v1 = vld [vmem:[#allocation9 + $0x3c] sm:$0xf0] }
 0x369   : > { %v5350_v6 = vor.u32 %v5903_v0, %v5347_v1  ;;  %v5597_v0 = vld [vmem:[#allocation9 + $0x228] sm:$0xf] }
 0x36c   : > { %3281 = vmatpush.bf16.msrb.mxu1 %v5282_v8  ;;  %3271 = vmatpush.bf16.msra.mxu0 %v5138_v10  ;;  %v5898_v8 = vld [vmem:[#allocation9 + $0x8] sm:$0xf0] }
 0x36d   : > { %v5322_v10 = vor.u32 %v5898_v8, %v5321_v15  ;;  %v5967_v15 = vld [vmem:[#allocation9 + $0x230] sm:$0xf0]  ;;  %v5930_v8 = vld [vmem:[#allocation9 + $0x10c] sm:$0xf] }
 0x36e   : > { %v5598_v39 = vor.u32 %v5967_v15, %v5597_v0  ;;  %v5921_v0 = vld [vmem:[#allocation9 + $0xc4] sm:$0xf] }
 0x36f   : > { %3272 = vmatmul.bf16.vlgmr.msra.gmra.mxu0 %v6375_v49  ;;  %v5394_v49 = vor.u32 %v5916_v24, %v5393_v4  ;;  %v5491_v4 = vld [vmem:[#allocation9 + $0x15c] sm:$0xf0]  ;;  %v5323_v24 = vld [vmem:[#allocation9 + $0xc] sm:$0xf0] }
 0x370   : > { %3282 = vmatpush.bf16.msrb.mxu1 %v5270_v12  ;;  %v5942_v12 = vld [vmem:[#allocation9 + $0x16c] sm:$0xf]  ;;  %v5326_v25 = vor.u32 %v5897_v23, %v5323_v24  ;;  %3831 = vmatpush.bf16.msrb.mxu0 %v5598_v39 }
 0x371   : > { %3804 = vmatpush.bf16.msra.mxu2 %v5394_v49  ;;  %v5494_v49 = vor.u32 %v5939_v21, %v5491_v4  ;;  %v5964_v21 = vld [vmem:[#allocation9 + $0x218] sm:$0xf0]  ;;  %v5443_v4 = vld [vmem:[#allocation9 + $0xfc] sm:$0xf0]  ;;  %v5966_v39 = vld [vmem:[#allocation9 + $0x22c] sm:$0xf] }
 0x374   : > { %3283 = vmatpush.bf16.msrb.mxu1 %v5258_v29  ;;  %v5900_v29 = vld [vmem:[#allocation9 + $0x1c] sm:$0xf] }
 0x375   : > { %3805 = vmatpush.bf16.msra.mxu2 %v5382_v32  ;;  %v5338_v18 = vor.u32 %v5900_v29, %v5335_v16 }
 0x378   : > { %3284 = vmatpush.bf16.msrb.mxu1 %v5246_v33  ;;  %v5506_v33 = vor.u32 %v5942_v12, %v5503_v14  ;;  %v5935_v14 = vld [vmem:[#allocation9 + $0x130] sm:$0xf0] }
 0x379   : > { %3806 = vmatpush.bf16.msra.mxu2 %v5370_v37  ;;  %v5474_v16 = vor.u32 %v5935_v14, %v5473_v13  ;;  %v5926_v13 = vld [vmem:[#allocation9 + $0xe8] sm:$0xf0] }
 0x37c   : > { %3285 = vmatpush.bf16.msrb.mxu1 %v5234_v20  ;;  %v5940_v20 = vld [vmem:[#allocation9 + $0x158] sm:$0xf0] }
 0x37d   : > { %3807 = vmatpush.bf16.msra.mxu2 %v5358_v48  ;;  %v5490_v22 = vor.u32 %v5940_v20, %v5489_v19  ;;  %v5465_v48 = vld [vmem:[#allocation9 + $0x120] sm:$0xf]  ;;  %v5585_v19 = vld [vmem:[#allocation9 + $0x210] sm:$0xf] }
 0x37e   : > { %v5466_v52 = vor.u32 %v5934_v50, %v5465_v48  ;;  %v5586_v24 = vor.u32 %v5964_v21, %v5585_v19  ;;  %v5929_v48 = vld [vmem:[#allocation9 + $0x100] sm:$0xf0]  ;;  %v5955_v19 = vld [vmem:[#allocation9 + $0x1d0] sm:$0xf0] }
 0x37f   : > { %3286 = vmatmul.bf16.vlgmr.msrb.gmra.mxu1 %v6377_v58  ;;  %v5398_v58 = vor.u32 %v5915_v31, %v5395_v34  ;;  %3818 = vmatpush.bf16.msrb.mxu3 %v5490_v22  ;;  %v5477_v34 = vld [vmem:[#allocation9 + $0x138] sm:$0xf]  ;;  %v5927_v22 = vld [vmem:[#allocation9 + $0xf4] sm:$0xf] }
 0x380   : > { %3845 = vmatpush.bf16.msra.mxu1 %v5410_v27  ;;  %v5944_v27 = vld [vmem:[#allocation9 + $0x178] sm:$0xf0]  ;;  %v5478_v37 = vor.u32 %v5937_v35, %v5477_v34  ;;  %3832 = vmatpush.bf16.msrb.mxu0 %v5586_v24  ;;  %v5573_v34 = vld [vmem:[#allocation9 + $0x1f8] sm:$0xf]  ;;  %v5963_v21 = vld [vmem:[#allocation9 + $0x214] sm:$0xf] }
 0x381   : > { %3808 = vmatpush.bf16.msra.mxu2 %v5346_v54  ;;  %v5510_v30 = vor.u32 %v5944_v27, %v5509_v26  ;;  %v5932_v26 = vld [vmem:[#allocation9 + $0x118] sm:$0xf0]  ;;  %v5425_v24 = vld [vmem:[#allocation9 + $0xc8] sm:$0xf] }
 0x383   : > { %3819 = vmatpush.bf16.msrb.mxu3 %v5478_v37 }
 0x384   : > { %3846 = vmatpush.bf16.msra.mxu1 %v5398_v58 }
 0x385   : > { %3809 = vmatpush.bf16.msra.mxu2 %v5334_v9  ;;  %v5931_v9 = vld [vmem:[#allocation9 + $0x110] sm:$0xf0] }
 0x387   : > { %3820 = vmatpush.bf16.msrb.mxu3 %v5466_v52 }
 0x388   : > { %3847 = vmatpush.bf16.msra.mxu1 %v5386_v42  ;;  %v5482_v42 = vor.u32 %v5936_v36, %v5479_v40  ;;  %v5961_v40 = vld [vmem:[#allocation9 + $0x200] sm:$0xf0] }
 0x389   : > { %3810 = vmatpush.bf16.msra.mxu2 %v5322_v10  ;;  %v5455_v10 = vld [vmem:[#allocation9 + $0x114] sm:$0xf0]  ;;  %v5574_v47 = vor.u32 %v5961_v40, %v5573_v34 }
 0x38a   : > { %v5458_v12 = vor.u32 %v5930_v8, %v5455_v10 }
 0x38b   : > { %v6468_v46 = vpop.f32.mrf.mxu0  ;;  %3833 = vmatpush.bf16.msrb.mxu0 %v5574_v47 }
 0x38c   : > { %3848 = vmatpush.bf16.msra.mxu1 %v5374_v53  ;;  %v5467_v53 = vld [vmem:[#allocation9 + $0x12c] sm:$0xf0] }
 0x38d   : > { %3859 = vmatpush.bf16.msrb.mxu2 %v5506_v33  ;;  %v5470_v54 = vor.u32 %v5933_v51, %v5467_v53  ;;  %v5441_v33 = vld [vmem:[#allocation9 + $0xf0] sm:$0xf] }
 0x390   : > { %3849 = vmatpush.bf16.msra.mxu1 %v5362_v60  ;;  %v5486_v60 = vor.u32 %v5938_v59, %v5485_v57  ;;  %v5922_v57 = vld [vmem:[#allocation9 + $0xc8] sm:$0xf0]  ;;  %v5561_v59 = vld [vmem:[#allocation9 + $0x1e0] sm:$0xf] }
 0x391   : > { %v6466_v43 = vpop.f32.mrf.mxu3  ;;  %3860 = vmatpush.bf16.msrb.mxu2 %v5494_v49  ;;  %v5446_v49 = vor.u32 %v5927_v22, %v5443_v4  ;;  %v5587_v22 = vld [vmem:[#allocation9 + $0x21c] sm:$0xf0] }
 0x393   : > { %v6476_v2 = vpop.f32.mrf.mxu0 }
 0x394   : > { %3850 = vmatpush.bf16.msra.mxu1 %v5350_v6  ;;  %v5454_v6 = vor.u32 %v5931_v9, %v5453_v62  ;;  %v5958_v9 = vld [vmem:[#allocation9 + $0x1e8] sm:$0xf0] }
 0x395   : > { %3861 = vmatpush.bf16.msrb.mxu2 %v5482_v42  ;;  %v5924_v42 = vld [vmem:[#allocation9 + $0xdc] sm:$0xf]  ;;  %v5562_v8 = vor.u32 %v5958_v9, %v5561_v59  ;;  %v5593_v59 = vld [vmem:[#allocation9 + $0x218] sm:$0xf]  ;;  %v5513_v9 = vld [vmem:[#allocation9 + $0x180] sm:$0xf] }
 0x396   : > { %3821 = vmatpush.bf16.msrb.mxu3 %v5454_v6  ;;  %v5419_v6 = vld [vmem:[#allocation9 + $0xcc] sm:$0xf0] }
 0x397   : > { %v5422_v10 = vor.u32 %v5921_v0, %v5419_v6  ;;  %3834 = vmatpush.bf16.msrb.mxu0 %v5562_v8  ;;  %v5946_v0 = vld [vmem:[#allocation9 + $0x188] sm:$0xf0] }
 0x398   : > { %3851 = vmatpush.bf16.msra.mxu1 %v5338_v18  ;;  %v5928_v18 = vld [vmem:[#allocation9 + $0xf8] sm:$0xf0]  ;;  %v5514_v8 = vor.u32 %v5946_v0, %v5513_v9  ;;  %v5365_v9 = vld [vmem:[#allocation9 + $0x50] sm:$0xf] }
 0x399   : > { %v6474_v63 = vpop.f32.mrf.mxu3  ;;  %3862 = vmatpush.bf16.msrb.mxu2 %v5470_v54  ;;  %v5442_v20 = vor.u32 %v5928_v18, %v5441_v33  ;;  %v5417_v54 = vld [vmem:[#allocation9 + $0xc0] sm:$0xf]  ;;  %v5549_v18 = vld [vmem:[#allocation9 + $0x1c8] sm:$0xf]  ;;  %v5908_v0 = vld [vmem:[#allocation9 + $0x58] sm:$0xf0] }
 0x39a   : > { %v5418_v62 = vor.u32 %v5922_v57, %v5417_v54  ;;  %v5563_v54 = vld [vmem:[#allocation9 + $0x1ec] sm:$0xf0] }
 0x39b   : > { %v6464_v38 = vpop.f32.mrf.mxu1  ;;  %3822 = vmatpush.bf16.msrb.mxu3 %v5442_v20 }
 0x39c   : > { %v6482_v31 = vpop.f32.mrf.mxu0  ;;  %3852 = vmatpush.bf16.msra.mxu1 %v5326_v25  ;;  %v2680_v23 = vadd.f32 %v6464_v38, %v6468_v46  ;;  %v5461_v25 = vld [vmem:[#allocation9 + $0x110] sm:$0xf]  ;;  %v5431_v38 = vld [vmem:[#allocation9 + $0xe4] sm:$0xf0] }
 0x39d   : > { %3863 = vmatpush.bf16.msrb.mxu2 %v5458_v12  ;;  %v5462_v27 = vor.u32 %v5932_v26, %v5461_v25  ;;  %v5434_v44 = vor.u32 %v5924_v42, %v5431_v38  ;;  %v5437_v12 = vld [vmem:[#allocation9 + $0xe0] sm:$0xf]  ;;  %v5605_v42 = vld [vmem:[#allocation9 + $0x230] sm:$0xf]  ;;  %v5968_v38 = vld [vmem:[#allocation9 + $0x238] sm:$0xf0] }
 0x39e   : > { %v5438_v33 = vor.u32 %v5926_v13, %v5437_v12  ;;  %v5413_v13 = vld [vmem:[#allocation9 + $0xb0] sm:$0xf] }
 0x3a0   : > { %3901 = vmatpush.bf16.msrb.mxu1 %v5510_v30  ;;  %v5429_v30 = vld [vmem:[#allocation9 + $0xd8] sm:$0xf] }
 0x3a1   : > { %v6470_v55 = vpop.f32.mrf.mxu2  ;;  %3864 = vmatpush.bf16.msrb.mxu2 %v5446_v49  ;;  %v5923_v49 = vld [vmem:[#allocation9 + $0xd0] sm:$0xf0] }
 0x3a2   : > { %v2763_v28 = vpop.f32.mrf.mxu3  ;;  %v5426_v26 = vor.u32 %v5923_v49, %v5425_v24 }
 0x3a3   : > { %v6472_v56 = vpop.f32.mrf.mxu1 }
 0x3a4   : > { %3902 = vmatpush.bf16.msrb.mxu1 %v5498_v45  ;;  %v6492_v11 = vpop.f32.mrf.mxu0  ;;  %v5449_v45 = vld [vmem:[#allocation9 + $0xf8] sm:$0xf]  ;;  %v2682_v51 = vadd.f32 %v6472_v56, %v6476_v2 }
 0x3a5   : > { %v5450_v50 = vor.u32 %v5929_v48, %v5449_v45  ;;  %3865 = vmatpush.bf16.msrb.mxu2 %v5434_v44  ;;  %v5599_v56 = vld [vmem:[#allocation9 + $0x234] sm:$0xf0]  ;;  %v5949_v48 = vld [vmem:[#allocation9 + $0x1a0] sm:$0xf0] }
 0x3a6   : > { %v5602_v2 = vor.u32 %v5966_v39, %v5599_v56  ;;  %v5525_v45 = vld [vmem:[#allocation9 + $0x198] sm:$0xf] }
 0x3a7   : > { %v5551_v39 = vld [vmem:[#allocation9 + $0x1d4] sm:$0xf0] }
 0x3a8   : > { %3903 = vmatpush.bf16.msrb.mxu1 %v5486_v60 }
 0x3a9   : > { %v6478_v7 = vpop.f32.mrf.mxu2  ;;  %3866 = vmatpush.bf16.msrb.mxu2 %v5422_v10  ;;  %v5954_v10 = vld [vmem:[#allocation9 + $0x1cc] sm:$0xf] }
 0x3aa   : > { %v6490_v1 = vpop.f32.mrf.mxu3  ;;  %v2696_v15 = vadd.f32 %v6478_v7, %v2682_v51  ;;  %v5550_v7 = vor.u32 %v5955_v19, %v5549_v18  ;;  %v5526_v51 = vor.u32 %v5949_v48, %v5525_v45  ;;  %v5554_v12 = vor.u32 %v5954_v10, %v5551_v39  ;;  %v5951_v18 = vld [vmem:[#allocation9 + $0x1b4] sm:$0xf]  ;;  %v5539_v19 = vld [vmem:[#allocation9 + $0x1bc] sm:$0xf0]  ;;  %v5377_v45 = vld [vmem:[#allocation9 + $0x68] sm:$0xf] }
 0x3ab   : > { %v6480_v17 = vpop.f32.mrf.mxu1  ;;  %v5366_v10 = vor.u32 %v5908_v0, %v5365_v9 }
 0x3ac   : > { %3904 = vmatpush.bf16.msrb.mxu1 %v5474_v16  ;;  %v6504_v52 = vpop.f32.mrf.mxu0  ;;  %3835 = vmatpush.bf16.msrb.mxu0 %v5550_v7  ;;  %v5569_v7 = vld [vmem:[#allocation9 + $0x1e8] sm:$0xf] }
 0x3b0   : > { %3905 = vmatpush.bf16.msrb.mxu1 %v5462_v27 }
 0x3b1   : > { %v2749_v32 = vpop.f32.mrf.mxu2 }
 0x3b2   : > { %v6484_v58 = vadd.f32 %v2763_v28, %v2749_v32  ;;  %v2694_v28 = vadd.f32 %v6470_v55, %v2680_v23  ;;  %v5925_v32 = vld [vmem:[#allocation9 + $0xe0] sm:$0xf0]  ;;  %v6500_v55 = vld [vmem:[%s6568_s8] sm:$0x7]  ;;  %v5590_v23 = vor.u32 %v5963_v21, %v5587_v22  ;;  %v5959_v21 = vld [vmem:[#allocation9 + $0x1f0] sm:$0xf0]  ;;  %v5542_v22 = vor.u32 %v5951_v18, %v5539_v19 }
 0x3b3   : > { %v6486_v41 = vpop.f32.mrf.mxu1  ;;  %v5430_v37 = vor.u32 %v5925_v32, %v5429_v30  ;;  %v5537_v30 = vld [vmem:[#allocation9 + $0x1b0] sm:$0xf]  ;;  %v5952_v32 = vld [vmem:[#allocation9 + $0x1b8] sm:$0xf0] }
 0x3b4   : > { %3906 = vmatpush.bf16.msrb.mxu1 %v5450_v50  ;;  %v5538_v34 = vor.u32 %v5952_v32, %v5537_v30  ;;  %v5606_v50 = vor.u32 %v5968_v38, %v5605_v42  ;;  %v5557_v32 = vld [vmem:[#allocation9 + $0x1d0] sm:$0xf] }
 0x3b5   : > { %v3203_v35 = vpop.f32.mrf.mxu3  ;;  %3823 = vmatpush.bf16.msrb.mxu3 %v5430_v37  ;;  %v6508_v37 = vpop.f32.mrf.mxu0 }
 0x3b6   : > { %3836 = vmatpush.bf16.msrb.mxu0 %v5538_v34  ;;  %v5956_v34 = vld [vmem:[#allocation9 + $0x1d8] sm:$0xf0] }
 0x3b8   : > { %3907 = vmatpush.bf16.msrb.mxu1 %v5438_v33 }
 0x3b9   : > { %v6488_v61 = vpop.f32.mrf.mxu2  ;;  %3824 = vmatpush.bf16.msrb.mxu3 %v5418_v62 }
 0x3ba   : > { %3837 = vmatpush.bf16.msrb.mxu0 %v5526_v51  ;;  %v5953_v51 = vld [vmem:[#allocation9 + $0x1c0] sm:$0xf0] }
 0x3bc   : > { %v3175_v29 = vpop.f32.mrf.mxu1  ;;  %3908 = vmatpush.bf16.msrb.mxu1 %v5426_v26  ;;  %v5948_v26 = vld [vmem:[#allocation9 + $0x19c] sm:$0xf] }
 0x3bd   : > { %v3176_v46 = vadd.f32 %v3175_v29, %v2694_v28  ;;  %v3294_v29 = vperm.slane %v6500_v55, 0  ;;  %3873 = vmatpush.bf16.msra.mxu3 %v5602_v2  ;;  %v3205_v25 = vpop.f32.mrf.mxu3  ;;  %v5962_v2 = vld [vmem:[#allocation9 + $0x208] sm:$0xf0] }
 0x3be   : > { %3838 = vmatpush.bf16.msrb.mxu0 %v5514_v8  ;;  %v5950_v8 = vld [vmem:[#allocation9 + $0x1a8] sm:$0xf0] }
 0x3c1   : > { %3874 = vmatpush.bf16.msra.mxu3 %v5590_v23  ;;  %v2722_v23 = vadd.f32 %v6482_v31, %v6466_v43 }
 0x3c3   : > { %v2736_v49 = vadd.f32 %v6480_v17, %v2722_v23 }
 0x3c4   : > { %v3177_v60 = vpop.f32.mrf.mxu1 }
 0x3c5   : > { %v3189_v36 = vpop.f32.mrf.mxu2  ;;  %v3178_v16 = vadd.f32 %v3177_v60, %v2696_v15  ;;  %v5965_v60 = vld [vmem:[#allocation9 + $0x220] sm:$0xf0]  ;;  %v5581_v15 = vld [vmem:[#allocation9 + $0x200] sm:$0xf] }
 0x3c6   : > { %v3190_v53 = vadd.f32 %v3189_v36, %v3176_v46  ;;  %v5575_v36 = vld [vmem:[#allocation9 + $0x204] sm:$0xf0]  ;;  %v5594_v6 = vor.u32 %v5965_v60, %v5593_v59  ;;  %v5582_v33 = vor.u32 %v5962_v2, %v5581_v15  ;;  %v5533_v15 = vld [vmem:[#allocation9 + $0x1a0] sm:$0xf]  ;;  %v5353_v2 = vld [vmem:[#allocation9 + $0x38] sm:$0xf] }
 0x3c8   : > { %v3204_v14 = vadd.f32 %v3203_v35, %v3190_v53  ;;  %v5960_v35 = vld [vmem:[#allocation9 + $0x1fc] sm:$0xf]  ;;  %v5957_v53 = vld [vmem:[#allocation9 + $0x1e4] sm:$0xf] }
 0x3c9   : > { %v5578_v46 = vor.u32 %v5960_v35, %v5575_v36  ;;  %v5566_v62 = vor.u32 %v5957_v53, %v5563_v54  ;;  %v5914_v36 = vld [vmem:[#allocation9 + $0x88] sm:$0xf0]  ;;  %v5911_v54 = vld [vmem:[#allocation9 + $0x70] sm:$0xf0] }
 0x3ca   : > { %v3300_v27 = vadd.f32 %v3294_v29, %v3204_v14  ;;  %v5920_v14 = vld [vmem:[#allocation9 + $0xb8] sm:$0xf0]  ;;  %v5378_v60 = vor.u32 %v5911_v54, %v5377_v45 }
 0x3cb   : > { %3875 = vmatpush.bf16.msra.mxu3 %v5578_v46  ;;  %v5558_v46 = vor.u32 %v5956_v34, %v5557_v32 }
 0x3cc   : > { %v3306_v47 = vmax.f32 %v3300_v27, 0.0  ;;  %v3217_v56 = vpop.f32.mrf.mxu0  ;;  %v5527_v27 = vld [vmem:[#allocation9 + $0x1a4] sm:$0xf0] }
 0x3cd   : > { %v3191_v20 = vpop.f32.mrf.mxu2  ;;  %v5530_v35 = vor.u32 %v5948_v26, %v5527_v27  ;;  %v3218_v42 = vadd.f32 %v3217_v56, %v2736_v49  ;;  %v5329_v49 = vld [vmem:[#allocation9 + $0x8] sm:$0xf]  ;;  %v2766_v27 = vadd.f32 %v6490_v1, %v6488_v61 }
 0x3ce   : > { %v3192_v4 = vadd.f32 %v3191_v20, %v3178_v16  ;;  %v5401_v20 = vld [vmem:[#allocation9 + $0x98] sm:$0xf] }
 0x3cf   : > { %3876 = vmatpush.bf16.msra.mxu3 %v5566_v62 }
 0x3d0   : > { %v3206_v28 = vadd.f32 %v3205_v25, %v3192_v4  ;;  %v5917_v4 = vld [vmem:[#allocation9 + $0xa0] sm:$0xf0]  ;;  %v5570_v25 = vor.u32 %v5959_v21, %v5569_v7  ;;  %v5902_v7 = vld [vmem:[#allocation9 + $0x28] sm:$0xf0] }
 0x3d1   : > { %v5402_v24 = vor.u32 %v5917_v4, %v5401_v20  ;;  %v5341_v20 = vld [vmem:[#allocation9 + $0x20] sm:$0xf] }
 0x3d2   : > { %v3303_v40 = vadd.f32 %v3294_v29, %v3206_v28  ;;  %v5414_v29 = vor.u32 %v5920_v14, %v5413_v13  ;;  %v5389_v28 = vld [vmem:[#allocation9 + $0x80] sm:$0xf]  ;;  %v5534_v14 = vor.u32 %v5950_v8, %v5533_v15 }
 0x3d3   : > { %3877 = vmatpush.bf16.msra.mxu3 %v5554_v12  ;;  %v5390_v43 = vor.u32 %v5914_v36, %v5389_v28  ;;  %v5905_v12 = vld [vmem:[#allocation9 + $0x40] sm:$0xf0]  ;;  %v2778_v28 = vadd.f32 %v6504_v52, %v6484_v58 }
 0x3d4   : > { %v3309_v44 = vmax.f32 %v3303_v40, 0.0  ;;  %3887 = vmatpush.bf16.msra.mxu0 %v5414_v29  ;;  %v2724_v40 = vadd.f32 %v6492_v11, %v6474_v63  ;;  %v3219_v31 = vpop.f32.mrf.mxu0  ;;  %v3295_v11 = vperm.slane %v6500_v55, 1  ;;  %v5521_v29 = vld [vmem:[#allocation9 + $0x188] sm:$0xf]  ;;  %v3259_v21 = vpop.f32.mrf.mxu3 }
 0x3d5   : > { %v3260_v32 = vadd.f32 %v3259_v21, %v2778_v28 }
 0x3d6   : > { %v6510_v57 = vpack.c.bf16 %v3309_v44, %v3306_v47  ;;  %v2738_v17 = vadd.f32 %v6486_v41, %v2724_v40  ;;  %v5945_v47 = vld [vmem:[#allocation9 + $0x184] sm:$0xf]  ;;  %v5515_v44 = vld [vmem:[#allocation9 + $0x18c] sm:$0xf0] }
 0x3d7   : > { %3878 = vmatpush.bf16.msra.mxu3 %v5542_v22  ;;  %v5518_v53 = vor.u32 %v5945_v47, %v5515_v44 }
 0x3d8   : > { %3811 = vmatmul.bf16.vlgmr.msra.gmra.mxu2 %v6510_v57  ;;  %3853 = vmatmul.bf16.vlgmr.msra.gmra.mxu1 %v6510_v57  ;;  %v3220_v59 = vadd.f32 %v3219_v31, %v2738_v17  ;;  %v3296_v31 = vperm.slane %v6500_v55, 2  ;;  %v3411_v55 = vld [vmem:[%s6570_s10] sm:$0x7] }
 0x3d9   : > { %3915 = vmatpush.bf16.msra.mxu2 %v5606_v50  ;;  %3888 = vmatpush.bf16.msra.mxu0 %v5402_v24  ;;  %v5545_v50 = vld [vmem:[#allocation9 + $0x1b8] sm:$0xf]  ;;  %v5342_v24 = vor.u32 %v5902_v7, %v5341_v20 }
 0x3da   : > { %v5546_v41 = vor.u32 %v5953_v51, %v5545_v50  ;;  %v3414_v51 = vperm.slane %v3411_v55, 1 }
 0x3db   : > { %3879 = vmatpush.bf16.msra.mxu3 %v5530_v35  ;;  %v2780_v35 = vadd.f32 %v6508_v37, %v2766_v27 }
 0x3dc   : > { %v3231_v16 = vpop.f32.mrf.mxu1  ;;  %v3261_v34 = vpop.f32.mrf.mxu3 }
 0x3dd   : > { %3916 = vmatpush.bf16.msra.mxu2 %v5594_v6  ;;  %v3232_v38 = vadd.f32 %v3231_v16, %v3218_v42  ;;  %3889 = vmatpush.bf16.msra.mxu0 %v5390_v43  ;;  %v5947_v16 = vld [vmem:[#allocation9 + $0x190] sm:$0xf0]  ;;  %v3262_v42 = vadd.f32 %v3261_v34, %v2780_v35 }
 0x3de   : > { %v5522_v4 = vor.u32 %v5947_v16, %v5521_v29 }
 0x3df   : > { %3880 = vmatpush.bf16.msra.mxu3 %v5518_v53  ;;  %v3413_v53 = vperm.slane %v3411_v55, 0 }
 0x3e1   : > { %3917 = vmatpush.bf16.msra.mxu2 %v5582_v33  ;;  %3890 = vmatpush.bf16.msra.mxu0 %v5378_v60  ;;  %v5354_v33 = vor.u32 %v5905_v12, %v5353_v2 }
 0x3e4   : > { %v3245_v30 = vpop.f32.mrf.mxu2  ;;  %v3233_v48 = vpop.f32.mrf.mxu1 }
 0x3e5   : > { %3918 = vmatpush.bf16.msra.mxu2 %v5570_v25  ;;  %v3246_v63 = vadd.f32 %v3245_v30, %v3232_v38  ;;  %v3234_v62 = vadd.f32 %v3233_v48, %v3220_v59  ;;  %3891 = vmatpush.bf16.msra.mxu0 %v5366_v10  ;;  %v5899_v25 = vld [vmem:[#allocation9 + $0x10] sm:$0xf0] }
 0x3e6   : > { %v5330_v26 = vor.u32 %v5899_v25, %v5329_v49 }
 0x3e7   : > { %v3301_v39 = vadd.f32 %v3295_v11, %v3246_v63 }
 0x3e9   : > { %3919 = vmatpush.bf16.msra.mxu2 %v5558_v46  ;;  %v3307_v18 = vmax.f32 %v3301_v39, 0.0  ;;  %3892 = vmatpush.bf16.msra.mxu0 %v5354_v33 }
 0x3ec   : > { %v3247_v6 = vpop.f32.mrf.mxu2  ;;  %v3273_v23 = vpop.f32.mrf.mxu0 }
 0x3ed   : > { %v3248_v56 = vadd.f32 %v3247_v6, %v3234_v62  ;;  %3920 = vmatpush.bf16.msra.mxu2 %v5546_v41  ;;  %3893 = vmatpush.bf16.msra.mxu0 %v5342_v24  ;;  %v3274_v36 = vadd.f32 %v3273_v23, %v3260_v32 }
 0x3ef   : > { %v3304_v13 = vadd.f32 %v3295_v11, %v3248_v56 }
 0x3f1   : > { %v3310_v19 = vmax.f32 %v3304_v13, 0.0  ;;  %3921 = vmatpush.bf16.msra.mxu2 %v5534_v14  ;;  %3894 = vmatpush.bf16.msra.mxu0 %v5330_v26  ;;  %v3415_v14 = vperm.slane %v3411_v55, 2 }
 0x3f3   : > { %v3409_v22 = vpack.c.bf16 %v3310_v19, %v3307_v18 }
 0x3f4   : > { %v3275_v40 = vpop.f32.mrf.mxu0 }
 0x3f5   : > { %3825 = vmatmul.bf16.vlgmr.msrb.gmra.mxu3 %v3409_v22  ;;  %3867 = vmatmul.bf16.vlgmr.msrb.gmra.mxu2 %v3409_v22  ;;  %v3276_v17 = vadd.f32 %v3275_v40, %v3262_v42 }
 0x3f6   : > { %3909 = vmatmul.bf16.vlgmr.msrb.gmra.mxu1 %v3409_v22  ;;  %3922 = vmatpush.bf16.msra.mxu2 %v5522_v4 }
 0x3fc   : > { %v3287_v30 = vpop.f32.mrf.mxu1 }
 0x3fd   : > { %v3288_v43 = vadd.f32 %v3287_v30, %v3274_v36 }
 0x3ff   : > { %v3302_v46 = vadd.f32 %v3296_v31, %v3288_v43 }
 0x401   : > { %v3308_v1 = vmax.f32 %v3302_v46, 0.0 }
 0x404   : > { %v3289_v38 = vpop.f32.mrf.mxu1 }
 0x405   : > { %v3290_v47 = vadd.f32 %v3289_v38, %v3276_v17 }
 0x407   : > { %v3305_v61 = vadd.f32 %v3296_v31, %v3290_v47 }
 0x409   : > { %v3311_v44 = vmax.f32 %v3305_v61, 0.0 }
 0x40b   : > { %v3410_v58 = vpack.c.bf16 %v3311_v44, %v3308_v1 }
 0x40d   : > { %3839 = vmatmul.bf16.vlgmr.msrb.gmra.mxu0 %v3410_v58  ;;  %3881 = vmatmul.bf16.vlgmr.msra.gmra.mxu3 %v3410_v58 }
 0x40e   : > { %3923 = vmatmul.bf16.vlgmr.msra.gmra.mxu2 %v3410_v58 }
 0x41d   : > { %3895 = vmatmul.bf16.vlgmr.msra.gmra.mxu0 %v6510_v57 }
 0x455   : > { %v3854_v48 = vpop.f32.mrf.mxu1 }
 0x456   : > { %v3855_v63 = vadd.f32 %v3854_v48, %v3414_v51 }
 0x45b   : > { %v3812_v52 = vpop.f32.mrf.mxu2 }
 0x45c   : > { %v3813_v11 = vadd.f32 %v3812_v52, %v3413_v53 }
 0x45d   : > { %v3856_v57 = vpop.f32.mrf.mxu1 }
 0x45e   : > { %v3857_v39 = vadd.f32 %v3856_v57, %v3414_v51 }
 0x463   : > { %v3814_v45 = vpop.f32.mrf.mxu2 }
 0x464   : > { %v3815_v8 = vadd.f32 %v3814_v45, %v3413_v53 }
 0x473   : > { %v3910_v19 = vpop.f32.mrf.mxu1 }
 0x478   : > { %v3826_v37 = vpop.f32.mrf.mxu3  ;;  %v3868_v54 = vpop.f32.mrf.mxu2 }
 0x479   : > { %v3869_v60 = vadd.f32 %v3868_v54, %v3855_v63  ;;  %v3827_v62 = vadd.f32 %v3826_v37, %v3813_v11 }
 0x47b   : > { %v3912_v17 = vpop.f32.mrf.mxu1 }
 0x480   : > { %v3828_v50 = vpop.f32.mrf.mxu3  ;;  %v3870_v10 = vpop.f32.mrf.mxu2 }
 0x481   : > { %v3829_v2 = vadd.f32 %v3828_v50, %v3815_v8  ;;  %v3871_v13 = vadd.f32 %v3870_v10, %v3857_v39 }
 0x48a   : > { %v3840_v59 = vpop.f32.mrf.mxu0 }
 0x48b   : > { %v3841_v0 = vadd.f32 %v3840_v59, %v3827_v62 }
 0x48d   : > { %v3929_v12 = vmax.f32 %v3841_v0, 0.0 }
 0x48f   : > { %v3938_v20 = vrot.slane %v3929_v12, 4 }
 0x490   : > { %v3882_v41 = vpop.f32.mrf.mxu3 }
 0x491   : > { %v3883_v9 = vadd.f32 %v3882_v41, %v3869_v60  ;;  %v3924_v23 = vpop.f32.mrf.mxu2  ;;  %v3939_v26 = vadd.f32 %v3938_v20, %v3929_v12 }
 0x492   : > { %v3842_v6 = vpop.f32.mrf.mxu0 }
 0x493   : > { %v3930_v15 = vmax.f32 %v3883_v9, 0.0  ;;  %v3843_v16 = vadd.f32 %v3842_v6, %v3829_v2  ;;  %v3940_v36 = vrot.slane %v3939_v26, 2 }
 0x495   : > { %v3944_v56 = vrot.slane %v3930_v15, 4  ;;  %v3932_v24 = vmax.f32 %v3843_v16, 0.0  ;;  %v3941_v1 = vadd.f32 %v3940_v36, %v3939_v26 }
 0x497   : > { %v3945_v29 = vadd.f32 %v3944_v56, %v3930_v15  ;;  %v3935_v32 = vsel %vm1981_vm0, %v3932_v24, 0.0  ;;  %v3942_v51 = vrot.slane %v3941_v1, 1 }
 0x498   : > { %v3884_v33 = vpop.f32.mrf.mxu3  ;;  %v3971_v42 = vrot.slane %v3935_v32, 4 }
 0x499   : > { %v3885_v18 = vadd.f32 %v3884_v33, %v3871_v13  ;;  %v3946_v4 = vrot.slane %v3945_v29, 2  ;;  %v3926_v44 = vpop.f32.mrf.mxu2  ;;  %v3943_v41 = vadd.f32 %v3942_v51, %v3941_v1 }
 0x49a   : > { %v3896_v7 = vpop.f32.mrf.mxu0  ;;  %v3972_v58 = vadd.f32 %v3971_v42, %v3935_v32 }
 0x49b   : > { %v3933_v21 = vmax.f32 %v3885_v18, 0.0  ;;  %v3897_v22 = vadd.f32 %v3896_v7, %v3415_v14  ;;  %v3947_v30 = vadd.f32 %v3946_v4, %v3945_v29 }
 0x49c   : > { %v3973_v53 = vrot.slane %v3972_v58, 2 }
 0x49d   : > { %v3936_v49 = vsel %vm1981_vm0, %v3933_v21, 0.0  ;;  %v3911_v25 = vadd.f32 %v3910_v19, %v3897_v22  ;;  %v3948_v38 = vrot.slane %v3947_v30, 1 }
 0x49e   : > { %v3977_v27 = vrot.slane %v3936_v49, 4  ;;  %v3974_v0 = vadd.f32 %v3973_v53, %v3972_v58 }
 0x49f   : > { %v3925_v28 = vadd.f32 %v3924_v23, %v3911_v25  ;;  %v3949_v45 = vadd.f32 %v3948_v38, %v3947_v30 }
 0x4a0   : > { %v3978_v34 = vadd.f32 %v3977_v27, %v3936_v49  ;;  %v3975_v3 = vrot.slane %v3974_v0, 1 }
 0x4a1   : > { %v3931_v35 = vmax.f32 %v3925_v28, 0.0  ;;  %v3959_v63 = vrot.slane %v3949_v45, 7 }
 0x4a2   : > { %v3898_v40 = vpop.f32.mrf.mxu0  ;;  %v3979_v46 = vrot.slane %v3978_v34, 2  ;;  %v3976_v13 = vadd.f32 %v3975_v3, %v3974_v0 }
 0x4a3   : > { %v3950_v43 = vrot.slane %v3931_v35, 4  ;;  %v3899_v31 = vadd.f32 %v3898_v40, %v3415_v14  ;;  %v3962_v6 = vsel %vm3961_vm11, %v3943_v41, %v3959_v63 }
 0x4a4   : > { %v3980_v55 = vadd.f32 %v3979_v46, %v3978_v34 }
 0x4a5   : > { %v3951_v47 = vadd.f32 %v3950_v43, %v3931_v35  ;;  %v3913_v61 = vadd.f32 %v3912_v17, %v3899_v31 }
 0x4a6   : > { %v3981_v60 = vrot.slane %v3980_v55, 1 }
 0x4a7   : > { %v3952_v52 = vrot.slane %v3951_v47, 2  ;;  %v3927_v37 = vadd.f32 %v3926_v44, %v3913_v61 }
 0x4a8   : > { %v3982_v8 = vadd.f32 %v3981_v60, %v3980_v55 }
 0x4a9   : > { %v3953_v48 = vadd.f32 %v3952_v52, %v3951_v47  ;;  %v3934_v50 = vmax.f32 %v3927_v37, 0.0 }
 0x4aa   : > { %v3992_v2 = vrot.slane %v3982_v8, 7 }
 0x4ab   : > { %v3954_v54 = vrot.slane %v3953_v48, 1  ;;  %v3937_v59 = vsel %vm1981_vm0, %v3934_v50, 0.0 }
 0x4ac   : > { %v3983_v11 = vrot.slane %v3937_v59, 4  ;;  %v3994_v29 = vsel %vm3961_vm11, %v3976_v13, %v3992_v2 }
 0x4ad   : > { %v3955_v62 = vadd.f32 %v3954_v54, %v3953_v48 }
 0x4ae   : > { %v3984_v9 = vadd.f32 %v3983_v11, %v3937_v59 }
 0x4af   : > { %v3960_v5 = vrot.slane %v3955_v62, 6 }
 0x4b0   : > { %v3985_v15 = vrot.slane %v3984_v9, 2 }
 0x4b1   : > { %v3964_v10 = vsel %vm3963_vm12, %v3962_v6, %v3960_v5 }
 0x4b2   : > { %3970 = vst.msk [vmem:[%s521_s13] sm:$0x7] %vm6539_vm13, %v3964_v10  ;;  %v3986_v39 = vadd.f32 %v3985_v15, %v3984_v9 }
 0x4b4   : > { %v3987_v56 = vrot.slane %v3986_v39, 1 }
 0x4b6   : > { %v3988_v12 = vadd.f32 %v3987_v56, %v3986_v39 }
 0x4b8   : > { %v3993_v14 = vrot.slane %v3988_v12, 6 }
 0x4ba   : > { %v3995_v16 = vsel %vm3963_vm12, %v3994_v29, %v3993_v14 }
 0x4bb   : > { %3997 = vst.msk [vmem:[%s525_s26] sm:$0x7] %vm6539_vm13, %v3995_v16 }
 0x4bc PF: > { %s26_s21 = sadd.s32 1, %s6214_s21  }
 0x4bd   : > { %p23_p7 = scmp.ge.s32.totalorder %s26_s21, 4  }
 0x4bf   :  { %25 = sbr.rel (!%p23_p7) target bundleno = 6 (0x6), region = 130 }
 0x4c4   :  { %4031 = vsyncpa [#allocation3], 1 }
 0x4c5   :  { %4033 = vsyncpa [#allocation3 + $0x1], 1 }
 0x4c6   :  { %4034 = vsyncpa [#allocation5], 1 }
 0x4c7   :  { %4035 = vsyncpa [#allocation8], 1 }

</bundles_post_ra>
